<compile_context>
chip_gen: v6e
topology: v6e:2x2x1
jax: 0.10.0
libtpu: 0.0.40
codegen_flags: <defaults>
</compile_context>

<pallas_src>
import functools

import jax
import jax.numpy as jnp
from jax.experimental import pallas as pl
from jax.experimental.pallas import tpu as pltpu


def _conv_bn_relu_kernel(x_ref, w_ref, b_ref, o_ref, *, k):
    # x_ref: (N, H+2p, W+2p, Cin)  padded NHWC input (compute dtype)
    # w_ref: (k*k*Cin, CP)         BN-scale-folded weights, CP = Cout padded to 128
    # b_ref: (1, CP)               folded BN bias (f32)
    # o_ref: (N, Ho, Wo, CP)       lane-dense output
    N, Ho, Wo, CP = o_ref.shape
    Cin = x_ref.shape[3]

    x = x_ref[...]

    # im2col: one concat + one reshape -> a single (N*Ho*Wo, k*k*Cin) slab,
    # so one MXU matmul replaces k*k tiny (Cin-deep) pushes.
    pieces = [x[:, kh:kh + Ho, kw:kw + Wo, :]
              for kh in range(k) for kw in range(k)]
    slab = jnp.concatenate(pieces, axis=-1).reshape(N * Ho * Wo, k * k * Cin)

    acc = jnp.dot(slab, w_ref[...], preferred_element_type=jnp.float32)
    y = jnp.maximum(acc + b_ref[...], 0.0)            # folded-BN bias + ReLU
    o_ref[...] = y.reshape(N, Ho, Wo, CP).astype(o_ref.dtype)


def conv_bn_relu(x_nchw, w_oihw, gamma, beta, run_mean, run_var, eps=1e-5,
                 compute_dtype=jnp.float32):
    """Fused Conv2d(pad=(k-1)//2, stride=1, no bias) + BatchNorm2d(eval) + ReLU.

    compute_dtype=jnp.bfloat16 selects the bf16 MXU fast path (f32 accumulate).
    """
    N, Cin, H, W = x_nchw.shape
    Cout, Cin2, k, k2 = w_oihw.shape
    assert Cin == Cin2 and k == k2

    pad = (k - 1) // 2
    Ho = H + 2 * pad - k + 1          # matches PyTorch for odd AND even k
    Wo = W + 2 * pad - k + 1
    CP = ((Cout + 127) // 128) * 128  # lane-dense padded output channels

    # ---- BN folding (eval mode): y = scale*conv + bias, scale folded into w.
    inv_std = 1.0 / jnp.sqrt(run_var + eps)
    scale = gamma * inv_std                               # (Cout,)
    bias = beta - run_mean * scale                        # (Cout,)

    w = w_oihw * scale[:, None, None, None]               # OIHW, scale-folded
    w = jnp.transpose(w, (2, 3, 1, 0)).reshape(k * k * Cin, Cout)  # (kh,kw,ci)
    w = jnp.pad(w, ((0, 0), (0, CP - Cout))).astype(compute_dtype)
    bias_p = jnp.pad(bias, (0, CP - Cout)).reshape(1, CP).astype(jnp.float32)

    # ---- layout glue: NCHW -> NHWC (channels on lanes) + conv padding.
    x = jnp.transpose(x_nchw, (0, 2, 3, 1))
    x = jnp.pad(x, ((0, 0), (pad, pad), (pad, pad), (0, 0))).astype(compute_dtype)

    kernel = functools.partial(_conv_bn_relu_kernel, k=k)
    out_nhwc = pl.pallas_call(
        kernel,
        out_shape=jax.ShapeDtypeStruct((N, Ho, Wo, CP), x_nchw.dtype),
        in_specs=[
            pl.BlockSpec(memory_space=pltpu.MemorySpace.VMEM),
            pl.BlockSpec(memory_space=pltpu.MemorySpace.VMEM),
            pl.BlockSpec(memory_space=pltpu.MemorySpace.VMEM),
        ],
        out_specs=pl.BlockSpec(memory_space=pltpu.MemorySpace.VMEM),
    )(x, w, bias_p)

    out = out_nhwc[..., :Cout]                            # drop lane padding
    return jnp.transpose(out, (0, 3, 1, 2))               # back to NCHW


def _reference(x_nchw, w_oihw, gamma, beta, run_mean, run_var, eps=1e-5):
    # Pure-JAX reference (conv + eval-mode BN + ReLU) for validation.
    pad = (w_oihw.shape[2] - 1) // 2
    conv = jax.lax.conv_general_dilated(
        x_nchw, w_oihw, window_strides=(1, 1),
        padding=((pad, pad), (pad, pad)),
        dimension_numbers=("NCHW", "OIHW", "NCHW"))
    inv_std = 1.0 / jnp.sqrt(run_var + eps)
    scale = (gamma * inv_std)[None, :, None, None]
    shift = (beta - run_mean * gamma * inv_std)[None, :, None, None]
    return jnp.maximum(conv * scale + shift, 0.0)


if __name__ == "__main__":
    key = jax.random.PRNGKey(0)
    k1, k2, k3, k4, k5, k6 = jax.random.split(key, 6)

    # Small shapes consistent with the module: convolution(k=3, inp_dim=4, out_dim=8)
    N, Cin, H, W = 2, 4, 16, 16
    Cout, ksz = 8, 3

    x = jax.random.normal(k1, (N, Cin, H, W), dtype=jnp.float32)
    w = jax.random.normal(k2, (Cout, Cin, ksz, ksz), dtype=jnp.float32) * 0.1
    gamma = jax.random.normal(k3, (Cout,), dtype=jnp.float32) * 0.1 + 1.0
    beta = jax.random.normal(k4, (Cout,), dtype=jnp.float32) * 0.1
    run_mean = jax.random.normal(k5, (Cout,), dtype=jnp.float32) * 0.1
    run_var = jax.random.uniform(k6, (Cout,), dtype=jnp.float32,
                                 minval=0.5, maxval=1.5)

    ref = _reference(x, w, gamma, beta, run_mean, run_var)

    # f32 path: bit-level-tight vs reference.
    out = conv_bn_relu(x, w, gamma, beta, run_mean, run_var)
    out = jax.block_until_ready(out)
    assert out.shape == (N, Cout, H, W)
    assert jnp.allclose(out, ref, atol=1e-4, rtol=1e-4), "f32 mismatch vs reference"

    # bf16 MXU fast path (portable v5e/v6e/v7x), f32 accumulation.
    out_bf16 = conv_bn_relu(x, w, gamma, beta, run_mean, run_var,
                            compute_dtype=jnp.bfloat16)
    out_bf16 = jax.block_until_ready(out_bf16)
    assert out_bf16.shape == (N, Cout, H, W)
    assert jnp.allclose(out_bf16, ref, atol=5e-2, rtol=5e-2), "bf16 mismatch vs reference"

    print("KERNEL_OK")
</pallas_src>

<mosaic_0001>
module attributes {stable_mosaic.version = 11 : i64} {
  func.func @_conv_bn_relu_kernel(%arg0: memref<2x18x18x4xf32, #tpu.memory_space<vmem>>, %arg1: memref<36x128xf32, #tpu.memory_space<vmem>>, %arg2: memref<1x128xf32, #tpu.memory_space<vmem>>, %arg3: memref<2x16x16x128xf32, #tpu.memory_space<vmem>>) attributes {dimension_semantics = [], scalar_prefetch = 0 : i64, scratch_operands = 0 : i64, tpu.core_type = #tpu.core_type<tc>} {
    %c0 = arith.constant 0 : index
    %c0_0 = arith.constant 0 : index
    %c0_1 = arith.constant 0 : index
    %c0_2 = arith.constant 0 : index
    %0 = vector.load %arg0[%c0, %c0_0, %c0_1, %c0_2] : memref<2x18x18x4xf32, #tpu.memory_space<vmem>>, vector<2x18x18x4xf32>
    %1 = vector.extract_strided_slice %0 {offsets = [0, 0, 0, 0], sizes = [2, 16, 16, 4], strides = [1, 1, 1, 1]} : vector<2x18x18x4xf32> to vector<2x16x16x4xf32>
    %2 = vector.extract_strided_slice %0 {offsets = [0, 0, 1, 0], sizes = [2, 16, 16, 4], strides = [1, 1, 1, 1]} : vector<2x18x18x4xf32> to vector<2x16x16x4xf32>
    %3 = vector.extract_strided_slice %0 {offsets = [0, 0, 2, 0], sizes = [2, 16, 16, 4], strides = [1, 1, 1, 1]} : vector<2x18x18x4xf32> to vector<2x16x16x4xf32>
    %4 = vector.extract_strided_slice %0 {offsets = [0, 1, 0, 0], sizes = [2, 16, 16, 4], strides = [1, 1, 1, 1]} : vector<2x18x18x4xf32> to vector<2x16x16x4xf32>
    %5 = vector.extract_strided_slice %0 {offsets = [0, 1, 1, 0], sizes = [2, 16, 16, 4], strides = [1, 1, 1, 1]} : vector<2x18x18x4xf32> to vector<2x16x16x4xf32>
    %6 = vector.extract_strided_slice %0 {offsets = [0, 1, 2, 0], sizes = [2, 16, 16, 4], strides = [1, 1, 1, 1]} : vector<2x18x18x4xf32> to vector<2x16x16x4xf32>
    %7 = vector.extract_strided_slice %0 {offsets = [0, 2, 0, 0], sizes = [2, 16, 16, 4], strides = [1, 1, 1, 1]} : vector<2x18x18x4xf32> to vector<2x16x16x4xf32>
    %8 = vector.extract_strided_slice %0 {offsets = [0, 2, 1, 0], sizes = [2, 16, 16, 4], strides = [1, 1, 1, 1]} : vector<2x18x18x4xf32> to vector<2x16x16x4xf32>
    %9 = vector.extract_strided_slice %0 {offsets = [0, 2, 2, 0], sizes = [2, 16, 16, 4], strides = [1, 1, 1, 1]} : vector<2x18x18x4xf32> to vector<2x16x16x4xf32>
    %10 = tpu.concatenate %1, %2, %3, %4, %5, %6, %7, %8, %9 in 3 : vector<2x16x16x4xf32>, vector<2x16x16x4xf32>, vector<2x16x16x4xf32>, vector<2x16x16x4xf32>, vector<2x16x16x4xf32>, vector<2x16x16x4xf32>, vector<2x16x16x4xf32>, vector<2x16x16x4xf32>, vector<2x16x16x4xf32> -> vector<2x16x16x36xf32>
    %11 = vector.shape_cast %10 : vector<2x16x16x36xf32> to vector<512x36xf32>
    %c0_3 = arith.constant 0 : index
    %c0_4 = arith.constant 0 : index
    %12 = vector.load %arg1[%c0_3, %c0_4] : memref<36x128xf32, #tpu.memory_space<vmem>>, vector<36x128xf32>
    %cst = arith.constant dense<0.000000e+00> : vector<512x128xf32>
    %13 = tpu.matmul %11, %12, %cst {dimension_numbers = #tpu.dot_dimension_numbers<[1], [0], [0], [1], [0, 0, 1, 1], [], []>} : vector<512x36xf32>, vector<36x128xf32>, vector<512x128xf32> -> vector<512x128xf32>
    %c0_5 = arith.constant 0 : index
    %c0_6 = arith.constant 0 : index
    %14 = vector.load %arg2[%c0_5, %c0_6] : memref<1x128xf32, #tpu.memory_space<vmem>>, vector<1x128xf32>
    %15 = vector.broadcast %14 : vector<1x128xf32> to vector<512x128xf32>
    %16 = arith.addf %13, %15 : vector<512x128xf32>
    %cst_7 = arith.constant 0.000000e+00 : f32
    %17 = vector.broadcast %cst_7 : f32 to vector<512x128xf32>
    %18 = arith.maximumf %16, %17 : vector<512x128xf32>
    %19 = vector.shape_cast %18 : vector<512x128xf32> to vector<2x16x16x128xf32>
    %c0_8 = arith.constant 0 : index
    %c0_9 = arith.constant 0 : index
    %c0_10 = arith.constant 0 : index
    %c0_11 = arith.constant 0 : index
    %20 = vector.load %arg3[%c0_8, %c0_9, %c0_10, %c0_11] : memref<2x16x16x128xf32, #tpu.memory_space<vmem>>, vector<2x16x16x128xf32>
    tpu.vector_store %arg3[%c0_8, %c0_9, %c0_10, %c0_11], %19 {strides = array<i32>} : memref<2x16x16x128xf32, #tpu.memory_space<vmem>>, vector<2x16x16x128xf32>,
    return
  }
}

</mosaic_0001>

<bundles_post_ra>
// kernel: tpu_custom_call.1
= control target key start
LH: loop header
LB: loop body
LE: loop exit
PB: predicated region body
PF: predicated region fallthrough
CT: control target
= control target key end

     0   :  { %vm219_vm0 = vcmask 1046528   ;;  %s3773_s30 = smov 4   ;;  %s8119_s0 = inlined_call_operand.vmem [shape: f32[2,18,18,4], index: 0, kind: input, shape index: {}]   ;;  %s8120_s1 = inlined_call_operand.vmem [shape: f32[36,128], index: 1, kind: input, shape index: {}]   ;;  %s8121_s2 = inlined_call_operand.vmem [shape: f32[1,128], index: 2, kind: input, shape index: {}]   ;;  %s8122_s3 = inlined_call_operand.hbm [shape: f32[2,16,16,128], index: 3, kind: output, shape index: {}]  }
   0x1   :  { %v3806_v0 = vld [vmem:[%s8119_s0 + $0x18] sm:$0xff]  ;;  %v3811_v1 = vld [vmem:[%s8119_s0 + $0x20] sm:$0xff]  ;;  %v3823_v5 = vld [vmem:[%s8119_s0 + $0x8] sm:$0xff] }
   0x2   :  { %v3816_v2 = vld [vmem:[%s8119_s0] sm:$0xff]  ;;  %v225_v3 = vrot.slane %v3806_v0, 1  ;;  %v226_v4 = vrot.slane %v3811_v1, 1  ;;  %v3829_v7 = vld [vmem:[%s8119_s0 + $0x28] sm:$0x3]  ;;  %v221_v8 = vrot.slane %v3823_v5, 1 }
   0x3   :  { %v220_v6 = vrot.slane %v3816_v2, 1  ;;  %v228_v9 = vrot.slane %v3829_v7, 1  ;;  %v3836_v10 = vld [vmem:[%s8119_s0 + $0x10] sm:$0x3]  ;;  %v3841_v11 = vld [vmem:[%s8119_s0 + $0x38] sm:$0xff]  ;;  %v3881_v24 = vld [vmem:[%s8119_s0 + $0x48] sm:$0xff] }
   0x4   :  { %v3844_v12 = vsel %vm219_vm0, %v225_v3, %v226_v4  ;;  %v223_v13 = vrot.slane %v3836_v10, 1  ;;  %v3850_v14 = vld [vmem:[%s8119_s0 + $0x40] sm:$0x3]  ;;  %v3855_v15 = vld [vmem:[%s8119_s0 + $0x30] sm:$0xff]  ;;  %v231_v18 = vrot.slane %v3841_v11, 1  ;;  %v235_v29 = vrot.slane %v3881_v24, 1 }
   0x5   :  { %8421 = vst [vmem:[#allocation5_spill] sm:$0xff] %v3844_v12  ;;  %384 = vrot.lane.b32.xlu1 %v3844_v12, %s3773_s30  ;;  %v222_v16 = vsel %vm219_vm0, %v220_v6, %v221_v8  ;;  %v3862_v17 = vsel %vm219_vm0, %v226_v4, %v228_v9  ;;  %v233_v19 = vrot.slane %v3850_v14, 1  ;;  %v230_v21 = vrot.slane %v3855_v15, 1  ;;  %v3871_v22 = vld [vmem:[%s8119_s0 + $0x50] sm:$0xff]  ;;  %v3876_v23 = vld [vmem:[%s8119_s0 + $0x58] sm:$0x3] }
   0x6   :  { %380 = vrot.lane.b32.xlu0 %v222_v16, %s3773_s30  ;;  %8422 = vst [vmem:[#allocation6_spill] sm:$0xff] %v3862_v17  ;;  %v224_v20 = vsel %vm219_vm0, %v221_v8, %v223_v13  ;;  %v236_v26 = vrot.slane %v3871_v22, 1  ;;  %v238_v27 = vrot.slane %v3876_v23, 1  ;;  %v3898_v30 = vld [vmem:[%s8119_s0 + $0x68] sm:$0xff]  ;;  %v3903_v31 = vld [vmem:[%s8119_s0 + $0x70] sm:$0x3] }
   0x7   :  { %v3887_v25 = vsel %vm219_vm0, %v231_v18, %v233_v19  ;;  %v3892_v28 = vsel %vm219_vm0, %v230_v21, %v231_v18  ;;  %v3908_v32 = vld [vmem:[%s8119_s0 + $0x60] sm:$0xff]  ;;  %v241_v34 = vrot.slane %v3898_v30, 1  ;;  %v243_v35 = vrot.slane %v3903_v31, 1  ;;  %v3931_v39 = vld [vmem:[%s8119_s0 + $0x88] sm:$0x3]  ;;  %v3936_v40 = vld [vmem:[%s8119_s0 + $0x78] sm:$0xff] }
   0x8   :  { %8423 = vst [vmem:[#allocation7_spill] sm:$0xff] %v3887_v25  ;;  %8424 = vst [vmem:[#allocation8_spill] sm:$0xff] %v3892_v28  ;;  %v3915_v33 = vsel %vm219_vm0, %v236_v26, %v238_v27  ;;  %v3920_v36 = vsel %vm219_vm0, %v235_v29, %v236_v26  ;;  %v240_v37 = vrot.slane %v3908_v32, 1  ;;  %v3926_v38 = vld [vmem:[%s8119_s0 + $0x80] sm:$0xff]  ;;  %v248_v43 = vrot.slane %v3931_v39, 1  ;;  %v3954_v46 = vld [vmem:[%s8119_s0 + $0x98] sm:$0xff] }
   0x9   :  { %386 = vrot.lane.b32.xlu1 %v3862_v17, %s3773_s30  ;;  %8425 = vst [vmem:[#allocation9_spill] sm:$0xff] %v3915_v33  ;;  %8426 = vst [vmem:[#allocation10_spill] sm:$0xff] %v3920_v36  ;;  %v3943_v41 = vsel %vm219_vm0, %v241_v34, %v243_v35  ;;  %v246_v42 = vrot.slane %v3926_v38, 1  ;;  %v245_v45 = vrot.slane %v3936_v40, 1  ;;  %v3959_v47 = vld [vmem:[%s8119_s0 + $0xa0] sm:$0x3] }
   0xa   :  { %382 = vrot.lane.b32.xlu0 %v224_v20, %s3773_s30  ;;  %8427 = vst [vmem:[#allocation11_spill] sm:$0xff] %v3943_v41  ;;  %v3948_v44 = vsel %vm219_vm0, %v240_v37, %v241_v34  ;;  %v3964_v48 = vld [vmem:[%s8119_s0 + $0x90] sm:$0xff]  ;;  %v251_v50 = vrot.slane %v3954_v46, 1  ;;  %v253_v51 = vrot.slane %v3959_v47, 1  ;;  %v3987_v55 = vld [vmem:[%s8119_s0 + $0xb8] sm:$0x3] }
   0xb   :  { %8428 = vst [vmem:[#allocation12_spill] sm:$0xff] %v3948_v44  ;;  %v3971_v49 = vsel %vm219_vm0, %v246_v42, %v248_v43  ;;  %v3976_v52 = vsel %vm219_vm0, %v245_v45, %v246_v42  ;;  %v250_v53 = vrot.slane %v3964_v48, 1  ;;  %v3982_v54 = vld [vmem:[%s8119_s0 + $0xb0] sm:$0xff]  ;;  %v3992_v56 = vld [vmem:[%s8119_s0 + $0xa8] sm:$0xff]  ;;  %v258_v59 = vrot.slane %v3987_v55, 1  ;;  %v4020_v3 = vld [vmem:[%s8119_s0 + $0xc0] sm:$0xff] }
   0xc   :  { %8429 = vst [vmem:[#allocation13_spill] sm:$0xff] %v3971_v49  ;;  %8430 = vst [vmem:[#allocation14_spill] sm:$0xff] %v3976_v52  ;;  %v3999_v57 = vsel %vm219_vm0, %v251_v50, %v253_v51  ;;  %v256_v58 = vrot.slane %v3982_v54, 1  ;;  %v255_v61 = vrot.slane %v3992_v56, 1  ;;  %v4010_v62 = vld [vmem:[%s8119_s0 + $0xc8] sm:$0xff]  ;;  %v260_v13 = vrot.slane %v4020_v3, 1 }
   0xd   :  { %390 = vrot.lane.b32.xlu1 %v3887_v25, %s3773_s30  ;;  %8431 = vst [vmem:[#allocation15_spill] sm:$0xff] %v3999_v57  ;;  %v4004_v60 = vsel %vm219_vm0, %v250_v53, %v251_v50  ;;  %v4015_v63 = vld [vmem:[%s8119_s0 + $0xd0] sm:$0x3]  ;;  %v261_v6 = vrot.slane %v4010_v62, 1  ;;  %v4038_v16 = vld [vmem:[%s8119_s0 + $0xe0] sm:$0xff]  ;;  %v4048_v19 = vld [vmem:[%s8119_s0 + $0xd8] sm:$0xff] }
   0xe   :  { %388 = vrot.lane.b32.xlu0 %v3892_v28, %s3773_s30  ;;  %8432 = vst [vmem:[#allocation16_spill] sm:$0xff] %v4004_v60  ;;  %v4027_v4 = vsel %vm219_vm0, %v256_v58, %v258_v59  ;;  %v263_v8 = vrot.slane %v4015_v63, 1  ;;  %v4032_v9 = vsel %vm219_vm0, %v255_v61, %v256_v58  ;;  %v4043_v18 = vld [vmem:[%s8119_s0 + $0xe8] sm:$0x3]  ;;  %v266_v21 = vrot.slane %v4038_v16, 1  ;;  %v4066_v34 = vld [vmem:[%s8119_s0 + $0xf8] sm:$0xff] }
   0xf   :  { %8433 = vst [vmem:[#allocation17_spill] sm:$0xff] %v4027_v4  ;;  %8434 = vst [vmem:[#allocation18_spill] sm:$0xff] %v4032_v9  ;;  %v268_v26 = vrot.slane %v4043_v18, 1  ;;  %v4060_v27 = vsel %vm219_vm0, %v260_v13, %v261_v6  ;;  %v265_v29 = vrot.slane %v4048_v19, 1  ;;  %v4071_v35 = vld [vmem:[%s8119_s0 + $0x100] sm:$0x3] }
  0x10   :  { %v4055_v20 = vsel %vm219_vm0, %v261_v6, %v263_v8  ;;  %8436 = vst [vmem:[#allocation20_spill] sm:$0xff] %v4060_v27  ;;  %v4076_v37 = vld [vmem:[%s8119_s0 + $0xf0] sm:$0xff] }
  0x11   :  { %394 = vrot.lane.b32.xlu1 %v3915_v33, %s3773_s30  ;;  %8435 = vst [vmem:[#allocation19_spill] sm:$0xff] %v4055_v20 }
  0x12   :  { %392 = vrot.lane.b32.xlu0 %v3920_v36, %s3773_s30 }
  0x15   :  { %398 = vrot.lane.b32.xlu1 %v3943_v41, %s3773_s30 }
  0x16   :  { %396 = vrot.lane.b32.xlu0 %v3948_v44, %s3773_s30 }
  0x19   :  { %402 = vrot.lane.b32.xlu1 %v3971_v49, %s3773_s30 }
  0x1a   :  { %400 = vrot.lane.b32.xlu0 %v3976_v52, %s3773_s30 }
  0x1d   :  { %406 = vrot.lane.b32.xlu1 %v3999_v57, %s3773_s30 }
  0x1e   :  { %404 = vrot.lane.b32.xlu0 %v4004_v60, %s3773_s30 }
  0x21   :  { %410 = vrot.lane.b32.xlu1 %v4027_v4, %s3773_s30 }
  0x22   :  { %408 = vrot.lane.b32.xlu0 %v4032_v9, %s3773_s30 }
  0x25   :  { %414 = vrot.lane.b32.xlu1 %v4055_v20, %s3773_s30 }
  0x26   :  { %8 = vsyncpa [#allocation3], 0  ;;  %412 = vrot.lane.b32.xlu0 %v4060_v27, %s3773_s30  ;;  %v4083_v42 = vsel %vm219_vm0, %v266_v21, %v268_v26  ;;  %v271_v43 = vrot.slane %v4066_v34, 1  ;;  %v273_v45 = vrot.slane %v4071_v35, 1  ;;  %v4088_v50 = vsel %vm219_vm0, %v265_v29, %v266_v21  ;;  %v4094_v53 = vld [vmem:[%s8119_s0 + $0x110] sm:$0xff]  ;;  %v4104_v59 = vld [vmem:[%s8119_s0 + $0x108] sm:$0xff] }
  0x27   :  { %8437 = vst [vmem:[#allocation21_spill] sm:$0xff] %v4083_v42  ;;  %8438 = vst [vmem:[#allocation22_spill] sm:$0xff] %v4088_v50  ;;  %v270_v51 = vrot.slane %v4076_v37, 1  ;;  %v4099_v58 = vld [vmem:[%s8119_s0 + $0x118] sm:$0x3]  ;;  %v276_v6 = vrot.slane %v4094_v53, 1 }
  0x28   :  { %v4111_v61 = vsel %vm219_vm0, %v271_v43, %v273_v45  ;;  %v278_v8 = vrot.slane %v4099_v58, 1  ;;  %v275_v21 = vrot.slane %v4104_v59, 1  ;;  %v4122_v26 = vld [vmem:[%s8119_s0 + $0x128] sm:$0xff]  ;;  %v4127_v29 = vld [vmem:[%s8119_s0 + $0x130] sm:$0x3]  ;;  %v4132_v45 = vld [vmem:[%s8119_s0 + $0x120] sm:$0xff] }
  0x29   :  { %418 = vrot.lane.b32.xlu1 %v4083_v42, %s3773_s30  ;;  %8439 = vst [vmem:[#allocation23_spill] sm:$0xff] %v4111_v61  ;;  %v4116_v13 = vsel %vm219_vm0, %v270_v51, %v271_v43  ;;  %v281_v51 = vrot.slane %v4122_v26, 1  ;;  %v280_v27 = vrot.slane %v4132_v45, 1  ;;  %v4150_v20 = vld [vmem:[%s8119_s0 + $0x140] sm:$0xff]  ;;  %v4178_v60 = vld [vmem:[%s8119_s0 + $0x158] sm:$0xff]  ;;  %v4206_v49 = vld [vmem:[%s8119_s0 + $0x170] sm:$0xff] }
  0x2a   :  { %416 = vrot.lane.b32.xlu0 %v4088_v50, %s3773_s30  ;;  %8440 = vst [vmem:[#allocation24_spill] sm:$0xff] %v4116_v13  ;;  %v4139_v43 = vsel %vm219_vm0, %v276_v6, %v278_v8  ;;  %v283_v50 = vrot.slane %v4127_v29, 1  ;;  %v4144_v42 = vsel %vm219_vm0, %v275_v21, %v276_v6  ;;  %v4160_v8 = vld [vmem:[%s8119_s0 + $0x138] sm:$0xff]  ;;  %v286_v21 = vrot.slane %v4150_v20, 1  ;;  %v4262_v25 = vld [vmem:[%s8119_s0 + $0x1d0] sm:$0xff]  ;;  %s3774_s22 = smov 8  }
  0x2b   :  { %8441 = vst [vmem:[#allocation25_spill] sm:$0xff] %v4139_v43  ;;  %8442 = vst [vmem:[#allocation26_spill] sm:$0xff] %v4144_v42  ;;  %v4172_v9 = vsel %vm219_vm0, %v280_v27, %v281_v51  ;;  %v285_v4 = vrot.slane %v4160_v8, 1  ;;  %v4234_v36 = vld [vmem:[%s8119_s0 + $0x1b8] sm:$0xff]  ;;  %vm572_vm1 = vcmask 1045504   ;;  %s3775_s24 = smov 12  }
  0x2c   :  { %v4167_v6 = vsel %vm219_vm0, %v281_v51, %v283_v50  ;;  %8444 = vst [vmem:[#allocation28_spill] sm:$0xff] %v4172_v9  ;;  %v4188_v50 = vld [vmem:[%s8119_s0 + $0x150] sm:$0xff]  ;;  %v291_v51 = vrot.slane %v4178_v60, 1  ;;  %8453 = vst [vmem:[#allocation37_spill] sm:$0xff] %v4262_v25  ;;  %s3776_s23 = smov 16   ;;  %s3777_s28 = smov 20  }
  0x2d   :  { %422 = vrot.lane.b32.xlu1 %v4111_v61, %s3773_s30  ;;  %8443 = vst [vmem:[#allocation27_spill] sm:$0xff] %v4167_v6  ;;  %v4200_v57 = vsel %vm219_vm0, %v285_v4, %v286_v21  ;;  %v290_v52 = vrot.slane %v4188_v50, 1  ;;  %s3778_s29 = smov 24   ;;  %vm2854_vm2 = vcmask 1043456   ;;  %s3779_s16 = smov 28   ;;  %vm2129_vm3 = vcmask 31744  }
  0x2e   :  { %420 = vrot.lane.b32.xlu0 %v4116_v13, %s3773_s30  ;;  %v4155_v13 = vld [vmem:[%s8119_s0 + $0x148] sm:$0x3]  ;;  %8446 = vst [vmem:[#allocation30_spill] sm:$0xff] %v4200_v57  ;;  %vm2194_vm4 = vcmask 64512   ;;  %vm2259_vm5 = vcmask 97280   ;;  %vm2324_vm6 = vcmask 130048  }
  0x2f   :  { %v288_v61 = vrot.slane %v4155_v13, 1  ;;  %v4228_v44 = vsel %vm219_vm0, %v290_v52, %v291_v51  ;;  %vm2389_vm7 = vcmask 162816   ;;  %vm2454_vm8 = vcmask 195584   ;;  %s3781_s17 = smov [#allocation2]  }
  0x30   :  { %8448 = vst [vmem:[#allocation32_spill] sm:$0xff] %v4228_v44  ;;  %vm2519_vm9 = vcmask 228352   ;;  %vm2584_vm10 = vcmask 261120   ;;  %vm2661_vm11 = vcmask 293888   ;;  %s3376_s18 = sshll.u32 %s3781_s17, 4  ;;  %s3377_s18 = int_to_ptr.vmem [resolvable:$true] %s3376_s18 }
  0x31   :  { %426 = vrot.lane.b32.xlu1 %v4139_v43, %s3773_s30  ;;  %v4195_v27 = vsel %vm219_vm0, %v286_v21, %v288_v61  ;;  %v4216_v61 = vld [vmem:[%s8119_s0 + $0x168] sm:$0xff]  ;;  %v296_v21 = vrot.slane %v4206_v49, 1  ;;  %s3751_s19 = scalar_lea.vmem %s3377_s18, 8192  ;;  %p3756_p1 = scmp.lt.s32.totalorder %s3377_s18, %s3377_s18 }
  0x32   :  { %424 = vrot.lane.b32.xlu0 %v4144_v42, %s3773_s30  ;;  %v4183_v42 = vld [vmem:[%s8119_s0 + $0x160] sm:$0x3]  ;;  %8445 = vst [vmem:[#allocation29_spill] sm:$0xff] %v4195_v27  ;;  %v295_v41 = vrot.slane %v4216_v61, 1  ;;  %p3752_p0 = scmp.ne.s32.totalorder %s3377_s18, %s3751_s19  ;;  %p3757_p2 = scmp.lt.s32.totalorder %s3751_s19, %s3751_s19 }
  0x33   :  { %v293_v43 = vrot.slane %v4183_v42, 1 }
  0x34   :  { %v4256_v33 = vsel %vm219_vm0, %v295_v41, %v296_v21  ;;  %p3758_p3 = por %p3757_p2, %p3756_p1 }
  0x35   :  { %430 = vrot.lane.b32.xlu1 %v4167_v6, %s3773_s30  ;;  %v4223_v4 = vsel %vm219_vm0, %v291_v51, %v293_v43  ;;  %v4244_v43 = vld [vmem:[%s8119_s0 + $0x1b0] sm:$0xff]  ;;  %v301_v51 = vrot.slane %v4234_v36, 1  ;;  %8452 = vst [vmem:[#allocation36_spill] sm:$0xff] %v4256_v33 }
  0x36   :  { %428 = vrot.lane.b32.xlu0 %v4172_v9, %s3773_s30  ;;  %v4211_v9 = vld [vmem:[%s8119_s0 + $0x178] sm:$0x3]  ;;  %8447 = vst [vmem:[#allocation31_spill] sm:$0xff] %v4223_v4  ;;  %8450 = vst [vmem:[#allocation34_spill] sm:$0xff] %v4244_v43  ;;  %v300_v28 = vrot.slane %v4244_v43, 1  ;;  %v4286_v43 = vld [vmem:[%s8119_s0 + $0x1e8] sm:$0xff]  ;;  %p3759_p4 = pnand %p3758_p3, %p3752_p0 }
  0x37   :  { %v298_v6 = vrot.slane %v4211_v9, 1  ;;  %8456 = vst [vmem:[#allocation40_spill] sm:$0xff] %v4286_v43 }
  0x38   :  { %v302_v12 = vsel %vm219_vm0, %v300_v28, %v301_v51 }
  0x39   :  { %434 = vrot.lane.b32.xlu1 %v4195_v27, %s3773_s30  ;;  %v4251_v52 = vsel %vm219_vm0, %v296_v21, %v298_v6  ;;  %v4272_v6 = vld [vmem:[%s8119_s0 + $0x1c8] sm:$0xff]  ;;  %v306_v21 = vrot.slane %v4262_v25, 1  ;;  %v4312_v25 = vld [vmem:[%s8119_s0 + $0x200] sm:$0xff] }
  0x3a   :  { %432 = vrot.lane.b32.xlu0 %v4200_v57, %s3773_s30  ;;  %v4239_v57 = vld [vmem:[%s8119_s0 + $0x1c0] sm:$0x3]  ;;  %8451 = vst [vmem:[#allocation35_spill] sm:$0xff] %v4251_v52  ;;  %8455 = vst [vmem:[#allocation39_spill] sm:$0xff] %v4272_v6  ;;  %v305_v17 = vrot.slane %v4272_v6, 1 }
  0x3b   :  { %8449 = vst [vmem:[#allocation33_spill] sm:$0xff] %v4239_v57  ;;  %v303_v27 = vrot.slane %v4239_v57, 1  ;;  %8461 = vst [vmem:[#allocation45_spill] sm:$0xff] %v4312_v25 }
  0x3c   :  { %v4306_v6 = vsel %vm219_vm0, %v305_v17, %v306_v21 }
  0x3d   :  { %438 = vrot.lane.b32.xlu1 %v4223_v4, %s3773_s30  ;;  %v304_v41 = vsel %vm219_vm0, %v301_v51, %v303_v27  ;;  %v4296_v27 = vld [vmem:[%s8119_s0 + $0x1e0] sm:$0xff]  ;;  %v311_v51 = vrot.slane %v4286_v43, 1  ;;  %8460 = vst [vmem:[#allocation44_spill] sm:$0xff] %v4306_v6  ;;  %v4340_v43 = vld [vmem:[%s8119_s0 + $0x218] sm:$0xff] }
  0x3e   :  { %436 = vrot.lane.b32.xlu0 %v4228_v44, %s3773_s30  ;;  %v4267_v44 = vld [vmem:[%s8119_s0 + $0x1d8] sm:$0x3]  ;;  %8458 = vst [vmem:[#allocation42_spill] sm:$0xff] %v4296_v27  ;;  %8466 = vst [vmem:[#allocation50_spill] sm:$0xff] %v4340_v43 }
  0x3f   :  { %8454 = vst [vmem:[#allocation38_spill] sm:$0xff] %v4267_v44  ;;  %v308_v4 = vrot.slane %v4267_v44, 1  ;;  %v310_v44 = vrot.slane %v4296_v27, 1 }
  0x41   :  { %442 = vrot.lane.b32.xlu1 %v4251_v52, %s3773_s30  ;;  %v4291_v52 = vld [vmem:[%s8119_s0 + $0x1f0] sm:$0x3]  ;;  %v4301_v28 = vsel %vm219_vm0, %v306_v21, %v308_v4  ;;  %v4322_v4 = vld [vmem:[%s8119_s0 + $0x1f8] sm:$0xff]  ;;  %v4334_v27 = vsel %vm219_vm0, %v310_v44, %v311_v51 }
  0x42   :  { %440 = vrot.lane.b32.xlu0 %v4256_v33, %s3773_s30  ;;  %8457 = vst [vmem:[#allocation41_spill] sm:$0xff] %v4291_v52  ;;  %8459 = vst [vmem:[#allocation43_spill] sm:$0xff] %v4301_v28  ;;  %v313_v33 = vrot.slane %v4291_v52, 1  ;;  %v315_v52 = vrot.slane %v4322_v4, 1 }
  0x43   :  { %8463 = vst [vmem:[#allocation47_spill] sm:$0xff] %v4322_v4  ;;  %8465 = vst [vmem:[#allocation49_spill] sm:$0xff] %v4334_v27 }
  0x44   :  { %v4329_v17 = vsel %vm219_vm0, %v311_v51, %v313_v33  ;;  %v4350_v33 = vld [vmem:[%s8119_s0 + $0x210] sm:$0xff]  ;;  %v321_v51 = vrot.slane %v4340_v43, 1  ;;  %v4396_v43 = vld [vmem:[%s8119_s0 + $0x248] sm:$0xff] }
  0x45   :  { %446 = vrot.lane.b32.xlu1 %v304_v41, %s3773_s30  ;;  %8464 = vst [vmem:[#allocation48_spill] sm:$0xff] %v4329_v17  ;;  %v316_v41 = vrot.slane %v4312_v25, 1  ;;  %8468 = vst [vmem:[#allocation52_spill] sm:$0xff] %v4350_v33  ;;  %v4368_v25 = vld [vmem:[%s8119_s0 + $0x230] sm:$0xff] }
  0x46   :  { %444 = vrot.lane.b32.xlu0 %v302_v12, %s3773_s30  ;;  %v4317_v12 = vld [vmem:[%s8119_s0 + $0x208] sm:$0x3]  ;;  %8471 = vst [vmem:[#allocation55_spill] sm:$0xff] %v4368_v25  ;;  %8476 = vst [vmem:[#allocation60_spill] sm:$0xff] %v4396_v43 }
  0x47   :  { %8462 = vst [vmem:[#allocation46_spill] sm:$0xff] %v4317_v12  ;;  %v318_v21 = vrot.slane %v4317_v12, 1  ;;  %v4362_v4 = vsel %vm219_vm0, %v315_v52, %v316_v41  ;;  %v320_v12 = vrot.slane %v4350_v33, 1 }
  0x48   :  { %8470 = vst [vmem:[#allocation54_spill] sm:$0xff] %v4362_v4 }
  0x49   :  { %450 = vrot.lane.b32.xlu1 %v4301_v28, %s3773_s30  ;;  %v4357_v44 = vsel %vm219_vm0, %v316_v41, %v318_v21  ;;  %v4378_v21 = vld [vmem:[%s8119_s0 + $0x228] sm:$0xff]  ;;  %v326_v41 = vrot.slane %v4368_v25, 1  ;;  %v4390_v33 = vsel %vm219_vm0, %v320_v12, %v321_v51  ;;  %v4424_v25 = vld [vmem:[%s8119_s0 + $0x260] sm:$0xff] }
  0x4a   :  { %448 = vrot.lane.b32.xlu0 %v4306_v6, %s3773_s30  ;;  %v4345_v6 = vld [vmem:[%s8119_s0 + $0x220] sm:$0x3]  ;;  %8469 = vst [vmem:[#allocation53_spill] sm:$0xff] %v4357_v44  ;;  %8473 = vst [vmem:[#allocation57_spill] sm:$0xff] %v4378_v21 }
  0x4b   :  { %8467 = vst [vmem:[#allocation51_spill] sm:$0xff] %v4345_v6  ;;  %v323_v28 = vrot.slane %v4345_v6, 1  ;;  %8475 = vst [vmem:[#allocation59_spill] sm:$0xff] %v4390_v33  ;;  %v325_v6 = vrot.slane %v4378_v21, 1 }
  0x4c   :  { %8481 = vst [vmem:[#allocation65_spill] sm:$0xff] %v4424_v25 }
  0x4d   :  { %454 = vrot.lane.b32.xlu1 %v4329_v17, %s3773_s30  ;;  %v4385_v52 = vsel %vm219_vm0, %v321_v51, %v323_v28  ;;  %v4406_v28 = vld [vmem:[%s8119_s0 + $0x240] sm:$0xff]  ;;  %v331_v51 = vrot.slane %v4396_v43, 1  ;;  %v4418_v21 = vsel %vm219_vm0, %v325_v6, %v326_v41  ;;  %v4452_v43 = vld [vmem:[%s8119_s0 + $0x278] sm:$0xff] }
  0x4e   :  { %452 = vrot.lane.b32.xlu0 %v4334_v27, %s3773_s30  ;;  %v4373_v27 = vld [vmem:[%s8119_s0 + $0x238] sm:$0x3]  ;;  %8474 = vst [vmem:[#allocation58_spill] sm:$0xff] %v4385_v52  ;;  %8478 = vst [vmem:[#allocation62_spill] sm:$0xff] %v4406_v28 }
  0x4f   :  { %8472 = vst [vmem:[#allocation56_spill] sm:$0xff] %v4373_v27  ;;  %v328_v17 = vrot.slane %v4373_v27, 1  ;;  %8480 = vst [vmem:[#allocation64_spill] sm:$0xff] %v4418_v21  ;;  %v330_v27 = vrot.slane %v4406_v28, 1 }
  0x50   :  { %8486 = vst [vmem:[#allocation70_spill] sm:$0xff] %v4452_v43 }
  0x51   :  { %458 = vrot.lane.b32.xlu1 %v4357_v44, %s3773_s30  ;;  %v4413_v12 = vsel %vm219_vm0, %v326_v41, %v328_v17  ;;  %v4434_v17 = vld [vmem:[%s8119_s0 + $0x258] sm:$0xff]  ;;  %v336_v41 = vrot.slane %v4424_v25, 1  ;;  %v4446_v28 = vsel %vm219_vm0, %v330_v27, %v331_v51  ;;  %v4480_v25 = vld [vmem:[%s8119_s0 + $0x290] sm:$0xff] }
  0x52   :  { %456 = vrot.lane.b32.xlu0 %v4362_v4, %s3773_s30  ;;  %v4401_v4 = vld [vmem:[%s8119_s0 + $0x250] sm:$0x3]  ;;  %8479 = vst [vmem:[#allocation63_spill] sm:$0xff] %v4413_v12  ;;  %8483 = vst [vmem:[#allocation67_spill] sm:$0xff] %v4434_v17 }
  0x53   :  { %8477 = vst [vmem:[#allocation61_spill] sm:$0xff] %v4401_v4  ;;  %v333_v44 = vrot.slane %v4401_v4, 1  ;;  %8485 = vst [vmem:[#allocation69_spill] sm:$0xff] %v4446_v28  ;;  %v335_v4 = vrot.slane %v4434_v17, 1 }
  0x54   :  { %8491 = vst [vmem:[#allocation75_spill] sm:$0xff] %v4480_v25 }
  0x55   :  { %462 = vrot.lane.b32.xlu1 %v4385_v52, %s3773_s30  ;;  %v4441_v6 = vsel %vm219_vm0, %v331_v51, %v333_v44  ;;  %v4462_v44 = vld [vmem:[%s8119_s0 + $0x270] sm:$0xff]  ;;  %v341_v51 = vrot.slane %v4452_v43, 1  ;;  %v4474_v17 = vsel %vm219_vm0, %v335_v4, %v336_v41  ;;  %v4508_v43 = vld [vmem:[%s8119_s0 + $0x2a8] sm:$0xff] }
  0x56   :  { %460 = vrot.lane.b32.xlu0 %v4390_v33, %s3773_s30  ;;  %v4429_v33 = vld [vmem:[%s8119_s0 + $0x268] sm:$0x3]  ;;  %8484 = vst [vmem:[#allocation68_spill] sm:$0xff] %v4441_v6  ;;  %8488 = vst [vmem:[#allocation72_spill] sm:$0xff] %v4462_v44 }
  0x57   :  { %8482 = vst [vmem:[#allocation66_spill] sm:$0xff] %v4429_v33  ;;  %v338_v52 = vrot.slane %v4429_v33, 1  ;;  %8490 = vst [vmem:[#allocation74_spill] sm:$0xff] %v4474_v17  ;;  %v340_v33 = vrot.slane %v4462_v44, 1 }
  0x58   :  { %8496 = vst [vmem:[#allocation80_spill] sm:$0xff] %v4508_v43 }
  0x59   :  { %466 = vrot.lane.b32.xlu1 %v4413_v12, %s3773_s30  ;;  %v4469_v27 = vsel %vm219_vm0, %v336_v41, %v338_v52  ;;  %v4490_v52 = vld [vmem:[%s8119_s0 + $0x288] sm:$0xff]  ;;  %v346_v41 = vrot.slane %v4480_v25, 1  ;;  %v4502_v44 = vsel %vm219_vm0, %v340_v33, %v341_v51  ;;  %v4536_v25 = vld [vmem:[%s8119_s0 + $0x2c0] sm:$0xff] }
  0x5a   :  { %464 = vrot.lane.b32.xlu0 %v4418_v21, %s3773_s30  ;;  %v4457_v21 = vld [vmem:[%s8119_s0 + $0x280] sm:$0x3]  ;;  %8489 = vst [vmem:[#allocation73_spill] sm:$0xff] %v4469_v27  ;;  %8493 = vst [vmem:[#allocation77_spill] sm:$0xff] %v4490_v52 }
  0x5b   :  { %8487 = vst [vmem:[#allocation71_spill] sm:$0xff] %v4457_v21  ;;  %v343_v12 = vrot.slane %v4457_v21, 1  ;;  %8495 = vst [vmem:[#allocation79_spill] sm:$0xff] %v4502_v44  ;;  %v345_v21 = vrot.slane %v4490_v52, 1 }
  0x5c   :  { %8501 = vst [vmem:[#allocation85_spill] sm:$0xff] %v4536_v25 }
  0x5d   :  { %470 = vrot.lane.b32.xlu1 %v4441_v6, %s3773_s30  ;;  %v4497_v4 = vsel %vm219_vm0, %v341_v51, %v343_v12  ;;  %v4518_v12 = vld [vmem:[%s8119_s0 + $0x2a0] sm:$0xff]  ;;  %v351_v51 = vrot.slane %v4508_v43, 1  ;;  %v4530_v52 = vsel %vm219_vm0, %v345_v21, %v346_v41  ;;  %v4564_v43 = vld [vmem:[%s8119_s0 + $0x2d8] sm:$0xff] }
  0x5e   :  { %468 = vrot.lane.b32.xlu0 %v4446_v28, %s3773_s30  ;;  %v4485_v28 = vld [vmem:[%s8119_s0 + $0x298] sm:$0x3]  ;;  %8494 = vst [vmem:[#allocation78_spill] sm:$0xff] %v4497_v4  ;;  %8498 = vst [vmem:[#allocation82_spill] sm:$0xff] %v4518_v12 }
  0x5f   :  { %8492 = vst [vmem:[#allocation76_spill] sm:$0xff] %v4485_v28  ;;  %v348_v6 = vrot.slane %v4485_v28, 1  ;;  %8500 = vst [vmem:[#allocation84_spill] sm:$0xff] %v4530_v52  ;;  %v350_v28 = vrot.slane %v4518_v12, 1 }
  0x60   :  { %8506 = vst [vmem:[#allocation90_spill] sm:$0xff] %v4564_v43 }
  0x61   :  { %474 = vrot.lane.b32.xlu1 %v4469_v27, %s3773_s30  ;;  %v4525_v33 = vsel %vm219_vm0, %v346_v41, %v348_v6  ;;  %v4546_v6 = vld [vmem:[%s8119_s0 + $0x2b8] sm:$0xff]  ;;  %v356_v41 = vrot.slane %v4536_v25, 1  ;;  %v4558_v12 = vsel %vm219_vm0, %v350_v28, %v351_v51  ;;  %v4592_v25 = vld [vmem:[%s8119_s0 + $0x2f0] sm:$0xff] }
  0x62   :  { %472 = vrot.lane.b32.xlu0 %v4474_v17, %s3773_s30  ;;  %v4513_v17 = vld [vmem:[%s8119_s0 + $0x2b0] sm:$0x3]  ;;  %8499 = vst [vmem:[#allocation83_spill] sm:$0xff] %v4525_v33  ;;  %8503 = vst [vmem:[#allocation87_spill] sm:$0xff] %v4546_v6 }
  0x63   :  { %8497 = vst [vmem:[#allocation81_spill] sm:$0xff] %v4513_v17  ;;  %v353_v27 = vrot.slane %v4513_v17, 1  ;;  %8505 = vst [vmem:[#allocation89_spill] sm:$0xff] %v4558_v12  ;;  %v355_v17 = vrot.slane %v4546_v6, 1 }
  0x64   :  { %8511 = vst [vmem:[#allocation95_spill] sm:$0xff] %v4592_v25 }
  0x65   :  { %478 = vrot.lane.b32.xlu1 %v4497_v4, %s3773_s30  ;;  %v4553_v21 = vsel %vm219_vm0, %v351_v51, %v353_v27  ;;  %v4574_v27 = vld [vmem:[%s8119_s0 + $0x2d0] sm:$0xff]  ;;  %v361_v51 = vrot.slane %v4564_v43, 1  ;;  %v4586_v6 = vsel %vm219_vm0, %v355_v17, %v356_v41  ;;  %v4620_v43 = vld [vmem:[%s8119_s0 + $0x308] sm:$0xff] }
  0x66   :  { %476 = vrot.lane.b32.xlu0 %v4502_v44, %s3773_s30  ;;  %v4541_v44 = vld [vmem:[%s8119_s0 + $0x2c8] sm:$0x3]  ;;  %8504 = vst [vmem:[#allocation88_spill] sm:$0xff] %v4553_v21  ;;  %8508 = vst [vmem:[#allocation92_spill] sm:$0xff] %v4574_v27 }
  0x67   :  { %8502 = vst [vmem:[#allocation86_spill] sm:$0xff] %v4541_v44  ;;  %v358_v4 = vrot.slane %v4541_v44, 1  ;;  %8510 = vst [vmem:[#allocation94_spill] sm:$0xff] %v4586_v6  ;;  %v360_v44 = vrot.slane %v4574_v27, 1 }
  0x68   :  { %8516 = vst [vmem:[#allocation100_spill] sm:$0xff] %v4620_v43 }
  0x69   :  { %482 = vrot.lane.b32.xlu1 %v4525_v33, %s3773_s30  ;;  %v4581_v28 = vsel %vm219_vm0, %v356_v41, %v358_v4  ;;  %v4602_v4 = vld [vmem:[%s8119_s0 + $0x2e8] sm:$0xff]  ;;  %v366_v41 = vrot.slane %v4592_v25, 1  ;;  %v4614_v27 = vsel %vm219_vm0, %v360_v44, %v361_v51 }
  0x6a   :  { %480 = vrot.lane.b32.xlu0 %v4530_v52, %s3773_s30  ;;  %v4569_v52 = vld [vmem:[%s8119_s0 + $0x2e0] sm:$0x3]  ;;  %8509 = vst [vmem:[#allocation93_spill] sm:$0xff] %v4581_v28  ;;  %8513 = vst [vmem:[#allocation97_spill] sm:$0xff] %v4602_v4 }
  0x6b   :  { %8507 = vst [vmem:[#allocation91_spill] sm:$0xff] %v4569_v52  ;;  %v363_v33 = vrot.slane %v4569_v52, 1  ;;  %8515 = vst [vmem:[#allocation99_spill] sm:$0xff] %v4614_v27  ;;  %v365_v52 = vrot.slane %v4602_v4, 1 }
  0x6d   :  { %486 = vrot.lane.b32.xlu1 %v4553_v21, %s3773_s30  ;;  %v4609_v17 = vsel %vm219_vm0, %v361_v51, %v363_v33  ;;  %v4630_v33 = vld [vmem:[%s8119_s0 + $0x300] sm:$0xff]  ;;  %v371_v51 = vrot.slane %v4620_v43, 1 }
  0x6e   :  { %484 = vrot.lane.b32.xlu0 %v4558_v12, %s3773_s30  ;;  %v4597_v12 = vld [vmem:[%s8119_s0 + $0x2f8] sm:$0x3]  ;;  %8514 = vst [vmem:[#allocation98_spill] sm:$0xff] %v4609_v17  ;;  %8518 = vst [vmem:[#allocation102_spill] sm:$0xff] %v4630_v33  ;;  %v370_v25 = vrot.slane %v4630_v33, 1 }
  0x6f   :  { %8512 = vst [vmem:[#allocation96_spill] sm:$0xff] %v4597_v12  ;;  %v368_v21 = vrot.slane %v4597_v12, 1  ;;  %v4644_v12 = vsel %vm219_vm0, %v365_v52, %v366_v41 }
  0x70   :  { %8521 = vst [vmem:[#allocation105_spill] sm:$0xff] %v4644_v12 }
  0x71   :  { %490 = vrot.lane.b32.xlu1 %v4581_v28, %s3773_s30  ;;  %v4637_v44 = vsel %vm219_vm0, %v366_v41, %v368_v21  ;;  %v4655_v21 = vld [vmem:[%s8119_s0 + $0x328] sm:$0x3] }
  0x72   :  { %488 = vrot.lane.b32.xlu0 %v4586_v6, %s3773_s30  ;;  %v4625_v6 = vld [vmem:[%s8119_s0 + $0x310] sm:$0x3]  ;;  %8519 = vst [vmem:[#allocation103_spill] sm:$0xff] %v4637_v44  ;;  %v378_v33 = vrot.slane %v4655_v21, 1 }
  0x73   :  { %8517 = vst [vmem:[#allocation101_spill] sm:$0xff] %v4625_v6  ;;  %v373_v28 = vrot.slane %v4625_v6, 1 }
  0x75   :  { %494 = vrot.lane.b32.xlu1 %v4609_v17, %s3773_s30  ;;  %v4650_v17 = vld [vmem:[%s8119_s0 + $0x320] sm:$0xff]  ;;  %v4669_v52 = vsel %vm219_vm0, %v371_v51, %v373_v28 }
  0x76   :  { %492 = vrot.lane.b32.xlu0 %v4614_v27, %s3773_s30  ;;  %8523 = vst [vmem:[#allocation107_spill] sm:$0xff] %v4669_v52  ;;  %v376_v41 = vrot.slane %v4650_v17, 1 }
  0x77   :  { %v4641_v4 = vpop.permute.xlu1 %384 }
  0x78   :  { %8520 = vst [vmem:[#allocation104_spill] sm:$0xff] %v4641_v4  ;;  %v4657_v27 = vpop.permute.xlu0 %380  ;;  %v4662_v4 = vld [vmem:[%s8119_s0 + $0x318] sm:$0xff]  ;;  %v4686_v28 = vsel %vm219_vm0, %v376_v41, %v378_v33  ;;  %v581_v33 = vrot.slane %v3829_v7, 2  ;;  %v586_v7 = vrot.slane %v3850_v14, 2  ;;  %v591_v14 = vrot.slane %v3876_v23, 2 }
  0x79   :  { %8522 = vst [vmem:[#allocation106_spill] sm:$0xff] %v4657_v27  ;;  %498 = vrot.lane.b32.xlu1 %v4637_v44, %s3773_s30  ;;  %v4676_v27 = vsel %vm219_vm0, %v370_v25, %v371_v51  ;;  %v375_v43 = vrot.slane %v4662_v4, 1  ;;  %8527 = vst [vmem:[#allocation111_spill] sm:$0xff] %v4686_v28  ;;  %v573_v51 = vrot.slane %v3816_v2, 2  ;;  %v578_v2 = vrot.slane %v3806_v0, 2 }
  0x7a   :  { %496 = vrot.lane.b32.xlu0 %v4644_v12, %s3773_s30  ;;  %8525 = vst [vmem:[#allocation109_spill] sm:$0xff] %v4676_v27  ;;  %v574_v12 = vrot.slane %v3823_v5, 2  ;;  %v583_v0 = vrot.slane %v3855_v15, 2  ;;  %v588_v15 = vrot.slane %v3881_v24, 2  ;;  %v596_v23 = vrot.slane %v3903_v31, 2 }
  0x7b   :  { %v4673_v6 = vpop.permute.xlu1 %386  ;;  %v4693_v25 = vsel %vm219_vm0, %v375_v43, %v376_v41  ;;  %v593_v24 = vrot.slane %v3908_v32, 2  ;;  %v601_v31 = vrot.slane %v3931_v39, 2  ;;  %v598_v32 = vrot.slane %v3936_v40, 2 }
  0x7c   :  { %8524 = vst [vmem:[#allocation108_spill] sm:$0xff] %v4673_v6  ;;  %v4679_v57 = vpop.permute.xlu0 %382  ;;  %v576_v6 = vrot.slane %v3836_v10, 2  ;;  %8529 = vst [vmem:[#allocation113_spill] sm:$0xff] %v4693_v25  ;;  %v579_v10 = vrot.slane %v3811_v1, 2  ;;  %v575_v43 = vsel %vm572_vm1, %v573_v51, %v574_v12  ;;  %v584_v1 = vrot.slane %v3841_v11, 2 }
  0x7d   :  { %8526 = vst [vmem:[#allocation110_spill] sm:$0xff] %v4679_v57  ;;  %502 = vrot.lane.b32.xlu1 %v4669_v52, %s3773_s30  ;;  %v589_v11 = vrot.slane %v3871_v22, 2  ;;  %v594_v22 = vrot.slane %v3898_v30, 2  ;;  %v599_v30 = vrot.slane %v3926_v38, 2  ;;  %v604_v38 = vrot.slane %v3954_v46, 2 }
  0x7e   :  { %500 = vrot.lane.b32.xlu0 %v4676_v27, %s3773_s30  ;;  %v577_v5 = vsel %vm572_vm1, %v574_v12, %v576_v6  ;;  %v4721_v12 = vsel %vm572_vm1, %v578_v2, %v579_v10  ;;  %v606_v39 = vrot.slane %v3959_v47, 2  ;;  %v603_v40 = vrot.slane %v3964_v48, 2 }
  0x7f   :  { %v4690_v44 = vpop.permute.xlu1 %390  ;;  %v4748_v2 = vsel %vm572_vm1, %v589_v11, %v591_v14  ;;  %v4765_v14 = vsel %vm572_vm1, %v594_v22, %v596_v23  ;;  %v4782_v23 = vsel %vm572_vm1, %v599_v30, %v601_v31  ;;  %v609_v46 = vrot.slane %v3982_v54, 2 }
  0x80   :  { %8528 = vst [vmem:[#allocation112_spill] sm:$0xff] %v4690_v44  ;;  %v4696_v57 = vpop.permute.xlu0 %388  ;;  %v4799_v31 = vsel %vm572_vm1, %v604_v38, %v606_v39  ;;  %v611_v47 = vrot.slane %v3987_v55, 2  ;;  %v608_v48 = vrot.slane %v3992_v56, 2  ;;  %v614_v54 = vrot.slane %v4010_v62, 2 }
  0x81   :  { %8530 = vst [vmem:[#allocation114_spill] sm:$0xff] %v4696_v57  ;;  %506 = vrot.lane.b32.xlu1 %v4686_v28, %s3773_s30  ;;  %v4714_v57 = vsel %vm572_vm1, %v579_v10, %v581_v33  ;;  %v4738_v10 = vsel %vm572_vm1, %v583_v0, %v584_v1  ;;  %v616_v55 = vrot.slane %v4015_v63, 2  ;;  %v613_v56 = vrot.slane %v4020_v3, 2 }
  0x82   :  { %504 = vrot.lane.b32.xlu0 %v4693_v25, %s3773_s30  ;;  %v4816_v39 = vsel %vm572_vm1, %v609_v46, %v611_v47  ;;  %v619_v62 = vrot.slane %v4038_v16, 2  ;;  %v621_v63 = vrot.slane %v4043_v18, 2  ;;  %v618_v3 = vrot.slane %v4048_v19, 2 }
  0x83   :  { %v4705_v44 = vpop.permute.xlu1 %394  ;;  %v4833_v47 = vsel %vm572_vm1, %v614_v54, %v616_v55  ;;  %v624_v16 = vrot.slane %v4066_v34, 2  ;;  %v626_v18 = vrot.slane %v4071_v35, 2  ;;  %v623_v19 = vrot.slane %v4076_v37, 2 }
  0x84   :  { %8531 = vst [vmem:[#allocation115_spill] sm:$0xff] %v4705_v44  ;;  %v4709_v41 = vpop.permute.xlu0 %392  ;;  %8547 = vst [vmem:[#allocation131_spill] sm:$0xff] %v4833_v47  ;;  %v4850_v55 = vsel %vm572_vm1, %v619_v62, %v621_v63  ;;  %v629_v34 = vrot.slane %v4094_v53, 2  ;;  %v631_v35 = vrot.slane %v4099_v58, 2  ;;  %v628_v37 = vrot.slane %v4104_v59, 2  ;;  %v8608_v44 = vld [vmem:[#allocation55_spill] sm:$0xff] }
  0x85   :  { %8532 = vst [vmem:[#allocation116_spill] sm:$0xff] %v4709_v41  ;;  %735 = vrot.lane.b32.xlu1 %v577_v5, %s3774_s22  ;;  %v4731_v5 = vsel %vm572_vm1, %v584_v1, %v586_v7  ;;  %v4755_v1 = vsel %vm572_vm1, %v588_v15, %v589_v11  ;;  %v4772_v11 = vsel %vm572_vm1, %v593_v24, %v594_v22  ;;  %8551 = vst [vmem:[#allocation135_spill] sm:$0xff] %v4850_v55  ;;  %v8609_v41 = vld [vmem:[#allocation56_spill] sm:$0xff] }
  0x86   :  { %733 = vrot.lane.b32.xlu0 %v575_v43, %s3774_s22  ;;  %v4789_v22 = vsel %vm572_vm1, %v598_v32, %v599_v30  ;;  %v4806_v30 = vsel %vm572_vm1, %v603_v40, %v604_v38  ;;  %v4823_v38 = vsel %vm572_vm1, %v608_v48, %v609_v46  ;;  %v4840_v46 = vsel %vm572_vm1, %v613_v56, %v614_v54 }
  0x87   :  { %v4718_v6 = vpop.permute.xlu1 %398  ;;  %8549 = vst [vmem:[#allocation133_spill] sm:$0xff] %v4840_v46  ;;  %v4857_v54 = vsel %vm572_vm1, %v618_v3, %v619_v62  ;;  %v4867_v63 = vsel %vm572_vm1, %v624_v16, %v626_v18  ;;  %v4874_v62 = vsel %vm572_vm1, %v623_v19, %v624_v16  ;;  %v4884_v18 = vsel %vm572_vm1, %v629_v34, %v631_v35 }
  0x88   :  { %8533 = vst [vmem:[#allocation117_spill] sm:$0xff] %v4718_v6  ;;  %v4724_v51 = vpop.permute.xlu0 %396  ;;  %8553 = vst [vmem:[#allocation137_spill] sm:$0xff] %v4857_v54  ;;  %v634_v53 = vrot.slane %v4122_v26, 2  ;;  %v636_v58 = vrot.slane %v4127_v29, 2  ;;  %v4891_v16 = vsel %vm572_vm1, %v628_v37, %v629_v34  ;;  %v633_v59 = vrot.slane %v4132_v45, 2  ;;  %v8601_v6 = vld [vmem:[#allocation50_spill] sm:$0xff] }
  0x89   :  { %8534 = vst [vmem:[#allocation118_spill] sm:$0xff] %v4724_v51  ;;  %739 = vrot.lane.b32.xlu1 %v4714_v57, %s3774_s22  ;;  %8555 = vst [vmem:[#allocation139_spill] sm:$0xff] %v4867_v63  ;;  %v639_v26 = vrot.slane %v4150_v20, 2  ;;  %v641_v29 = vrot.slane %v4155_v13, 2  ;;  %v638_v45 = vrot.slane %v4160_v8, 2  ;;  %v644_v20 = vrot.slane %v4178_v60, 2 }
  0x8a   :  { %737 = vrot.lane.b32.xlu0 %v4721_v12, %s3774_s22  ;;  %8557 = vst [vmem:[#allocation141_spill] sm:$0xff] %v4874_v62  ;;  %8559 = vst [vmem:[#allocation143_spill] sm:$0xff] %v4884_v18  ;;  %v4901_v35 = vsel %vm572_vm1, %v634_v53, %v636_v58  ;;  %v4908_v34 = vsel %vm572_vm1, %v633_v59, %v634_v53  ;;  %v646_v13 = vrot.slane %v4183_v42, 2  ;;  %v643_v8 = vrot.slane %v4188_v50, 2  ;;  %v8602_v51 = vld [vmem:[#allocation51_spill] sm:$0xff] }
  0x8b   :  { %v4735_v33 = vpop.permute.xlu1 %402  ;;  %8561 = vst [vmem:[#allocation145_spill] sm:$0xff] %v4891_v16  ;;  %8563 = vst [vmem:[#allocation147_spill] sm:$0xff] %v4901_v35  ;;  %v4918_v58 = vsel %vm572_vm1, %v639_v26, %v641_v29  ;;  %v4925_v53 = vsel %vm572_vm1, %v638_v45, %v639_v26  ;;  %v649_v60 = vrot.slane %v4206_v49, 2  ;;  %v651_v42 = vrot.slane %v4211_v9, 2  ;;  %v8576_v9 = vld [vmem:[#allocation33_spill] sm:$0xff] }
  0x8c   :  { %8535 = vst [vmem:[#allocation119_spill] sm:$0xff] %v4735_v33  ;;  %v4741_v43 = vpop.permute.xlu0 %400  ;;  %8565 = vst [vmem:[#allocation149_spill] sm:$0xff] %v4908_v34  ;;  %v4935_v29 = vsel %vm572_vm1, %v644_v20, %v646_v13  ;;  %v4942_v26 = vsel %vm572_vm1, %v643_v8, %v644_v20  ;;  %v648_v50 = vrot.slane %v4216_v61, 2  ;;  %v654_v49 = vrot.slane %v4234_v36, 2  ;;  %v8579_v61 = vld [vmem:[#allocation34_spill] sm:$0xff]  ;;  %v8581_v36 = vld [vmem:[#allocation37_spill] sm:$0xff] }
  0x8d   :  { %8536 = vst [vmem:[#allocation120_spill] sm:$0xff] %v4741_v43  ;;  %743 = vrot.lane.b32.xlu1 %v4731_v5, %s3774_s22  ;;  %8567 = vst [vmem:[#allocation151_spill] sm:$0xff] %v4918_v58  ;;  %v4952_v13 = vsel %vm572_vm1, %v649_v60, %v651_v42  ;;  %v653_v8 = vrot.slane %v8579_v61, 2 }
  0x8e   :  { %741 = vrot.lane.b32.xlu0 %v4738_v10, %s3774_s22  ;;  %8569 = vst [vmem:[#allocation153_spill] sm:$0xff] %v4925_v53  ;;  %8571 = vst [vmem:[#allocation155_spill] sm:$0xff] %v4935_v29  ;;  %v4959_v20 = vsel %vm572_vm1, %v648_v50, %v649_v60  ;;  %v8584_v50 = vld [vmem:[#allocation39_spill] sm:$0xff] }
  0x8f   :  { %v4752_v7 = vpop.permute.xlu1 %406  ;;  %8573 = vst [vmem:[#allocation157_spill] sm:$0xff] %v4942_v26  ;;  %8575 = vst [vmem:[#allocation159_spill] sm:$0xff] %v4952_v13  ;;  %v655_v60 = vsel %vm572_vm1, %v653_v8, %v654_v49  ;;  %v658_v61 = vrot.slane %v8584_v50, 2 }
  0x90   :  { %8537 = vst [vmem:[#allocation121_spill] sm:$0xff] %v4752_v7  ;;  %v4758_v0 = vpop.permute.xlu0 %404  ;;  %8578 = vst [vmem:[#allocation160_spill] sm:$0xff] %v4959_v20 }
  0x91   :  { %8538 = vst [vmem:[#allocation122_spill] sm:$0xff] %v4758_v0  ;;  %747 = vrot.lane.b32.xlu1 %v4748_v2, %s3774_s22 }
  0x92   :  { %745 = vrot.lane.b32.xlu0 %v4755_v1, %s3774_s22 }
  0x93   :  { %v4769_v7 = vpop.permute.xlu1 %410 }
  0x94   :  { %8539 = vst [vmem:[#allocation123_spill] sm:$0xff] %v4769_v7  ;;  %v4775_v15 = vpop.permute.xlu0 %408 }
  0x95   :  { %8540 = vst [vmem:[#allocation124_spill] sm:$0xff] %v4775_v15  ;;  %751 = vrot.lane.b32.xlu1 %v4765_v14, %s3774_s22 }
  0x96   :  { %749 = vrot.lane.b32.xlu0 %v4772_v11, %s3774_s22 }
  0x97   :  { %v4786_v7 = vpop.permute.xlu1 %414 }
  0x98   :  { %8541 = vst [vmem:[#allocation125_spill] sm:$0xff] %v4786_v7  ;;  %v4792_v24 = vpop.permute.xlu0 %412 }
  0x99   :  { %8542 = vst [vmem:[#allocation126_spill] sm:$0xff] %v4792_v24  ;;  %755 = vrot.lane.b32.xlu1 %v4782_v23, %s3774_s22 }
  0x9a   :  { %753 = vrot.lane.b32.xlu0 %v4789_v22, %s3774_s22 }
  0x9b   :  { %v4803_v7 = vpop.permute.xlu1 %418 }
  0x9c   :  { %8543 = vst [vmem:[#allocation127_spill] sm:$0xff] %v4803_v7  ;;  %v4809_v32 = vpop.permute.xlu0 %416 }
  0x9d   :  { %8544 = vst [vmem:[#allocation128_spill] sm:$0xff] %v4809_v32  ;;  %759 = vrot.lane.b32.xlu1 %v4799_v31, %s3774_s22 }
  0x9e   :  { %757 = vrot.lane.b32.xlu0 %v4806_v30, %s3774_s22 }
  0x9f   :  { %v4820_v7 = vpop.permute.xlu1 %422 }
  0xa0   :  { %8545 = vst [vmem:[#allocation129_spill] sm:$0xff] %v4820_v7  ;;  %v4826_v40 = vpop.permute.xlu0 %420 }
  0xa1   :  { %8546 = vst [vmem:[#allocation130_spill] sm:$0xff] %v4826_v40  ;;  %763 = vrot.lane.b32.xlu1 %v4816_v39, %s3774_s22 }
  0xa2   :  { %761 = vrot.lane.b32.xlu0 %v4823_v38, %s3774_s22 }
  0xa3   :  { %v4837_v7 = vpop.permute.xlu1 %426 }
  0xa4   :  { %8548 = vst [vmem:[#allocation132_spill] sm:$0xff] %v4837_v7  ;;  %v4843_v48 = vpop.permute.xlu0 %424 }
  0xa5   :  { %8550 = vst [vmem:[#allocation134_spill] sm:$0xff] %v4843_v48  ;;  %767 = vrot.lane.b32.xlu1 %v4833_v47, %s3774_s22  ;;  %v659_v48 = vrot.slane %v8581_v36, 2  ;;  %v8588_v36 = vld [vmem:[#allocation41_spill] sm:$0xff] }
  0xa6   :  { %765 = vrot.lane.b32.xlu0 %v4840_v46, %s3774_s22  ;;  %v666_v33 = vrot.slane %v8588_v36, 2 }
  0xa7   :  { %v4854_v7 = vpop.permute.xlu1 %430  ;;  %v4987_v43 = vsel %vm572_vm1, %v658_v61, %v659_v48  ;;  %v8598_v61 = vld [vmem:[#allocation47_spill] sm:$0xff] }
  0xa8   :  { %8552 = vst [vmem:[#allocation136_spill] sm:$0xff] %v4854_v7  ;;  %v4860_v56 = vpop.permute.xlu0 %428  ;;  %8590 = vst [vmem:[#allocation41_spill] sm:$0xff] %v4987_v43 }
  0xa9   :  { %8554 = vst [vmem:[#allocation138_spill] sm:$0xff] %v4860_v56  ;;  %771 = vrot.lane.b32.xlu1 %v4850_v55, %s3774_s22 }
  0xaa   :  { %769 = vrot.lane.b32.xlu0 %v4857_v54, %s3774_s22 }
  0xab   :  { %v4871_v7 = vpop.permute.xlu1 %434 }
  0xac   :  { %8556 = vst [vmem:[#allocation140_spill] sm:$0xff] %v4871_v7  ;;  %v4877_v3 = vpop.permute.xlu0 %432 }
  0xad   :  { %8558 = vst [vmem:[#allocation142_spill] sm:$0xff] %v4877_v3  ;;  %775 = vrot.lane.b32.xlu1 %v4867_v63, %s3774_s22 }
  0xae   :  { %773 = vrot.lane.b32.xlu0 %v4874_v62, %s3774_s22 }
  0xaf   :  { %v4888_v7 = vpop.permute.xlu1 %438 }
  0xb0   :  { %8560 = vst [vmem:[#allocation144_spill] sm:$0xff] %v4888_v7  ;;  %v4894_v19 = vpop.permute.xlu0 %436 }
  0xb1   :  { %8562 = vst [vmem:[#allocation146_spill] sm:$0xff] %v4894_v19  ;;  %779 = vrot.lane.b32.xlu1 %v4884_v18, %s3774_s22  ;;  %v656_v19 = vrot.slane %v8576_v9, 2  ;;  %v8582_v9 = vld [vmem:[#allocation38_spill] sm:$0xff] }
  0xb2   :  { %777 = vrot.lane.b32.xlu0 %v4891_v16, %s3774_s22  ;;  %v661_v40 = vrot.slane %v8582_v9, 2 }
  0xb3   :  { %v4905_v7 = vpop.permute.xlu1 %442  ;;  %v657_v42 = vsel %vm572_vm1, %v654_v49, %v656_v19  ;;  %v8587_v19 = vld [vmem:[#allocation40_spill] sm:$0xff]  ;;  %v8591_v49 = vld [vmem:[#allocation42_spill] sm:$0xff] }
  0xb4   :  { %8564 = vst [vmem:[#allocation148_spill] sm:$0xff] %v4905_v7  ;;  %v4911_v37 = vpop.permute.xlu0 %440  ;;  %v4980_v15 = vsel %vm572_vm1, %v659_v48, %v661_v40  ;;  %v664_v0 = vrot.slane %v8587_v19, 2  ;;  %v663_v8 = vrot.slane %v8591_v49, 2  ;;  %v8595_v19 = vld [vmem:[#allocation46_spill] sm:$0xff]  ;;  %v668_v49 = vrot.slane %v8598_v61, 2 }
  0xb5   :  { %8566 = vst [vmem:[#allocation150_spill] sm:$0xff] %v4911_v37  ;;  %783 = vrot.lane.b32.xlu1 %v4901_v35, %s3774_s22  ;;  %8586 = vst [vmem:[#allocation39_spill] sm:$0xff] %v4980_v15  ;;  %v671_v36 = vrot.slane %v8595_v19, 2  ;;  %v674_v19 = vrot.slane %v8601_v6, 2 }
  0xb6   :  { %781 = vrot.lane.b32.xlu0 %v4908_v34, %s3774_s22  ;;  %v4997_v40 = vsel %vm572_vm1, %v664_v0, %v666_v33  ;;  %v5004_v48 = vsel %vm572_vm1, %v663_v8, %v664_v0  ;;  %v8605_v8 = vld [vmem:[#allocation52_spill] sm:$0xff] }
  0xb7   :  { %v4922_v7 = vpop.permute.xlu1 %446  ;;  %8593 = vst [vmem:[#allocation161_spill] sm:$0xff] %v4997_v40  ;;  %8597 = vst [vmem:[#allocation46_spill] sm:$0xff] %v5004_v48 }
  0xb8   :  { %8568 = vst [vmem:[#allocation152_spill] sm:$0xff] %v4922_v7  ;;  %v4928_v59 = vpop.permute.xlu0 %444 }
  0xb9   :  { %8570 = vst [vmem:[#allocation154_spill] sm:$0xff] %v4928_v59  ;;  %787 = vrot.lane.b32.xlu1 %v4918_v58, %s3774_s22 }
  0xba   :  { %785 = vrot.lane.b32.xlu0 %v4925_v53, %s3774_s22 }
  0xbb   :  { %v4939_v37 = vpop.permute.xlu1 %450 }
  0xbc   :  { %8572 = vst [vmem:[#allocation156_spill] sm:$0xff] %v4939_v37  ;;  %v4945_v45 = vpop.permute.xlu0 %448  ;;  %v8615_v37 = vld [vmem:[#allocation60_spill] sm:$0xff] }
  0xbd   :  { %8574 = vst [vmem:[#allocation158_spill] sm:$0xff] %v4945_v45  ;;  %791 = vrot.lane.b32.xlu1 %v4935_v29, %s3774_s22  ;;  %v8616_v45 = vld [vmem:[#allocation61_spill] sm:$0xff] }
  0xbe   :  { %789 = vrot.lane.b32.xlu0 %v4942_v26, %s3774_s22 }
  0xbf   :  { %v4956_v3 = vpop.permute.xlu1 %454 }
  0xc0   :  { %8577 = vst [vmem:[#allocation33_spill] sm:$0xff] %v4956_v3  ;;  %v4962_v56 = vpop.permute.xlu0 %452 }
  0xc1   :  { %8580 = vst [vmem:[#allocation34_spill] sm:$0xff] %v4962_v56  ;;  %795 = vrot.lane.b32.xlu1 %v4952_v13, %s3774_s22 }
  0xc2   :  { %793 = vrot.lane.b32.xlu0 %v4959_v20, %s3774_s22 }
  0xc3   :  { %v4971_v32 = vpop.permute.xlu1 %458 }
  0xc4   :  { %8583 = vst [vmem:[#allocation37_spill] sm:$0xff] %v4971_v32  ;;  %v4975_v24 = vpop.permute.xlu0 %456 }
  0xc5   :  { %8585 = vst [vmem:[#allocation38_spill] sm:$0xff] %v4975_v24  ;;  %799 = vrot.lane.b32.xlu1 %v657_v42, %s3774_s22  ;;  %v8594_v42 = vld [vmem:[#allocation45_spill] sm:$0xff] }
  0xc6   :  { %797 = vrot.lane.b32.xlu0 %v655_v60, %s3774_s22  ;;  %v669_v60 = vrot.slane %v8594_v42, 2 }
  0xc7   :  { %v4984_v9 = vpop.permute.xlu1 %462 }
  0xc8   :  { %8589 = vst [vmem:[#allocation40_spill] sm:$0xff] %v4984_v9  ;;  %v4990_v50 = vpop.permute.xlu0 %460  ;;  %v5014_v33 = vsel %vm572_vm1, %v669_v60, %v671_v36  ;;  %v5021_v0 = vsel %vm572_vm1, %v668_v49, %v669_v60  ;;  %v8612_v49 = vld [vmem:[#allocation57_spill] sm:$0xff] }
  0xc9   :  { %8592 = vst [vmem:[#allocation42_spill] sm:$0xff] %v4990_v50  ;;  %803 = vrot.lane.b32.xlu1 %v4980_v15, %s3774_s22  ;;  %8600 = vst [vmem:[#allocation162_spill] sm:$0xff] %v5014_v33 }
  0xca   :  { %801 = vrot.lane.b32.xlu0 %v4987_v43, %s3774_s22  ;;  %8604 = vst [vmem:[#allocation51_spill] sm:$0xff] %v5021_v0 }
  0xcb   :  { %v5001_v9 = vpop.permute.xlu1 %466 }
  0xcc   :  { %8596 = vst [vmem:[#allocation45_spill] sm:$0xff] %v5001_v9  ;;  %v5007_v50 = vpop.permute.xlu0 %464  ;;  %v676_v9 = vrot.slane %v8602_v51, 2  ;;  %v679_v51 = vrot.slane %v8608_v44, 2 }
  0xcd   :  { %8599 = vst [vmem:[#allocation47_spill] sm:$0xff] %v5007_v50  ;;  %807 = vrot.lane.b32.xlu1 %v4997_v40, %s3774_s22  ;;  %v673_v50 = vrot.slane %v8605_v8, 2 }
  0xce   :  { %805 = vrot.lane.b32.xlu0 %v5004_v48, %s3774_s22  ;;  %v5031_v36 = vsel %vm572_vm1, %v674_v19, %v676_v9 }
  0xcf   :  { %v5018_v32 = vpop.permute.xlu1 %470  ;;  %8607 = vst [vmem:[#allocation163_spill] sm:$0xff] %v5031_v36  ;;  %v5038_v60 = vsel %vm572_vm1, %v673_v50, %v674_v19  ;;  %v8619_v19 = vld [vmem:[#allocation62_spill] sm:$0xff] }
  0xd0   :  { %8603 = vst [vmem:[#allocation50_spill] sm:$0xff] %v5018_v32  ;;  %v5024_v24 = vpop.permute.xlu0 %468  ;;  %v681_v32 = vrot.slane %v8609_v41, 2  ;;  %8611 = vst [vmem:[#allocation56_spill] sm:$0xff] %v5038_v60  ;;  %v684_v41 = vrot.slane %v8615_v37, 2 }
  0xd1   :  { %8606 = vst [vmem:[#allocation52_spill] sm:$0xff] %v5024_v24  ;;  %811 = vrot.lane.b32.xlu1 %v5014_v33, %s3774_s22  ;;  %v678_v24 = vrot.slane %v8612_v49, 2 }
  0xd2   :  { %809 = vrot.lane.b32.xlu0 %v5021_v0, %s3774_s22  ;;  %v5048_v9 = vsel %vm572_vm1, %v679_v51, %v681_v32 }
  0xd3   :  { %v5035_v3 = vpop.permute.xlu1 %474  ;;  %8614 = vst [vmem:[#allocation164_spill] sm:$0xff] %v5048_v9  ;;  %v5055_v50 = vsel %vm572_vm1, %v678_v24, %v679_v51  ;;  %v8626_v51 = vld [vmem:[#allocation67_spill] sm:$0xff] }
  0xd4   :  { %8610 = vst [vmem:[#allocation55_spill] sm:$0xff] %v5035_v3  ;;  %v5041_v56 = vpop.permute.xlu0 %472  ;;  %v686_v3 = vrot.slane %v8616_v45, 2  ;;  %8618 = vst [vmem:[#allocation61_spill] sm:$0xff] %v5055_v50 }
  0xd5   :  { %8613 = vst [vmem:[#allocation57_spill] sm:$0xff] %v5041_v56  ;;  %815 = vrot.lane.b32.xlu1 %v5031_v36, %s3774_s22  ;;  %v683_v56 = vrot.slane %v8619_v19, 2  ;;  %v8623_v36 = vld [vmem:[#allocation66_spill] sm:$0xff] }
  0xd6   :  { %813 = vrot.lane.b32.xlu0 %v5038_v60, %s3774_s22  ;;  %v5065_v32 = vsel %vm572_vm1, %v684_v41, %v686_v3  ;;  %v8622_v60 = vld [vmem:[#allocation65_spill] sm:$0xff] }
  0xd7   :  { %v5052_v7 = vpop.permute.xlu1 %478  ;;  %8621 = vst [vmem:[#allocation165_spill] sm:$0xff] %v5065_v32  ;;  %v689_v45 = vrot.slane %v8622_v60, 2  ;;  %v5072_v24 = vsel %vm572_vm1, %v683_v56, %v684_v41  ;;  %v8633_v41 = vld [vmem:[#allocation72_spill] sm:$0xff] }
  0xd8   :  { %8617 = vst [vmem:[#allocation60_spill] sm:$0xff] %v5052_v7  ;;  %v5058_v59 = vpop.permute.xlu0 %476  ;;  %v691_v7 = vrot.slane %v8623_v36, 2  ;;  %8625 = vst [vmem:[#allocation66_spill] sm:$0xff] %v5072_v24 }
  0xd9   :  { %8620 = vst [vmem:[#allocation62_spill] sm:$0xff] %v5058_v59  ;;  %819 = vrot.lane.b32.xlu1 %v5048_v9, %s3774_s22  ;;  %v688_v59 = vrot.slane %v8626_v51, 2  ;;  %v8630_v9 = vld [vmem:[#allocation71_spill] sm:$0xff] }
  0xda   :  { %817 = vrot.lane.b32.xlu0 %v5055_v50, %s3774_s22  ;;  %v5082_v3 = vsel %vm572_vm1, %v689_v45, %v691_v7  ;;  %v8629_v50 = vld [vmem:[#allocation70_spill] sm:$0xff] }
  0xdb   :  { %v5069_v0 = vpop.permute.xlu1 %482  ;;  %8628 = vst [vmem:[#allocation166_spill] sm:$0xff] %v5082_v3  ;;  %v694_v36 = vrot.slane %v8629_v50, 2  ;;  %v5089_v56 = vsel %vm572_vm1, %v688_v59, %v689_v45  ;;  %v8640_v45 = vld [vmem:[#allocation77_spill] sm:$0xff] }
  0xdc   :  { %8624 = vst [vmem:[#allocation65_spill] sm:$0xff] %v5069_v0  ;;  %v5075_v33 = vpop.permute.xlu0 %480  ;;  %v696_v0 = vrot.slane %v8630_v9, 2  ;;  %8632 = vst [vmem:[#allocation71_spill] sm:$0xff] %v5089_v56 }
  0xdd   :  { %8627 = vst [vmem:[#allocation67_spill] sm:$0xff] %v5075_v33  ;;  %823 = vrot.lane.b32.xlu1 %v5065_v32, %s3774_s22  ;;  %v693_v33 = vrot.slane %v8633_v41, 2  ;;  %v8637_v32 = vld [vmem:[#allocation76_spill] sm:$0xff] }
  0xde   :  { %821 = vrot.lane.b32.xlu0 %v5072_v24, %s3774_s22  ;;  %v5099_v7 = vsel %vm572_vm1, %v694_v36, %v696_v0  ;;  %v8636_v24 = vld [vmem:[#allocation75_spill] sm:$0xff] }
  0xdf   :  { %v5086_v48 = vpop.permute.xlu1 %486  ;;  %8635 = vst [vmem:[#allocation167_spill] sm:$0xff] %v5099_v7  ;;  %v699_v9 = vrot.slane %v8636_v24, 2  ;;  %v5106_v59 = vsel %vm572_vm1, %v693_v33, %v694_v36  ;;  %v8647_v36 = vld [vmem:[#allocation82_spill] sm:$0xff] }
  0xe0   :  { %8631 = vst [vmem:[#allocation70_spill] sm:$0xff] %v5086_v48  ;;  %v5092_v40 = vpop.permute.xlu0 %484  ;;  %v701_v48 = vrot.slane %v8637_v32, 2  ;;  %8639 = vst [vmem:[#allocation76_spill] sm:$0xff] %v5106_v59 }
  0xe1   :  { %8634 = vst [vmem:[#allocation72_spill] sm:$0xff] %v5092_v40  ;;  %827 = vrot.lane.b32.xlu1 %v5082_v3, %s3774_s22  ;;  %v698_v40 = vrot.slane %v8640_v45, 2  ;;  %v8644_v3 = vld [vmem:[#allocation81_spill] sm:$0xff] }
  0xe2   :  { %825 = vrot.lane.b32.xlu0 %v5089_v56, %s3774_s22  ;;  %v5116_v0 = vsel %vm572_vm1, %v699_v9, %v701_v48  ;;  %v8643_v56 = vld [vmem:[#allocation80_spill] sm:$0xff] }
  0xe3   :  { %v5103_v43 = vpop.permute.xlu1 %490  ;;  %8642 = vst [vmem:[#allocation168_spill] sm:$0xff] %v5116_v0  ;;  %v704_v32 = vrot.slane %v8643_v56, 2  ;;  %v5123_v33 = vsel %vm572_vm1, %v698_v40, %v699_v9  ;;  %v8654_v9 = vld [vmem:[#allocation87_spill] sm:$0xff] }
  0xe4   :  { %8638 = vst [vmem:[#allocation75_spill] sm:$0xff] %v5103_v43  ;;  %v5109_v15 = vpop.permute.xlu0 %488  ;;  %v706_v43 = vrot.slane %v8644_v3, 2  ;;  %8646 = vst [vmem:[#allocation81_spill] sm:$0xff] %v5123_v33 }
  0xe5   :  { %8641 = vst [vmem:[#allocation77_spill] sm:$0xff] %v5109_v15  ;;  %831 = vrot.lane.b32.xlu1 %v5099_v7, %s3774_s22  ;;  %v703_v15 = vrot.slane %v8647_v36, 2  ;;  %v8651_v7 = vld [vmem:[#allocation86_spill] sm:$0xff] }
  0xe6   :  { %829 = vrot.lane.b32.xlu0 %v5106_v59, %s3774_s22  ;;  %v5133_v48 = vsel %vm572_vm1, %v704_v32, %v706_v43  ;;  %v8650_v59 = vld [vmem:[#allocation85_spill] sm:$0xff] }
  0xe7   :  { %v5120_v20 = vpop.permute.xlu1 %494  ;;  %8649 = vst [vmem:[#allocation169_spill] sm:$0xff] %v5133_v48  ;;  %v709_v3 = vrot.slane %v8650_v59, 2  ;;  %v5140_v40 = vsel %vm572_vm1, %v703_v15, %v704_v32  ;;  %v8661_v32 = vld [vmem:[#allocation92_spill] sm:$0xff] }
  0xe8   :  { %8645 = vst [vmem:[#allocation80_spill] sm:$0xff] %v5120_v20  ;;  %v5126_v13 = vpop.permute.xlu0 %492  ;;  %v711_v20 = vrot.slane %v8651_v7, 2  ;;  %8653 = vst [vmem:[#allocation86_spill] sm:$0xff] %v5140_v40 }
  0xe9   :  { %8648 = vst [vmem:[#allocation82_spill] sm:$0xff] %v5126_v13  ;;  %835 = vrot.lane.b32.xlu1 %v5116_v0, %s3774_s22  ;;  %v708_v13 = vrot.slane %v8654_v9, 2  ;;  %v8658_v0 = vld [vmem:[#allocation91_spill] sm:$0xff] }
  0xea   :  { %833 = vrot.lane.b32.xlu0 %v5123_v33, %s3774_s22  ;;  %v5150_v43 = vsel %vm572_vm1, %v709_v3, %v711_v20  ;;  %v8657_v33 = vld [vmem:[#allocation90_spill] sm:$0xff] }
  0xeb   :  { %v5137_v26 = vpop.permute.xlu1 %498  ;;  %8656 = vst [vmem:[#allocation170_spill] sm:$0xff] %v5150_v43  ;;  %v714_v7 = vrot.slane %v8657_v33, 2  ;;  %v5157_v15 = vsel %vm572_vm1, %v708_v13, %v709_v3  ;;  %v8668_v3 = vld [vmem:[#allocation97_spill] sm:$0xff] }
  0xec   :  { %8652 = vst [vmem:[#allocation85_spill] sm:$0xff] %v5137_v26  ;;  %v5143_v29 = vpop.permute.xlu0 %496  ;;  %v716_v26 = vrot.slane %v8658_v0, 2  ;;  %8660 = vst [vmem:[#allocation91_spill] sm:$0xff] %v5157_v15 }
  0xed   :  { %8655 = vst [vmem:[#allocation87_spill] sm:$0xff] %v5143_v29  ;;  %839 = vrot.lane.b32.xlu1 %v5133_v48, %s3774_s22  ;;  %v713_v29 = vrot.slane %v8661_v32, 2  ;;  %v8665_v48 = vld [vmem:[#allocation96_spill] sm:$0xff] }
  0xee   :  { %837 = vrot.lane.b32.xlu0 %v5140_v40, %s3774_s22  ;;  %v5167_v20 = vsel %vm572_vm1, %v714_v7, %v716_v26  ;;  %v8664_v40 = vld [vmem:[#allocation95_spill] sm:$0xff] }
  0xef   :  { %v5154_v53 = vpop.permute.xlu1 %502  ;;  %8663 = vst [vmem:[#allocation171_spill] sm:$0xff] %v5167_v20  ;;  %v719_v0 = vrot.slane %v8664_v40, 2  ;;  %v5174_v13 = vsel %vm572_vm1, %v713_v29, %v714_v7  ;;  %v8675_v7 = vld [vmem:[#allocation102_spill] sm:$0xff] }
  0xf0   :  { %8659 = vst [vmem:[#allocation90_spill] sm:$0xff] %v5154_v53  ;;  %v5160_v58 = vpop.permute.xlu0 %500  ;;  %v721_v53 = vrot.slane %v8665_v48, 2  ;;  %8667 = vst [vmem:[#allocation96_spill] sm:$0xff] %v5174_v13 }
  0xf1   :  { %8662 = vst [vmem:[#allocation92_spill] sm:$0xff] %v5160_v58  ;;  %843 = vrot.lane.b32.xlu1 %v5150_v43, %s3774_s22  ;;  %v718_v58 = vrot.slane %v8668_v3, 2  ;;  %v8672_v43 = vld [vmem:[#allocation101_spill] sm:$0xff] }
  0xf2   :  { %841 = vrot.lane.b32.xlu0 %v5157_v15, %s3774_s22  ;;  %v5184_v26 = vsel %vm572_vm1, %v719_v0, %v721_v53  ;;  %v8671_v15 = vld [vmem:[#allocation100_spill] sm:$0xff] }
  0xf3   :  { %v5171_v34 = vpop.permute.xlu1 %506  ;;  %8670 = vst [vmem:[#allocation172_spill] sm:$0xff] %v5184_v26  ;;  %v724_v48 = vrot.slane %v8671_v15, 2  ;;  %v5191_v29 = vsel %vm572_vm1, %v718_v58, %v719_v0  ;;  %v728_v0 = vrot.slane %v4662_v4, 2 }
  0xf4   :  { %8666 = vst [vmem:[#allocation95_spill] sm:$0xff] %v5171_v34  ;;  %v5177_v35 = vpop.permute.xlu0 %504  ;;  %v726_v34 = vrot.slane %v8672_v43, 2  ;;  %8674 = vst [vmem:[#allocation101_spill] sm:$0xff] %v5191_v29  ;;  %v729_v43 = vrot.slane %v4650_v17, 2 }
  0xf5   :  { %8669 = vst [vmem:[#allocation97_spill] sm:$0xff] %v5177_v35  ;;  %847 = vrot.lane.b32.xlu1 %v5167_v20, %s3774_s22  ;;  %v723_v35 = vrot.slane %v8675_v7, 2 }
  0xf6   :  { %845 = vrot.lane.b32.xlu0 %v5174_v13, %s3774_s22  ;;  %v5201_v53 = vsel %vm572_vm1, %v724_v48, %v726_v34 }
  0xf7   :  { %v5188_v16 = vpop.permute.xlu1 %735  ;;  %8677 = vst [vmem:[#allocation173_spill] sm:$0xff] %v5201_v53  ;;  %v5208_v58 = vsel %vm572_vm1, %v723_v35, %v724_v48 }
  0xf8   :  { %8673 = vst [vmem:[#allocation100_spill] sm:$0xff] %v5188_v16  ;;  %v5194_v18 = vpop.permute.xlu0 %733  ;;  %v731_v16 = vrot.slane %v4655_v21, 2  ;;  %8679 = vst [vmem:[#allocation175_spill] sm:$0xff] %v5208_v58  ;;  %v5223_v21 = vsel %vm572_vm1, %v728_v0, %v729_v43 }
  0xf9   :  { %8676 = vst [vmem:[#allocation102_spill] sm:$0xff] %v5194_v18  ;;  %851 = vrot.lane.b32.xlu1 %v5184_v26, %s3774_s22  ;;  %8683 = vst [vmem:[#allocation179_spill] sm:$0xff] %v5223_v21 }
  0xfa   :  { %849 = vrot.lane.b32.xlu0 %v5191_v29, %s3774_s22  ;;  %v5218_v34 = vsel %vm572_vm1, %v729_v43, %v731_v16  ;;  %v3648_v16 = vld [vmem:[%s8119_s0 + $0x20] sm:$0xff]  ;;  %v3649_v43 = vld [vmem:[%s8119_s0 + $0x18] sm:$0xff] }
  0xfb   :  { %v5205_v13 = vpop.permute.xlu1 %739  ;;  %8681 = vst [vmem:[#allocation177_spill] sm:$0xff] %v5218_v34 }
  0xfc   :  { %8678 = vst [vmem:[#allocation174_spill] sm:$0xff] %v5205_v13  ;;  %v5211_v18 = vpop.permute.xlu0 %737 }
  0xfd   :  { %8680 = vst [vmem:[#allocation176_spill] sm:$0xff] %v5211_v18  ;;  %855 = vrot.lane.b32.xlu1 %v5201_v53, %s3774_s22  ;;  %v5293_v18 = vld [vmem:[%s8119_s0 + $0x60] sm:$0xff] }
  0xfe   :  { %853 = vrot.lane.b32.xlu0 %v5208_v58, %s3774_s22  ;;  %8698 = vst [vmem:[#allocation194_spill] sm:$0xff] %v5293_v18 }
  0xff   :  { %v5220_v29 = vpop.permute.xlu1 %743 }
 0x100   :  { %8682 = vst [vmem:[#allocation178_spill] sm:$0xff] %v5220_v29  ;;  %v5225_v35 = vpop.permute.xlu0 %741 }
 0x101   :  { %8684 = vst [vmem:[#allocation180_spill] sm:$0xff] %v5225_v35  ;;  %859 = vrot.lane.b32.xlu1 %v5218_v34, %s3774_s22 }
 0x102   :  { %857 = vrot.lane.b32.xlu0 %v5223_v21, %s3774_s22 }
 0x103   :  { %v5231_v48 = vpop.permute.xlu1 %747 }
 0x104   :  { %8685 = vst [vmem:[#allocation181_spill] sm:$0xff] %v5231_v48  ;;  %v5233_v13 = vpop.permute.xlu0 %745  ;;  %v5250_v48 = vld [vmem:[%s8119_s0 + $0x38] sm:$0xff] }
 0x105   :  { %8686 = vst [vmem:[#allocation182_spill] sm:$0xff] %v5233_v13  ;;  %931 = vrot.lane.b32.xlu1 %v3648_v16, %s3775_s24  ;;  %8689 = vst [vmem:[#allocation185_spill] sm:$0xff] %v5250_v48  ;;  %v5257_v16 = vld [vmem:[%s8119_s0 + $0x30] sm:$0xff]  ;;  %v5275_v13 = vld [vmem:[%s8119_s0 + $0x48] sm:$0xff] }
 0x106   :  { %929 = vrot.lane.b32.xlu0 %v3649_v43, %s3775_s24  ;;  %8690 = vst [vmem:[#allocation186_spill] sm:$0xff] %v5257_v16  ;;  %8694 = vst [vmem:[#allocation190_spill] sm:$0xff] %v5275_v13 }
 0x107   :  { %v5243_v0 = vpop.permute.xlu1 %751 }
 0x108   :  { %8687 = vst [vmem:[#allocation183_spill] sm:$0xff] %v5243_v0  ;;  %v5245_v29 = vpop.permute.xlu0 %749 }
 0x109   :  { %8688 = vst [vmem:[#allocation184_spill] sm:$0xff] %v5245_v29  ;;  %935 = vrot.lane.b32.xlu1 %v5250_v48, %s3775_s24  ;;  %v5268_v29 = vld [vmem:[%s8119_s0 + $0x50] sm:$0xff] }
 0x10a   :  { %933 = vrot.lane.b32.xlu0 %v5257_v16, %s3775_s24  ;;  %8693 = vst [vmem:[#allocation189_spill] sm:$0xff] %v5268_v29 }
 0x10b   :  { %v5261_v43 = vpop.permute.xlu1 %755 }
 0x10c   :  { %8691 = vst [vmem:[#allocation187_spill] sm:$0xff] %v5261_v43  ;;  %v5263_v0 = vpop.permute.xlu0 %753 }
 0x10d   :  { %8692 = vst [vmem:[#allocation188_spill] sm:$0xff] %v5263_v0  ;;  %939 = vrot.lane.b32.xlu1 %v5268_v29, %s3775_s24  ;;  %v5286_v0 = vld [vmem:[%s8119_s0 + $0x68] sm:$0xff] }
 0x10e   :  { %937 = vrot.lane.b32.xlu0 %v5275_v13, %s3775_s24  ;;  %8697 = vst [vmem:[#allocation193_spill] sm:$0xff] %v5286_v0 }
 0x10f   :  { %v5279_v35 = vpop.permute.xlu1 %759 }
 0x110   :  { %8695 = vst [vmem:[#allocation191_spill] sm:$0xff] %v5279_v35  ;;  %v5281_v43 = vpop.permute.xlu0 %757 }
 0x111   :  { %8696 = vst [vmem:[#allocation192_spill] sm:$0xff] %v5281_v43  ;;  %943 = vrot.lane.b32.xlu1 %v5286_v0, %s3775_s24  ;;  %v5304_v43 = vld [vmem:[%s8119_s0 + $0x80] sm:$0xff]  ;;  %v5311_v0 = vld [vmem:[%s8119_s0 + $0x78] sm:$0xff] }
 0x112   :  { %941 = vrot.lane.b32.xlu0 %v5293_v18, %s3775_s24  ;;  %8701 = vst [vmem:[#allocation197_spill] sm:$0xff] %v5304_v43  ;;  %8702 = vst [vmem:[#allocation198_spill] sm:$0xff] %v5311_v0 }
 0x113   :  { %v5297_v13 = vpop.permute.xlu1 %763 }
 0x114   :  { %8699 = vst [vmem:[#allocation195_spill] sm:$0xff] %v5297_v13  ;;  %v5299_v35 = vpop.permute.xlu0 %761 }
 0x115   :  { %8700 = vst [vmem:[#allocation196_spill] sm:$0xff] %v5299_v35  ;;  %947 = vrot.lane.b32.xlu1 %v5304_v43, %s3775_s24  ;;  %v5322_v35 = vld [vmem:[%s8119_s0 + $0x98] sm:$0xff]  ;;  %v5329_v43 = vld [vmem:[%s8119_s0 + $0x90] sm:$0xff] }
 0x116   :  { %945 = vrot.lane.b32.xlu0 %v5311_v0, %s3775_s24  ;;  %8705 = vst [vmem:[#allocation201_spill] sm:$0xff] %v5322_v35  ;;  %8706 = vst [vmem:[#allocation202_spill] sm:$0xff] %v5329_v43 }
 0x117   :  { %v5315_v18 = vpop.permute.xlu1 %767 }
 0x118   :  { %8703 = vst [vmem:[#allocation199_spill] sm:$0xff] %v5315_v18  ;;  %v5317_v13 = vpop.permute.xlu0 %765 }
 0x119   :  { %8704 = vst [vmem:[#allocation200_spill] sm:$0xff] %v5317_v13  ;;  %951 = vrot.lane.b32.xlu1 %v5322_v35, %s3775_s24  ;;  %v5340_v13 = vld [vmem:[%s8119_s0 + $0xb0] sm:$0xff]  ;;  %v5347_v35 = vld [vmem:[%s8119_s0 + $0xa8] sm:$0xff] }
 0x11a   :  { %949 = vrot.lane.b32.xlu0 %v5329_v43, %s3775_s24  ;;  %8709 = vst [vmem:[#allocation205_spill] sm:$0xff] %v5340_v13  ;;  %8710 = vst [vmem:[#allocation206_spill] sm:$0xff] %v5347_v35 }
 0x11b   :  { %v5333_v0 = vpop.permute.xlu1 %771 }
 0x11c   :  { %8707 = vst [vmem:[#allocation203_spill] sm:$0xff] %v5333_v0  ;;  %v5335_v18 = vpop.permute.xlu0 %769 }
 0x11d   :  { %8708 = vst [vmem:[#allocation204_spill] sm:$0xff] %v5335_v18  ;;  %955 = vrot.lane.b32.xlu1 %v5340_v13, %s3775_s24  ;;  %v5358_v18 = vld [vmem:[%s8119_s0 + $0xc8] sm:$0xff]  ;;  %v5365_v13 = vld [vmem:[%s8119_s0 + $0xc0] sm:$0xff] }
 0x11e   :  { %953 = vrot.lane.b32.xlu0 %v5347_v35, %s3775_s24  ;;  %8713 = vst [vmem:[#allocation209_spill] sm:$0xff] %v5358_v18  ;;  %8714 = vst [vmem:[#allocation210_spill] sm:$0xff] %v5365_v13 }
 0x11f   :  { %v5351_v43 = vpop.permute.xlu1 %775 }
 0x120   :  { %8711 = vst [vmem:[#allocation207_spill] sm:$0xff] %v5351_v43  ;;  %v5353_v0 = vpop.permute.xlu0 %773 }
 0x121   :  { %8712 = vst [vmem:[#allocation208_spill] sm:$0xff] %v5353_v0  ;;  %959 = vrot.lane.b32.xlu1 %v5358_v18, %s3775_s24  ;;  %v5376_v0 = vld [vmem:[%s8119_s0 + $0xe0] sm:$0xff]  ;;  %v5383_v18 = vld [vmem:[%s8119_s0 + $0xd8] sm:$0xff] }
 0x122   :  { %957 = vrot.lane.b32.xlu0 %v5365_v13, %s3775_s24  ;;  %8717 = vst [vmem:[#allocation213_spill] sm:$0xff] %v5376_v0  ;;  %8718 = vst [vmem:[#allocation214_spill] sm:$0xff] %v5383_v18 }
 0x123   :  { %v5369_v35 = vpop.permute.xlu1 %779 }
 0x124   :  { %8715 = vst [vmem:[#allocation211_spill] sm:$0xff] %v5369_v35  ;;  %v5371_v43 = vpop.permute.xlu0 %777 }
 0x125   :  { %8716 = vst [vmem:[#allocation212_spill] sm:$0xff] %v5371_v43  ;;  %963 = vrot.lane.b32.xlu1 %v5376_v0, %s3775_s24  ;;  %v5394_v43 = vld [vmem:[%s8119_s0 + $0xf8] sm:$0xff]  ;;  %v5401_v0 = vld [vmem:[%s8119_s0 + $0xf0] sm:$0xff] }
 0x126   :  { %961 = vrot.lane.b32.xlu0 %v5383_v18, %s3775_s24  ;;  %8721 = vst [vmem:[#allocation217_spill] sm:$0xff] %v5394_v43  ;;  %8722 = vst [vmem:[#allocation218_spill] sm:$0xff] %v5401_v0 }
 0x127   :  { %v5387_v13 = vpop.permute.xlu1 %783 }
 0x128   :  { %8719 = vst [vmem:[#allocation215_spill] sm:$0xff] %v5387_v13  ;;  %v5389_v35 = vpop.permute.xlu0 %781 }
 0x129   :  { %8720 = vst [vmem:[#allocation216_spill] sm:$0xff] %v5389_v35  ;;  %967 = vrot.lane.b32.xlu1 %v5394_v43, %s3775_s24  ;;  %v5412_v35 = vld [vmem:[%s8119_s0 + $0x110] sm:$0xff]  ;;  %v5419_v43 = vld [vmem:[%s8119_s0 + $0x108] sm:$0xff] }
 0x12a   :  { %965 = vrot.lane.b32.xlu0 %v5401_v0, %s3775_s24  ;;  %8725 = vst [vmem:[#allocation221_spill] sm:$0xff] %v5412_v35  ;;  %8726 = vst [vmem:[#allocation222_spill] sm:$0xff] %v5419_v43 }
 0x12b   :  { %v5405_v18 = vpop.permute.xlu1 %787 }
 0x12c   :  { %8723 = vst [vmem:[#allocation219_spill] sm:$0xff] %v5405_v18  ;;  %v5407_v13 = vpop.permute.xlu0 %785 }
 0x12d   :  { %8724 = vst [vmem:[#allocation220_spill] sm:$0xff] %v5407_v13  ;;  %971 = vrot.lane.b32.xlu1 %v5412_v35, %s3775_s24  ;;  %v5430_v13 = vld [vmem:[%s8119_s0 + $0x128] sm:$0xff]  ;;  %v5437_v35 = vld [vmem:[%s8119_s0 + $0x120] sm:$0xff] }
 0x12e   :  { %969 = vrot.lane.b32.xlu0 %v5419_v43, %s3775_s24  ;;  %8729 = vst [vmem:[#allocation225_spill] sm:$0xff] %v5430_v13  ;;  %8730 = vst [vmem:[#allocation226_spill] sm:$0xff] %v5437_v35 }
 0x12f   :  { %v5423_v0 = vpop.permute.xlu1 %791 }
 0x130   :  { %8727 = vst [vmem:[#allocation223_spill] sm:$0xff] %v5423_v0  ;;  %v5425_v18 = vpop.permute.xlu0 %789 }
 0x131   :  { %8728 = vst [vmem:[#allocation224_spill] sm:$0xff] %v5425_v18  ;;  %975 = vrot.lane.b32.xlu1 %v5430_v13, %s3775_s24  ;;  %v5448_v18 = vld [vmem:[%s8119_s0 + $0x140] sm:$0xff]  ;;  %v5455_v13 = vld [vmem:[%s8119_s0 + $0x138] sm:$0xff] }
 0x132   :  { %973 = vrot.lane.b32.xlu0 %v5437_v35, %s3775_s24  ;;  %8733 = vst [vmem:[#allocation229_spill] sm:$0xff] %v5448_v18  ;;  %8734 = vst [vmem:[#allocation230_spill] sm:$0xff] %v5455_v13 }
 0x133   :  { %v5441_v43 = vpop.permute.xlu1 %795 }
 0x134   :  { %8731 = vst [vmem:[#allocation227_spill] sm:$0xff] %v5441_v43  ;;  %v5443_v0 = vpop.permute.xlu0 %793 }
 0x135   :  { %8732 = vst [vmem:[#allocation228_spill] sm:$0xff] %v5443_v0  ;;  %979 = vrot.lane.b32.xlu1 %v5448_v18, %s3775_s24  ;;  %v5466_v0 = vld [vmem:[%s8119_s0 + $0x158] sm:$0xff]  ;;  %v5473_v18 = vld [vmem:[%s8119_s0 + $0x150] sm:$0xff] }
 0x136   :  { %977 = vrot.lane.b32.xlu0 %v5455_v13, %s3775_s24  ;;  %8737 = vst [vmem:[#allocation233_spill] sm:$0xff] %v5466_v0  ;;  %8738 = vst [vmem:[#allocation234_spill] sm:$0xff] %v5473_v18 }
 0x137   :  { %v5459_v35 = vpop.permute.xlu1 %799 }
 0x138   :  { %8735 = vst [vmem:[#allocation231_spill] sm:$0xff] %v5459_v35  ;;  %v5461_v43 = vpop.permute.xlu0 %797 }
 0x139   :  { %8736 = vst [vmem:[#allocation232_spill] sm:$0xff] %v5461_v43  ;;  %983 = vrot.lane.b32.xlu1 %v5466_v0, %s3775_s24  ;;  %v5484_v43 = vld [vmem:[%s8119_s0 + $0x170] sm:$0xff]  ;;  %v5491_v0 = vld [vmem:[%s8119_s0 + $0x168] sm:$0xff] }
 0x13a   :  { %981 = vrot.lane.b32.xlu0 %v5473_v18, %s3775_s24  ;;  %8741 = vst [vmem:[#allocation237_spill] sm:$0xff] %v5484_v43  ;;  %8742 = vst [vmem:[#allocation238_spill] sm:$0xff] %v5491_v0  ;;  %v5505_v18 = vld [vmem:[%s8119_s0 + $0x180] sm:$0xff] }
 0x13b   :  { %v5477_v13 = vpop.permute.xlu1 %803 }
 0x13c   :  { %8739 = vst [vmem:[#allocation235_spill] sm:$0xff] %v5477_v13  ;;  %v5479_v35 = vpop.permute.xlu0 %801  ;;  %v5498_v13 = vld [vmem:[%s8119_s0 + $0x188] sm:$0xff] }
 0x13d   :  { %8740 = vst [vmem:[#allocation236_spill] sm:$0xff] %v5479_v35  ;;  %987 = vrot.lane.b32.xlu1 %v5484_v43, %s3775_s24 }
 0x13e   :  { %985 = vrot.lane.b32.xlu0 %v5491_v0, %s3775_s24 }
 0x13f   :  { %v5500_v35 = vpop.permute.xlu1 %807 }
 0x140   :  { %8743 = vst [vmem:[#allocation239_spill] sm:$0xff] %v5500_v35  ;;  %v5507_v43 = vpop.permute.xlu0 %805  ;;  %v3678_v35 = vld [vmem:[%s8119_s0 + $0x1d0] sm:$0xff] }
 0x141   :  { %8744 = vst [vmem:[#allocation240_spill] sm:$0xff] %v5507_v43  ;;  %991 = vrot.lane.b32.xlu1 %v5498_v13, %s3775_s24  ;;  %v3679_v43 = vld [vmem:[%s8119_s0 + $0x1c8] sm:$0xff] }
 0x142   :  { %989 = vrot.lane.b32.xlu0 %v5505_v18, %s3775_s24 }
 0x143   :  { %v5513_v0 = vpop.permute.xlu1 %811 }
 0x144   :  { %8745 = vst [vmem:[#allocation241_spill] sm:$0xff] %v5513_v0  ;;  %v5515_v29 = vpop.permute.xlu0 %809  ;;  %v5532_v0 = vld [vmem:[%s8119_s0 + $0x1e8] sm:$0xff] }
 0x145   :  { %8746 = vst [vmem:[#allocation242_spill] sm:$0xff] %v5515_v29  ;;  %995 = vrot.lane.b32.xlu1 %v3678_v35, %s3775_s24  ;;  %8749 = vst [vmem:[#allocation245_spill] sm:$0xff] %v5532_v0  ;;  %v5539_v35 = vld [vmem:[%s8119_s0 + $0x1e0] sm:$0xff] }
 0x146   :  { %993 = vrot.lane.b32.xlu0 %v3679_v43, %s3775_s24 }
 0x147   :  { %v5525_v16 = vpop.permute.xlu1 %815 }
 0x148   :  { %8747 = vst [vmem:[#allocation243_spill] sm:$0xff] %v5525_v16  ;;  %v5527_v48 = vpop.permute.xlu0 %813 }
 0x149   :  { %8748 = vst [vmem:[#allocation244_spill] sm:$0xff] %v5527_v48  ;;  %999 = vrot.lane.b32.xlu1 %v5532_v0, %s3775_s24 }
 0x14a   :  { %997 = vrot.lane.b32.xlu0 %v5539_v35, %s3775_s24 }
 0x14b   :  { %v5543_v43 = vpop.permute.xlu1 %819 }
 0x14c   :  { %8750 = vst [vmem:[#allocation246_spill] sm:$0xff] %v5543_v43  ;;  %v5545_v16 = vpop.permute.xlu0 %817 }
 0x14d   :  { %8751 = vst [vmem:[#allocation247_spill] sm:$0xff] %v5545_v16  ;;  %1003 = vrot.lane.b32.xlu1 %v8594_v42, %s3775_s24  ;;  %v8809_v16 = vld [vmem:[#allocation20_spill] sm:$0xff] }
 0x14e   :  { %1001 = vrot.lane.b32.xlu0 %v8598_v61, %s3775_s24 }
 0x14f   :  { %v5551_v48 = vpop.permute.xlu1 %823 }
 0x150   :  { %8752 = vst [vmem:[#allocation248_spill] sm:$0xff] %v5551_v48  ;;  %v5553_v29 = vpop.permute.xlu0 %821  ;;  %v8800_v48 = vld [vmem:[#allocation15_spill] sm:$0xff] }
 0x151   :  { %8753 = vst [vmem:[#allocation249_spill] sm:$0xff] %v5553_v29  ;;  %1007 = vrot.lane.b32.xlu1 %v8601_v6, %s3775_s24 }
 0x152   :  { %1005 = vrot.lane.b32.xlu0 %v8605_v8, %s3775_s24 }
 0x153   :  { %v5559_v0 = vpop.permute.xlu1 %827 }
 0x154   :  { %8754 = vst [vmem:[#allocation250_spill] sm:$0xff] %v5559_v0  ;;  %v5561_v43 = vpop.permute.xlu0 %825 }
 0x155   :  { %8755 = vst [vmem:[#allocation251_spill] sm:$0xff] %v5561_v43  ;;  %1011 = vrot.lane.b32.xlu1 %v8608_v44, %s3775_s24 }
 0x156   :  { %1009 = vrot.lane.b32.xlu0 %v8612_v49, %s3775_s24 }
 0x157   :  { %v5567_v42 = vpop.permute.xlu1 %831 }
 0x158   :  { %8756 = vst [vmem:[#allocation252_spill] sm:$0xff] %v5567_v42  ;;  %v5569_v61 = vpop.permute.xlu0 %829  ;;  %v8796_v42 = vld [vmem:[#allocation13_spill] sm:$0xff] }
 0x159   :  { %8757 = vst [vmem:[#allocation253_spill] sm:$0xff] %v5569_v61  ;;  %1015 = vrot.lane.b32.xlu1 %v8615_v37, %s3775_s24  ;;  %v8797_v61 = vld [vmem:[#allocation14_spill] sm:$0xff] }
 0x15a   :  { %1013 = vrot.lane.b32.xlu0 %v8619_v19, %s3775_s24 }
 0x15b   :  { %v5575_v6 = vpop.permute.xlu1 %835 }
 0x15c   :  { %8758 = vst [vmem:[#allocation254_spill] sm:$0xff] %v5575_v6  ;;  %v5577_v8 = vpop.permute.xlu0 %833 }
 0x15d   :  { %8759 = vst [vmem:[#allocation255_spill] sm:$0xff] %v5577_v8  ;;  %1019 = vrot.lane.b32.xlu1 %v8622_v60, %s3775_s24 }
 0x15e   :  { %1017 = vrot.lane.b32.xlu0 %v8626_v51, %s3775_s24 }
 0x15f   :  { %v5583_v44 = vpop.permute.xlu1 %839 }
 0x160   :  { %8760 = vst [vmem:[#allocation256_spill] sm:$0xff] %v5583_v44  ;;  %v5585_v49 = vpop.permute.xlu0 %837  ;;  %v8792_v44 = vld [vmem:[#allocation11_spill] sm:$0xff] }
 0x161   :  { %8761 = vst [vmem:[#allocation257_spill] sm:$0xff] %v5585_v49  ;;  %1023 = vrot.lane.b32.xlu1 %v8629_v50, %s3775_s24  ;;  %v8793_v49 = vld [vmem:[#allocation12_spill] sm:$0xff] }
 0x162   :  { %1021 = vrot.lane.b32.xlu0 %v8633_v41, %s3775_s24 }
 0x163   :  { %v5591_v37 = vpop.permute.xlu1 %843 }
 0x164   :  { %8762 = vst [vmem:[#allocation258_spill] sm:$0xff] %v5591_v37  ;;  %v5593_v19 = vpop.permute.xlu0 %841  ;;  %v8788_v37 = vld [vmem:[#allocation9_spill] sm:$0xff] }
 0x165   :  { %8763 = vst [vmem:[#allocation259_spill] sm:$0xff] %v5593_v19  ;;  %1027 = vrot.lane.b32.xlu1 %v8636_v24, %s3775_s24 }
 0x166   :  { %1025 = vrot.lane.b32.xlu0 %v8640_v45, %s3775_s24 }
 0x167   :  { %v5599_v60 = vpop.permute.xlu1 %847 }
 0x168   :  { %8764 = vst [vmem:[#allocation260_spill] sm:$0xff] %v5599_v60  ;;  %v5601_v51 = vpop.permute.xlu0 %845 }
 0x169   :  { %8765 = vst [vmem:[#allocation261_spill] sm:$0xff] %v5601_v51  ;;  %1031 = vrot.lane.b32.xlu1 %v8643_v56, %s3775_s24 }
 0x16a   :  { %1029 = vrot.lane.b32.xlu0 %v8647_v36, %s3775_s24 }
 0x16b   :  { %v5607_v50 = vpop.permute.xlu1 %851 }
 0x16c   :  { %8766 = vst [vmem:[#allocation262_spill] sm:$0xff] %v5607_v50  ;;  %v5609_v41 = vpop.permute.xlu0 %849  ;;  %v8784_v50 = vld [vmem:[#allocation7_spill] sm:$0xff] }
 0x16d   :  { %8767 = vst [vmem:[#allocation263_spill] sm:$0xff] %v5609_v41  ;;  %1035 = vrot.lane.b32.xlu1 %v8650_v59, %s3775_s24  ;;  %v8785_v41 = vld [vmem:[#allocation8_spill] sm:$0xff] }
 0x16e   :  { %1033 = vrot.lane.b32.xlu0 %v8654_v9, %s3775_s24 }
 0x16f   :  { %v5615_v24 = vpop.permute.xlu1 %855 }
 0x170   :  { %8768 = vst [vmem:[#allocation264_spill] sm:$0xff] %v5615_v24  ;;  %v5617_v45 = vpop.permute.xlu0 %853 }
 0x171   :  { %8769 = vst [vmem:[#allocation265_spill] sm:$0xff] %v5617_v45  ;;  %1039 = vrot.lane.b32.xlu1 %v8657_v33, %s3775_s24 }
 0x172   :  { %1037 = vrot.lane.b32.xlu0 %v8661_v32, %s3775_s24 }
 0x173   :  { %v5623_v56 = vpop.permute.xlu1 %859 }
 0x174   :  { %8770 = vst [vmem:[#allocation266_spill] sm:$0xff] %v5623_v56  ;;  %v5625_v36 = vpop.permute.xlu0 %857  ;;  %v8780_v56 = vld [vmem:[#allocation6_spill] sm:$0xff] }
 0x175   :  { %8771 = vst [vmem:[#allocation267_spill] sm:$0xff] %v5625_v36  ;;  %1043 = vrot.lane.b32.xlu1 %v8664_v40, %s3775_s24  ;;  %v5650_v40 = vld [vmem:[%s8119_s0 + $0x338] sm:$0xff]  ;;  %v8781_v36 = vld [vmem:[#allocation5_spill] sm:$0xff] }
 0x176   :  { %1041 = vrot.lane.b32.xlu0 %v8668_v3, %s3775_s24 }
 0x177   :  { %v5631_v59 = vpop.permute.xlu1 %931 }
 0x178   :  { %8772 = vst [vmem:[#allocation268_spill] sm:$0xff] %v5631_v59  ;;  %v5633_v9 = vpop.permute.xlu0 %929  ;;  %v8865_v59 = vld [vmem:[#allocation69_spill] sm:$0xff] }
 0x179   :  { %8773 = vst [vmem:[#allocation269_spill] sm:$0xff] %v5633_v9  ;;  %1047 = vrot.lane.b32.xlu1 %v8671_v15, %s3775_s24  ;;  %v5657_v15 = vld [vmem:[%s8119_s0 + $0x330] sm:$0xff]  ;;  %v8869_v9 = vld [vmem:[#allocation74_spill] sm:$0xff] }
 0x17a   :  { %1045 = vrot.lane.b32.xlu0 %v8675_v7, %s3775_s24 }
 0x17b   :  { %v5639_v33 = vpop.permute.xlu1 %935 }
 0x17c   :  { %8774 = vst [vmem:[#allocation270_spill] sm:$0xff] %v5639_v33  ;;  %v5641_v32 = vpop.permute.xlu0 %933  ;;  %v8836_v33 = vld [vmem:[#allocation35_spill] sm:$0xff] }
 0x17d   :  { %8775 = vst [vmem:[#allocation271_spill] sm:$0xff] %v5641_v32  ;;  %1051 = vrot.lane.b32.xlu1 %v4650_v17, %s3775_s24 }
 0x17e   :  { %1049 = vrot.lane.b32.xlu0 %v4662_v4, %s3775_s24 }
 0x17f   :  { %v5652_v3 = vpop.permute.xlu1 %939 }
 0x180   :  { %8776 = vst [vmem:[#allocation272_spill] sm:$0xff] %v5652_v3  ;;  %v5659_v7 = vpop.permute.xlu0 %937  ;;  %v8821_v3 = vld [vmem:[#allocation26_spill] sm:$0xff] }
 0x181   :  { %8777 = vst [vmem:[#allocation273_spill] sm:$0xff] %v5659_v7  ;;  %1055 = vrot.lane.b32.xlu1 %v5650_v40, %s3775_s24 }
 0x182   :  { %1053 = vrot.lane.b32.xlu0 %v5657_v15, %s3775_s24 }
 0x183   :  { %v5665_v4 = vpop.permute.xlu1 %943 }
 0x184   :  { %8778 = vst [vmem:[#allocation274_spill] sm:$0xff] %v5665_v4  ;;  %v5667_v17 = vpop.permute.xlu0 %941  ;;  %v8817_v4 = vld [vmem:[#allocation24_spill] sm:$0xff] }
 0x185   :  { %8779 = vst [vmem:[#allocation275_spill] sm:$0xff] %v5667_v17  ;;  %1135 = vrot.lane.b32.xlu1 %v8780_v56, %s3776_s23  ;;  %v8789_v56 = vld [vmem:[#allocation10_spill] sm:$0xff] }
 0x186   :  { %1133 = vrot.lane.b32.xlu0 %v8781_v36, %s3776_s23 }
 0x187   :  { %v5673_v24 = vpop.permute.xlu1 %947 }
 0x188   :  { %8782 = vst [vmem:[#allocation6_spill] sm:$0xff] %v5673_v24  ;;  %v5675_v45 = vpop.permute.xlu0 %945  ;;  %v8813_v24 = vld [vmem:[#allocation22_spill] sm:$0xff] }
 0x189   :  { %8783 = vst [vmem:[#allocation5_spill] sm:$0xff] %v5675_v45  ;;  %1139 = vrot.lane.b32.xlu1 %v8784_v50, %s3776_s23 }
 0x18a   :  { %1137 = vrot.lane.b32.xlu0 %v8785_v41, %s3776_s23 }
 0x18b   :  { %v5681_v60 = vpop.permute.xlu1 %951 }
 0x18c   :  { %8786 = vst [vmem:[#allocation7_spill] sm:$0xff] %v5681_v60  ;;  %v5683_v51 = vpop.permute.xlu0 %949 }
 0x18d   :  { %8787 = vst [vmem:[#allocation8_spill] sm:$0xff] %v5683_v51  ;;  %1143 = vrot.lane.b32.xlu1 %v8788_v37, %s3776_s23 }
 0x18e   :  { %1141 = vrot.lane.b32.xlu0 %v8789_v56, %s3776_s23 }
 0x18f   :  { %v5689_v36 = vpop.permute.xlu1 %955 }
 0x190   :  { %8790 = vst [vmem:[#allocation9_spill] sm:$0xff] %v5689_v36  ;;  %v5691_v19 = vpop.permute.xlu0 %953  ;;  %v8801_v36 = vld [vmem:[#allocation16_spill] sm:$0xff] }
 0x191   :  { %8791 = vst [vmem:[#allocation10_spill] sm:$0xff] %v5691_v19  ;;  %1147 = vrot.lane.b32.xlu1 %v8792_v44, %s3776_s23  ;;  %v8805_v19 = vld [vmem:[#allocation18_spill] sm:$0xff] }
 0x192   :  { %1145 = vrot.lane.b32.xlu0 %v8793_v49, %s3776_s23 }
 0x193   :  { %v5697_v6 = vpop.permute.xlu1 %959 }
 0x194   :  { %8794 = vst [vmem:[#allocation11_spill] sm:$0xff] %v5697_v6  ;;  %v5699_v8 = vpop.permute.xlu0 %957 }
 0x195   :  { %8795 = vst [vmem:[#allocation12_spill] sm:$0xff] %v5699_v8  ;;  %1151 = vrot.lane.b32.xlu1 %v8796_v42, %s3776_s23  ;;  %v8804_v8 = vld [vmem:[#allocation17_spill] sm:$0xff] }
 0x196   :  { %1149 = vrot.lane.b32.xlu0 %v8797_v61, %s3776_s23 }
 0x197   :  { %v5705_v0 = vpop.permute.xlu1 %963 }
 0x198   :  { %8798 = vst [vmem:[#allocation13_spill] sm:$0xff] %v5705_v0  ;;  %v5707_v43 = vpop.permute.xlu0 %961 }
 0x199   :  { %8799 = vst [vmem:[#allocation14_spill] sm:$0xff] %v5707_v43  ;;  %1155 = vrot.lane.b32.xlu1 %v8800_v48, %s3776_s23  ;;  %v8808_v43 = vld [vmem:[#allocation19_spill] sm:$0xff] }
 0x19a   :  { %1153 = vrot.lane.b32.xlu0 %v8801_v36, %s3776_s23 }
 0x19b   :  { %v5713_v29 = vpop.permute.xlu1 %967 }
 0x19c   :  { %8802 = vst [vmem:[#allocation15_spill] sm:$0xff] %v5713_v29  ;;  %v5715_v6 = vpop.permute.xlu0 %965 }
 0x19d   :  { %8803 = vst [vmem:[#allocation16_spill] sm:$0xff] %v5715_v6  ;;  %1159 = vrot.lane.b32.xlu1 %v8804_v8, %s3776_s23  ;;  %v8812_v6 = vld [vmem:[#allocation21_spill] sm:$0xff] }
 0x19e   :  { %1157 = vrot.lane.b32.xlu0 %v8805_v19, %s3776_s23  ;;  %v8873_v19 = vld [vmem:[#allocation79_spill] sm:$0xff] }
 0x19f   :  { %v5721_v60 = vpop.permute.xlu1 %971 }
 0x1a0   :  { %8806 = vst [vmem:[#allocation276_spill] sm:$0xff] %v5721_v60  ;;  %v5723_v0 = vpop.permute.xlu0 %969 }
 0x1a1   :  { %8807 = vst [vmem:[#allocation277_spill] sm:$0xff] %v5723_v0  ;;  %1163 = vrot.lane.b32.xlu1 %v8808_v43, %s3776_s23  ;;  %v8816_v0 = vld [vmem:[#allocation23_spill] sm:$0xff]  ;;  %v8861_v43 = vld [vmem:[#allocation64_spill] sm:$0xff] }
 0x1a2   :  { %1161 = vrot.lane.b32.xlu0 %v8809_v16, %s3776_s23 }
 0x1a3   :  { %v5729_v51 = vpop.permute.xlu1 %975 }
 0x1a4   :  { %8810 = vst [vmem:[#allocation278_spill] sm:$0xff] %v5729_v51  ;;  %v5731_v29 = vpop.permute.xlu0 %973 }
 0x1a5   :  { %8811 = vst [vmem:[#allocation279_spill] sm:$0xff] %v5731_v29  ;;  %1167 = vrot.lane.b32.xlu1 %v8812_v6, %s3776_s23  ;;  %v8820_v29 = vld [vmem:[#allocation25_spill] sm:$0xff] }
 0x1a6   :  { %1165 = vrot.lane.b32.xlu0 %v8813_v24, %s3776_s23  ;;  %v8837_v24 = vld [vmem:[#allocation36_spill] sm:$0xff] }
 0x1a7   :  { %v5737_v45 = vpop.permute.xlu1 %979 }
 0x1a8   :  { %8814 = vst [vmem:[#allocation280_spill] sm:$0xff] %v5737_v45  ;;  %v5739_v60 = vpop.permute.xlu0 %977 }
 0x1a9   :  { %8815 = vst [vmem:[#allocation281_spill] sm:$0xff] %v5739_v60  ;;  %1171 = vrot.lane.b32.xlu1 %v8816_v0, %s3776_s23  ;;  %v8824_v60 = vld [vmem:[#allocation27_spill] sm:$0xff]  ;;  %v8825_v0 = vld [vmem:[#allocation28_spill] sm:$0xff] }
 0x1aa   :  { %1169 = vrot.lane.b32.xlu0 %v8817_v4, %s3776_s23 }
 0x1ab   :  { %v5745_v17 = vpop.permute.xlu1 %983 }
 0x1ac   :  { %8818 = vst [vmem:[#allocation282_spill] sm:$0xff] %v5745_v17  ;;  %v5747_v51 = vpop.permute.xlu0 %981 }
 0x1ad   :  { %8819 = vst [vmem:[#allocation283_spill] sm:$0xff] %v5747_v51  ;;  %1175 = vrot.lane.b32.xlu1 %v8820_v29, %s3776_s23  ;;  %v8828_v51 = vld [vmem:[#allocation29_spill] sm:$0xff]  ;;  %v8829_v29 = vld [vmem:[#allocation30_spill] sm:$0xff] }
 0x1ae   :  { %1173 = vrot.lane.b32.xlu0 %v8821_v3, %s3776_s23 }
 0x1af   :  { %v5753_v7 = vpop.permute.xlu1 %987 }
 0x1b0   :  { %8822 = vst [vmem:[#allocation284_spill] sm:$0xff] %v5753_v7  ;;  %v5755_v45 = vpop.permute.xlu0 %985  ;;  %v5774_v7 = vld [vmem:[%s8119_s0 + $0x190] sm:$0x3] }
 0x1b1   :  { %8823 = vst [vmem:[#allocation285_spill] sm:$0xff] %v5755_v45  ;;  %1179 = vrot.lane.b32.xlu1 %v8824_v60, %s3776_s23  ;;  %v8832_v60 = vld [vmem:[#allocation31_spill] sm:$0xff] }
 0x1b2   :  { %1177 = vrot.lane.b32.xlu0 %v8825_v0, %s3776_s23 }
 0x1b3   :  { %v5761_v4 = vpop.permute.xlu1 %991 }
 0x1b4   :  { %8826 = vst [vmem:[#allocation286_spill] sm:$0xff] %v5761_v4  ;;  %v5763_v17 = vpop.permute.xlu0 %989  ;;  %v1124_v4 = vrot.slane %v5498_v13, 1 }
 0x1b5   :  { %8827 = vst [vmem:[#allocation287_spill] sm:$0xff] %v5763_v17  ;;  %1183 = vrot.lane.b32.xlu1 %v8828_v51, %s3776_s23  ;;  %v8833_v17 = vld [vmem:[#allocation32_spill] sm:$0xff]  ;;  %v1126_v51 = vrot.slane %v5774_v7, 1 }
 0x1b6   :  { %1181 = vrot.lane.b32.xlu0 %v8829_v29, %s3776_s23  ;;  %v1123_v29 = vrot.slane %v5505_v18, 1 }
 0x1b7   :  { %v5769_v3 = vpop.permute.xlu1 %995 }
 0x1b8   :  { %8830 = vst [vmem:[#allocation288_spill] sm:$0xff] %v5769_v3  ;;  %v5776_v45 = vpop.permute.xlu0 %993 }
 0x1b9   :  { %8831 = vst [vmem:[#allocation289_spill] sm:$0xff] %v5776_v45  ;;  %1187 = vrot.lane.b32.xlu1 %v8832_v60, %s3776_s23  ;;  %v5794_v60 = vsel %vm219_vm0, %v1124_v4, %v1126_v51  ;;  %v8844_v51 = vld [vmem:[#allocation43_spill] sm:$0xff] }
 0x1ba   :  { %1185 = vrot.lane.b32.xlu0 %v8833_v17, %s3776_s23  ;;  %8838 = vst [vmem:[#allocation292_spill] sm:$0xff] %v5794_v60  ;;  %v5799_v17 = vsel %vm219_vm0, %v1123_v29, %v1124_v4 }
 0x1bb   :  { %v5785_v0 = vpop.permute.xlu1 %999  ;;  %8840 = vst [vmem:[#allocation294_spill] sm:$0xff] %v5799_v17 }
 0x1bc   :  { %8834 = vst [vmem:[#allocation290_spill] sm:$0xff] %v5785_v0  ;;  %v5787_v6 = vpop.permute.xlu0 %997 }
 0x1bd   :  { %8835 = vst [vmem:[#allocation291_spill] sm:$0xff] %v5787_v6  ;;  %1191 = vrot.lane.b32.xlu1 %v8836_v33, %s3776_s23 }
 0x1be   :  { %1189 = vrot.lane.b32.xlu0 %v8837_v24, %s3776_s23  ;;  %v8845_v24 = vld [vmem:[#allocation44_spill] sm:$0xff] }
 0x1bf   :  { %v5796_v32 = vpop.permute.xlu1 %1003 }
 0x1c0   :  { %8839 = vst [vmem:[#allocation293_spill] sm:$0xff] %v5796_v32  ;;  %v5801_v3 = vpop.permute.xlu0 %1001  ;;  %v8848_v32 = vld [vmem:[#allocation48_spill] sm:$0xff] }
 0x1c1   :  { %8841 = vst [vmem:[#allocation295_spill] sm:$0xff] %v5801_v3  ;;  %1195 = vrot.lane.b32.xlu1 %v5794_v60, %s3776_s23  ;;  %v8849_v60 = vld [vmem:[#allocation49_spill] sm:$0xff]  ;;  %v8857_v3 = vld [vmem:[#allocation59_spill] sm:$0xff] }
 0x1c2   :  { %1193 = vrot.lane.b32.xlu0 %v5799_v17, %s3776_s23 }
 0x1c3   :  { %v5807_v33 = vpop.permute.xlu1 %1007 }
 0x1c4   :  { %8842 = vst [vmem:[#allocation296_spill] sm:$0xff] %v5807_v33  ;;  %v5809_v0 = vpop.permute.xlu0 %1005 }
 0x1c5   :  { %8843 = vst [vmem:[#allocation297_spill] sm:$0xff] %v5809_v0  ;;  %1199 = vrot.lane.b32.xlu1 %v8844_v51, %s3776_s23  ;;  %v8852_v0 = vld [vmem:[#allocation53_spill] sm:$0xff]  ;;  %v8853_v51 = vld [vmem:[#allocation54_spill] sm:$0xff] }
 0x1c6   :  { %1197 = vrot.lane.b32.xlu0 %v8845_v24, %s3776_s23 }
 0x1c7   :  { %v5815_v29 = vpop.permute.xlu1 %1011 }
 0x1c8   :  { %8846 = vst [vmem:[#allocation43_spill] sm:$0xff] %v5815_v29  ;;  %v5817_v4 = vpop.permute.xlu0 %1009 }
 0x1c9   :  { %8847 = vst [vmem:[#allocation44_spill] sm:$0xff] %v5817_v4  ;;  %1203 = vrot.lane.b32.xlu1 %v8848_v32, %s3776_s23  ;;  %v8856_v4 = vld [vmem:[#allocation58_spill] sm:$0xff] }
 0x1ca   :  { %1201 = vrot.lane.b32.xlu0 %v8849_v60, %s3776_s23 }
 0x1cb   :  { %v5823_v17 = vpop.permute.xlu1 %1015 }
 0x1cc   :  { %8850 = vst [vmem:[#allocation48_spill] sm:$0xff] %v5823_v17  ;;  %v5825_v33 = vpop.permute.xlu0 %1013 }
 0x1cd   :  { %8851 = vst [vmem:[#allocation49_spill] sm:$0xff] %v5825_v33  ;;  %1207 = vrot.lane.b32.xlu1 %v8852_v0, %s3776_s23  ;;  %v8860_v33 = vld [vmem:[#allocation63_spill] sm:$0xff] }
 0x1ce   :  { %1205 = vrot.lane.b32.xlu0 %v8853_v51, %s3776_s23 }
 0x1cf   :  { %v5831_v24 = vpop.permute.xlu1 %1019 }
 0x1d0   :  { %8854 = vst [vmem:[#allocation53_spill] sm:$0xff] %v5831_v24  ;;  %v5833_v29 = vpop.permute.xlu0 %1017 }
 0x1d1   :  { %8855 = vst [vmem:[#allocation54_spill] sm:$0xff] %v5833_v29  ;;  %1211 = vrot.lane.b32.xlu1 %v8856_v4, %s3776_s23  ;;  %v8864_v29 = vld [vmem:[#allocation68_spill] sm:$0xff] }
 0x1d2   :  { %1209 = vrot.lane.b32.xlu0 %v8857_v3, %s3776_s23 }
 0x1d3   :  { %v5839_v6 = vpop.permute.xlu1 %1023 }
 0x1d4   :  { %8858 = vst [vmem:[#allocation58_spill] sm:$0xff] %v5839_v6  ;;  %v5841_v17 = vpop.permute.xlu0 %1021 }
 0x1d5   :  { %8859 = vst [vmem:[#allocation59_spill] sm:$0xff] %v5841_v17  ;;  %1215 = vrot.lane.b32.xlu1 %v8860_v33, %s3776_s23  ;;  %v8868_v17 = vld [vmem:[#allocation73_spill] sm:$0xff] }
 0x1d6   :  { %1213 = vrot.lane.b32.xlu0 %v8861_v43, %s3776_s23 }
 0x1d7   :  { %v5847_v45 = vpop.permute.xlu1 %1027 }
 0x1d8   :  { %8862 = vst [vmem:[#allocation63_spill] sm:$0xff] %v5847_v45  ;;  %v5849_v24 = vpop.permute.xlu0 %1025 }
 0x1d9   :  { %8863 = vst [vmem:[#allocation64_spill] sm:$0xff] %v5849_v24  ;;  %1219 = vrot.lane.b32.xlu1 %v8864_v29, %s3776_s23  ;;  %v8872_v24 = vld [vmem:[#allocation78_spill] sm:$0xff] }
 0x1da   :  { %1217 = vrot.lane.b32.xlu0 %v8865_v59, %s3776_s23 }
 0x1db   :  { %v5855_v16 = vpop.permute.xlu1 %1031 }
 0x1dc   :  { %8866 = vst [vmem:[#allocation69_spill] sm:$0xff] %v5855_v16  ;;  %v5857_v6 = vpop.permute.xlu0 %1029 }
 0x1dd   :  { %8867 = vst [vmem:[#allocation298_spill] sm:$0xff] %v5857_v6  ;;  %1223 = vrot.lane.b32.xlu1 %v8868_v17, %s3776_s23  ;;  %v8876_v6 = vld [vmem:[#allocation83_spill] sm:$0xff]  ;;  %v8877_v17 = vld [vmem:[#allocation84_spill] sm:$0xff] }
 0x1de   :  { %1221 = vrot.lane.b32.xlu0 %v8869_v9, %s3776_s23 }
 0x1df   :  { %v5863_v8 = vpop.permute.xlu1 %1035 }
 0x1e0   :  { %8870 = vst [vmem:[#allocation299_spill] sm:$0xff] %v5863_v8  ;;  %v5865_v45 = vpop.permute.xlu0 %1033 }
 0x1e1   :  { %8871 = vst [vmem:[#allocation300_spill] sm:$0xff] %v5865_v45  ;;  %1227 = vrot.lane.b32.xlu1 %v8872_v24, %s3776_s23  ;;  %v8880_v45 = vld [vmem:[#allocation88_spill] sm:$0xff]  ;;  %v8881_v24 = vld [vmem:[#allocation89_spill] sm:$0xff] }
 0x1e2   :  { %1225 = vrot.lane.b32.xlu0 %v8873_v19, %s3776_s23 }
 0x1e3   :  { %v5871_v29 = vpop.permute.xlu1 %1039 }
 0x1e4   :  { %8874 = vst [vmem:[#allocation301_spill] sm:$0xff] %v5871_v29  ;;  %v5873_v16 = vpop.permute.xlu0 %1037 }
 0x1e5   :  { %8875 = vst [vmem:[#allocation302_spill] sm:$0xff] %v5873_v16  ;;  %1231 = vrot.lane.b32.xlu1 %v8876_v6, %s3776_s23  ;;  %v8884_v16 = vld [vmem:[#allocation93_spill] sm:$0xff]  ;;  %v8885_v6 = vld [vmem:[#allocation94_spill] sm:$0xff] }
 0x1e6   :  { %1229 = vrot.lane.b32.xlu0 %v8877_v17, %s3776_s23 }
 0x1e7   :  { %v5879_v9 = vpop.permute.xlu1 %1043 }
 0x1e8   :  { %8878 = vst [vmem:[#allocation303_spill] sm:$0xff] %v5879_v9  ;;  %v5881_v8 = vpop.permute.xlu0 %1041 }
 0x1e9   :  { %8879 = vst [vmem:[#allocation304_spill] sm:$0xff] %v5881_v8  ;;  %1235 = vrot.lane.b32.xlu1 %v8880_v45, %s3776_s23  ;;  %v8888_v8 = vld [vmem:[#allocation98_spill] sm:$0xff]  ;;  %v8889_v45 = vld [vmem:[#allocation99_spill] sm:$0xff] }
 0x1ea   :  { %1233 = vrot.lane.b32.xlu0 %v8881_v24, %s3776_s23 }
 0x1eb   :  { %v5887_v19 = vpop.permute.xlu1 %1047 }
 0x1ec   :  { %8882 = vst [vmem:[#allocation305_spill] sm:$0xff] %v5887_v19  ;;  %v5889_v29 = vpop.permute.xlu0 %1045 }
 0x1ed   :  { %8883 = vst [vmem:[#allocation306_spill] sm:$0xff] %v5889_v29  ;;  %1239 = vrot.lane.b32.xlu1 %v8884_v16, %s3776_s23  ;;  %v8892_v29 = vld [vmem:[#allocation103_spill] sm:$0xff]  ;;  %v8893_v16 = vld [vmem:[#allocation105_spill] sm:$0xff] }
 0x1ee   :  { %1237 = vrot.lane.b32.xlu0 %v8885_v6, %s3776_s23 }
 0x1ef   :  { %v5895_v17 = vpop.permute.xlu1 %1051 }
 0x1f0   :  { %8886 = vst [vmem:[#allocation307_spill] sm:$0xff] %v5895_v17  ;;  %v5897_v9 = vpop.permute.xlu0 %1049  ;;  %v5916_v17 = vld [vmem:[%s8119_s0 + $0x340] sm:$0x3] }
 0x1f1   :  { %8887 = vst [vmem:[#allocation308_spill] sm:$0xff] %v5897_v9  ;;  %1243 = vrot.lane.b32.xlu1 %v8888_v8, %s3776_s23 }
 0x1f2   :  { %1241 = vrot.lane.b32.xlu0 %v8889_v45, %s3776_s23 }
 0x1f3   :  { %v5903_v24 = vpop.permute.xlu1 %1055 }
 0x1f4   :  { %8890 = vst [vmem:[#allocation309_spill] sm:$0xff] %v5903_v24  ;;  %v5905_v19 = vpop.permute.xlu0 %1053  ;;  %v1129_v24 = vrot.slane %v5650_v40, 1 }
 0x1f5   :  { %8891 = vst [vmem:[#allocation310_spill] sm:$0xff] %v5905_v19  ;;  %1247 = vrot.lane.b32.xlu1 %v8892_v29, %s3776_s23  ;;  %v1131_v19 = vrot.slane %v5916_v17, 1  ;;  %v1128_v29 = vrot.slane %v5657_v15, 1 }
 0x1f6   :  { %1245 = vrot.lane.b32.xlu0 %v8893_v16, %s3776_s23 }
 0x1f7   :  { %v5911_v6 = vpop.permute.xlu1 %1135 }
 0x1f8   :  { %8894 = vst [vmem:[#allocation311_spill] sm:$0xff] %v5911_v6  ;;  %v5918_v9 = vpop.permute.xlu0 %1133 }
 0x1f9   :  { %8895 = vst [vmem:[#allocation312_spill] sm:$0xff] %v5918_v9  ;;  %1251 = vrot.lane.b32.xlu1 %v4669_v52, %s3776_s23  ;;  %v5936_v52 = vsel %vm219_vm0, %v1129_v24, %v1131_v19 }
 0x1fa   :  { %1249 = vrot.lane.b32.xlu0 %v4676_v27, %s3776_s23  ;;  %8898 = vst [vmem:[#allocation315_spill] sm:$0xff] %v5936_v52  ;;  %v5941_v27 = vsel %vm219_vm0, %v1128_v29, %v1129_v24 }
 0x1fb   :  { %v5927_v16 = vpop.permute.xlu1 %1139  ;;  %8900 = vst [vmem:[#allocation317_spill] sm:$0xff] %v5941_v27 }
 0x1fc   :  { %8896 = vst [vmem:[#allocation313_spill] sm:$0xff] %v5927_v16  ;;  %v5929_v8 = vpop.permute.xlu0 %1137 }
 0x1fd   :  { %8897 = vst [vmem:[#allocation314_spill] sm:$0xff] %v5929_v8  ;;  %1255 = vrot.lane.b32.xlu1 %v4686_v28, %s3776_s23  ;;  %v8973_v8 = vld [vmem:[#allocation71_spill] sm:$0xff] }
 0x1fe   :  { %1253 = vrot.lane.b32.xlu0 %v4693_v25, %s3776_s23 }
 0x1ff   :  { %v5938_v45 = vpop.permute.xlu1 %1143 }
 0x200   :  { %8899 = vst [vmem:[#allocation316_spill] sm:$0xff] %v5938_v45  ;;  %v5943_v6 = vpop.permute.xlu0 %1141 }
 0x201   :  { %8901 = vst [vmem:[#allocation318_spill] sm:$0xff] %v5943_v6  ;;  %1259 = vrot.lane.b32.xlu1 %v5936_v52, %s3776_s23 }
 0x202   :  { %1257 = vrot.lane.b32.xlu0 %v5941_v27, %s3776_s23 }
 0x203   :  { %v5949_v28 = vpop.permute.xlu1 %1147 }
 0x204   :  { %8902 = vst [vmem:[#allocation319_spill] sm:$0xff] %v5949_v28  ;;  %v5951_v16 = vpop.permute.xlu0 %1145 }
 0x205   :  { %8903 = vst [vmem:[#allocation320_spill] sm:$0xff] %v5951_v16  ;;  %1337 = vrot.lane.b32.xlu1 %v4714_v57, %s3777_s28 }
 0x206   :  { %1335 = vrot.lane.b32.xlu0 %v4721_v12, %s3777_s28 }
 0x207   :  { %v5957_v19 = vpop.permute.xlu1 %1151 }
 0x208   :  { %8904 = vst [vmem:[#allocation321_spill] sm:$0xff] %v5957_v19  ;;  %v5959_v29 = vpop.permute.xlu0 %1149 }
 0x209   :  { %8905 = vst [vmem:[#allocation322_spill] sm:$0xff] %v5959_v29  ;;  %1341 = vrot.lane.b32.xlu1 %v4731_v5, %s3777_s28  ;;  %v8929_v29 = vld [vmem:[#allocation149_spill] sm:$0xff] }
 0x20a   :  { %1339 = vrot.lane.b32.xlu0 %v4738_v10, %s3777_s28 }
 0x20b   :  { %v5965_v24 = vpop.permute.xlu1 %1155 }
 0x20c   :  { %8906 = vst [vmem:[#allocation323_spill] sm:$0xff] %v5965_v24  ;;  %v5967_v52 = vpop.permute.xlu0 %1153 }
 0x20d   :  { %8907 = vst [vmem:[#allocation324_spill] sm:$0xff] %v5967_v52  ;;  %1345 = vrot.lane.b32.xlu1 %v4748_v2, %s3777_s28  ;;  %v8925_v52 = vld [vmem:[#allocation145_spill] sm:$0xff] }
 0x20e   :  { %1343 = vrot.lane.b32.xlu0 %v4755_v1, %s3777_s28 }
 0x20f   :  { %v5973_v57 = vpop.permute.xlu1 %1159 }
 0x210   :  { %8908 = vst [vmem:[#allocation325_spill] sm:$0xff] %v5973_v57  ;;  %v5975_v12 = vpop.permute.xlu0 %1157 }
 0x211   :  { %8909 = vst [vmem:[#allocation326_spill] sm:$0xff] %v5975_v12  ;;  %1349 = vrot.lane.b32.xlu1 %v4765_v14, %s3777_s28 }
 0x212   :  { %1347 = vrot.lane.b32.xlu0 %v4772_v11, %s3777_s28 }
 0x213   :  { %v5981_v27 = vpop.permute.xlu1 %1163 }
 0x214   :  { %8910 = vst [vmem:[#allocation327_spill] sm:$0xff] %v5981_v27  ;;  %v5983_v25 = vpop.permute.xlu0 %1161 }
 0x215   :  { %8911 = vst [vmem:[#allocation328_spill] sm:$0xff] %v5983_v25  ;;  %1353 = vrot.lane.b32.xlu1 %v4782_v23, %s3777_s28 }
 0x216   :  { %1351 = vrot.lane.b32.xlu0 %v4789_v22, %s3777_s28 }
 0x217   :  { %v5989_v24 = vpop.permute.xlu1 %1167 }
 0x218   :  { %8912 = vst [vmem:[#allocation329_spill] sm:$0xff] %v5989_v24  ;;  %v5991_v57 = vpop.permute.xlu0 %1165 }
 0x219   :  { %8913 = vst [vmem:[#allocation330_spill] sm:$0xff] %v5991_v57  ;;  %1357 = vrot.lane.b32.xlu1 %v4799_v31, %s3777_s28 }
 0x21a   :  { %1355 = vrot.lane.b32.xlu0 %v4806_v30, %s3777_s28 }
 0x21b   :  { %v5997_v12 = vpop.permute.xlu1 %1171 }
 0x21c   :  { %8914 = vst [vmem:[#allocation331_spill] sm:$0xff] %v5997_v12  ;;  %v5999_v27 = vpop.permute.xlu0 %1169 }
 0x21d   :  { %8915 = vst [vmem:[#allocation332_spill] sm:$0xff] %v5999_v27  ;;  %1361 = vrot.lane.b32.xlu1 %v4816_v39, %s3777_s28 }
 0x21e   :  { %1359 = vrot.lane.b32.xlu0 %v4823_v38, %s3777_s28 }
 0x21f   :  { %v6005_v25 = vpop.permute.xlu1 %1175 }
 0x220   :  { %8916 = vst [vmem:[#allocation333_spill] sm:$0xff] %v6005_v25  ;;  %v6007_v24 = vpop.permute.xlu0 %1173 }
 0x221   :  { %8917 = vst [vmem:[#allocation334_spill] sm:$0xff] %v6007_v24  ;;  %1365 = vrot.lane.b32.xlu1 %v4833_v47, %s3777_s28 }
 0x222   :  { %1363 = vrot.lane.b32.xlu0 %v4840_v46, %s3777_s28  ;;  %v8977_v46 = vld [vmem:[#allocation76_spill] sm:$0xff] }
 0x223   :  { %v6013_v57 = vpop.permute.xlu1 %1179 }
 0x224   :  { %8918 = vst [vmem:[#allocation335_spill] sm:$0xff] %v6013_v57  ;;  %v6015_v12 = vpop.permute.xlu0 %1177 }
 0x225   :  { %8919 = vst [vmem:[#allocation336_spill] sm:$0xff] %v6015_v12  ;;  %1369 = vrot.lane.b32.xlu1 %v4850_v55, %s3777_s28  ;;  %v8924_v12 = vld [vmem:[#allocation143_spill] sm:$0xff]  ;;  %v8965_v55 = vld [vmem:[#allocation61_spill] sm:$0xff] }
 0x226   :  { %1367 = vrot.lane.b32.xlu0 %v4857_v54, %s3777_s28 }
 0x227   :  { %v6021_v27 = vpop.permute.xlu1 %1183 }
 0x228   :  { %8920 = vst [vmem:[#allocation337_spill] sm:$0xff] %v6021_v27  ;;  %v6023_v25 = vpop.permute.xlu0 %1181 }
 0x229   :  { %8921 = vst [vmem:[#allocation338_spill] sm:$0xff] %v6023_v25  ;;  %1373 = vrot.lane.b32.xlu1 %v4867_v63, %s3777_s28  ;;  %v8928_v25 = vld [vmem:[#allocation147_spill] sm:$0xff]  ;;  %v8941_v63 = vld [vmem:[#allocation160_spill] sm:$0xff] }
 0x22a   :  { %1371 = vrot.lane.b32.xlu0 %v4874_v62, %s3777_s28 }
 0x22b   :  { %v6029_v24 = vpop.permute.xlu1 %1187 }
 0x22c   :  { %8922 = vst [vmem:[#allocation339_spill] sm:$0xff] %v6029_v24  ;;  %v6031_v57 = vpop.permute.xlu0 %1185 }
 0x22d   :  { %8923 = vst [vmem:[#allocation340_spill] sm:$0xff] %v6031_v57  ;;  %1377 = vrot.lane.b32.xlu1 %v8924_v12, %s3777_s28  ;;  %v8932_v57 = vld [vmem:[#allocation151_spill] sm:$0xff]  ;;  %v8933_v12 = vld [vmem:[#allocation153_spill] sm:$0xff] }
 0x22e   :  { %1375 = vrot.lane.b32.xlu0 %v8925_v52, %s3777_s28 }
 0x22f   :  { %v6037_v19 = vpop.permute.xlu1 %1191 }
 0x230   :  { %8926 = vst [vmem:[#allocation341_spill] sm:$0xff] %v6037_v19  ;;  %v6039_v27 = vpop.permute.xlu0 %1189 }
 0x231   :  { %8927 = vst [vmem:[#allocation342_spill] sm:$0xff] %v6039_v27  ;;  %1381 = vrot.lane.b32.xlu1 %v8928_v25, %s3777_s28  ;;  %v8936_v27 = vld [vmem:[#allocation155_spill] sm:$0xff]  ;;  %v1326_v25 = vrot.slane %v5498_v13, 2 }
 0x232   :  { %1379 = vrot.lane.b32.xlu0 %v8929_v29, %s3777_s28  ;;  %v8937_v29 = vld [vmem:[#allocation157_spill] sm:$0xff] }
 0x233   :  { %v6045_v28 = vpop.permute.xlu1 %1195 }
 0x234   :  { %8930 = vst [vmem:[#allocation343_spill] sm:$0xff] %v6045_v28  ;;  %v6047_v24 = vpop.permute.xlu0 %1193  ;;  %v1328_v28 = vrot.slane %v5774_v7, 2 }
 0x235   :  { %8931 = vst [vmem:[#allocation344_spill] sm:$0xff] %v6047_v24  ;;  %1385 = vrot.lane.b32.xlu1 %v8932_v57, %s3777_s28  ;;  %v1325_v24 = vrot.slane %v5505_v18, 2 }
 0x236   :  { %1383 = vrot.lane.b32.xlu0 %v8933_v12, %s3777_s28  ;;  %v8940_v12 = vld [vmem:[#allocation159_spill] sm:$0xff] }
 0x237   :  { %v6053_v52 = vpop.permute.xlu1 %1199 }
 0x238   :  { %8934 = vst [vmem:[#allocation345_spill] sm:$0xff] %v6053_v52  ;;  %v6055_v19 = vpop.permute.xlu0 %1197 }
 0x239   :  { %8935 = vst [vmem:[#allocation346_spill] sm:$0xff] %v6055_v19  ;;  %1389 = vrot.lane.b32.xlu1 %v8936_v27, %s3777_s28  ;;  %v6073_v27 = vsel %vm572_vm1, %v1326_v25, %v1328_v28  ;;  %v8948_v28 = vld [vmem:[#allocation39_spill] sm:$0xff]  ;;  %v8981_v19 = vld [vmem:[#allocation81_spill] sm:$0xff] }
 0x23a   :  { %1387 = vrot.lane.b32.xlu0 %v8937_v29, %s3777_s28  ;;  %8942 = vst [vmem:[#allocation349_spill] sm:$0xff] %v6073_v27  ;;  %v6078_v29 = vsel %vm572_vm1, %v1325_v24, %v1326_v25 }
 0x23b   :  { %v6064_v57 = vpop.permute.xlu1 %1203  ;;  %8944 = vst [vmem:[#allocation351_spill] sm:$0xff] %v6078_v29 }
 0x23c   :  { %8938 = vst [vmem:[#allocation347_spill] sm:$0xff] %v6064_v57  ;;  %v6066_v16 = vpop.permute.xlu0 %1201  ;;  %v8969_v57 = vld [vmem:[#allocation66_spill] sm:$0xff] }
 0x23d   :  { %8939 = vst [vmem:[#allocation348_spill] sm:$0xff] %v6066_v16  ;;  %1393 = vrot.lane.b32.xlu1 %v8940_v12, %s3777_s28 }
 0x23e   :  { %1391 = vrot.lane.b32.xlu0 %v8941_v63, %s3777_s28  ;;  %v8949_v63 = vld [vmem:[#allocation41_spill] sm:$0xff] }
 0x23f   :  { %v6075_v62 = vpop.permute.xlu1 %1207 }
 0x240   :  { %8943 = vst [vmem:[#allocation350_spill] sm:$0xff] %v6075_v62  ;;  %v6080_v7 = vpop.permute.xlu0 %1205  ;;  %v8952_v62 = vld [vmem:[#allocation161_spill] sm:$0xff] }
 0x241   :  { %8945 = vst [vmem:[#allocation352_spill] sm:$0xff] %v6080_v7  ;;  %1397 = vrot.lane.b32.xlu1 %v6073_v27, %s3777_s28  ;;  %v8953_v27 = vld [vmem:[#allocation46_spill] sm:$0xff]  ;;  %v8961_v7 = vld [vmem:[#allocation56_spill] sm:$0xff] }
 0x242   :  { %1395 = vrot.lane.b32.xlu0 %v6078_v29, %s3777_s28 }
 0x243   :  { %v6086_v12 = vpop.permute.xlu1 %1211 }
 0x244   :  { %8946 = vst [vmem:[#allocation353_spill] sm:$0xff] %v6086_v12  ;;  %v6088_v45 = vpop.permute.xlu0 %1209 }
 0x245   :  { %8947 = vst [vmem:[#allocation354_spill] sm:$0xff] %v6088_v45  ;;  %1401 = vrot.lane.b32.xlu1 %v8948_v28, %s3777_s28  ;;  %v8956_v45 = vld [vmem:[#allocation162_spill] sm:$0xff]  ;;  %v8957_v28 = vld [vmem:[#allocation51_spill] sm:$0xff] }
 0x246   :  { %1399 = vrot.lane.b32.xlu0 %v8949_v63, %s3777_s28 }
 0x247   :  { %v6094_v25 = vpop.permute.xlu1 %1215 }
 0x248   :  { %8950 = vst [vmem:[#allocation39_spill] sm:$0xff] %v6094_v25  ;;  %v6096_v24 = vpop.permute.xlu0 %1213 }
 0x249   :  { %8951 = vst [vmem:[#allocation41_spill] sm:$0xff] %v6096_v24  ;;  %1405 = vrot.lane.b32.xlu1 %v8952_v62, %s3777_s28  ;;  %v8960_v24 = vld [vmem:[#allocation163_spill] sm:$0xff] }
 0x24a   :  { %1403 = vrot.lane.b32.xlu0 %v8953_v27, %s3777_s28 }
 0x24b   :  { %v6102_v29 = vpop.permute.xlu1 %1219 }
 0x24c   :  { %8954 = vst [vmem:[#allocation161_spill] sm:$0xff] %v6102_v29  ;;  %v6104_v12 = vpop.permute.xlu0 %1217 }
 0x24d   :  { %8955 = vst [vmem:[#allocation46_spill] sm:$0xff] %v6104_v12  ;;  %1409 = vrot.lane.b32.xlu1 %v8956_v45, %s3777_s28  ;;  %v8964_v12 = vld [vmem:[#allocation164_spill] sm:$0xff] }
 0x24e   :  { %1407 = vrot.lane.b32.xlu0 %v8957_v28, %s3777_s28 }
 0x24f   :  { %v6110_v63 = vpop.permute.xlu1 %1223 }
 0x250   :  { %8958 = vst [vmem:[#allocation162_spill] sm:$0xff] %v6110_v63  ;;  %v6112_v25 = vpop.permute.xlu0 %1221 }
 0x251   :  { %8959 = vst [vmem:[#allocation51_spill] sm:$0xff] %v6112_v25  ;;  %1413 = vrot.lane.b32.xlu1 %v8960_v24, %s3777_s28  ;;  %v8968_v25 = vld [vmem:[#allocation165_spill] sm:$0xff] }
 0x252   :  { %1411 = vrot.lane.b32.xlu0 %v8961_v7, %s3777_s28 }
 0x253   :  { %v6118_v6 = vpop.permute.xlu1 %1227 }
 0x254   :  { %8962 = vst [vmem:[#allocation163_spill] sm:$0xff] %v6118_v6  ;;  %v6120_v29 = vpop.permute.xlu0 %1225 }
 0x255   :  { %8963 = vst [vmem:[#allocation56_spill] sm:$0xff] %v6120_v29  ;;  %1417 = vrot.lane.b32.xlu1 %v8964_v12, %s3777_s28  ;;  %v8972_v29 = vld [vmem:[#allocation166_spill] sm:$0xff] }
 0x256   :  { %1415 = vrot.lane.b32.xlu0 %v8965_v55, %s3777_s28 }
 0x257   :  { %v6126_v54 = vpop.permute.xlu1 %1231 }
 0x258   :  { %8966 = vst [vmem:[#allocation164_spill] sm:$0xff] %v6126_v54  ;;  %v6128_v63 = vpop.permute.xlu0 %1229 }
 0x259   :  { %8967 = vst [vmem:[#allocation61_spill] sm:$0xff] %v6128_v63  ;;  %1421 = vrot.lane.b32.xlu1 %v8968_v25, %s3777_s28  ;;  %v8976_v63 = vld [vmem:[#allocation167_spill] sm:$0xff] }
 0x25a   :  { %1419 = vrot.lane.b32.xlu0 %v8969_v57, %s3777_s28 }
 0x25b   :  { %v6134_v16 = vpop.permute.xlu1 %1235 }
 0x25c   :  { %8970 = vst [vmem:[#allocation165_spill] sm:$0xff] %v6134_v16  ;;  %v6136_v6 = vpop.permute.xlu0 %1233 }
 0x25d   :  { %8971 = vst [vmem:[#allocation66_spill] sm:$0xff] %v6136_v6  ;;  %1425 = vrot.lane.b32.xlu1 %v8972_v29, %s3777_s28  ;;  %v8980_v6 = vld [vmem:[#allocation168_spill] sm:$0xff] }
 0x25e   :  { %1423 = vrot.lane.b32.xlu0 %v8973_v8, %s3777_s28 }
 0x25f   :  { %v6142_v47 = vpop.permute.xlu1 %1239 }
 0x260   :  { %8974 = vst [vmem:[#allocation166_spill] sm:$0xff] %v6142_v47  ;;  %v6144_v54 = vpop.permute.xlu0 %1237 }
 0x261   :  { %8975 = vst [vmem:[#allocation71_spill] sm:$0xff] %v6144_v54  ;;  %1429 = vrot.lane.b32.xlu1 %v8976_v63, %s3777_s28  ;;  %v8984_v54 = vld [vmem:[#allocation169_spill] sm:$0xff]  ;;  %v8985_v63 = vld [vmem:[#allocation86_spill] sm:$0xff] }
 0x262   :  { %1427 = vrot.lane.b32.xlu0 %v8977_v46, %s3777_s28 }
 0x263   :  { %v6150_v52 = vpop.permute.xlu1 %1243 }
 0x264   :  { %8978 = vst [vmem:[#allocation355_spill] sm:$0xff] %v6150_v52  ;;  %v6152_v16 = vpop.permute.xlu0 %1241 }
 0x265   :  { %8979 = vst [vmem:[#allocation356_spill] sm:$0xff] %v6152_v16  ;;  %1433 = vrot.lane.b32.xlu1 %v8980_v6, %s3777_s28  ;;  %v8988_v16 = vld [vmem:[#allocation170_spill] sm:$0xff]  ;;  %v8989_v6 = vld [vmem:[#allocation91_spill] sm:$0xff] }
 0x266   :  { %1431 = vrot.lane.b32.xlu0 %v8981_v19, %s3777_s28 }
 0x267   :  { %v6158_v9 = vpop.permute.xlu1 %1247 }
 0x268   :  { %8982 = vst [vmem:[#allocation357_spill] sm:$0xff] %v6158_v9  ;;  %v6160_v47 = vpop.permute.xlu0 %1245 }
 0x269   :  { %8983 = vst [vmem:[#allocation358_spill] sm:$0xff] %v6160_v47  ;;  %1437 = vrot.lane.b32.xlu1 %v8984_v54, %s3777_s28  ;;  %v8992_v47 = vld [vmem:[#allocation96_spill] sm:$0xff] }
 0x26a   :  { %1435 = vrot.lane.b32.xlu0 %v8985_v63, %s3777_s28 }
 0x26b   :  { %v6166_v46 = vpop.permute.xlu1 %1251 }
 0x26c   :  { %8986 = vst [vmem:[#allocation86_spill] sm:$0xff] %v6166_v46  ;;  %v6168_v52 = vpop.permute.xlu0 %1249 }
 0x26d   :  { %8987 = vst [vmem:[#allocation359_spill] sm:$0xff] %v6168_v52  ;;  %1441 = vrot.lane.b32.xlu1 %v8988_v16, %s3777_s28  ;;  %v8995_v52 = vld [vmem:[#allocation101_spill] sm:$0xff] }
 0x26e   :  { %1439 = vrot.lane.b32.xlu0 %v8989_v6, %s3777_s28  ;;  %v9008_v6 = vld [vmem:[#allocation193_spill] sm:$0xff] }
 0x26f   :  { %v6174_v19 = vpop.permute.xlu1 %1255 }
 0x270   :  { %8990 = vst [vmem:[#allocation360_spill] sm:$0xff] %v6174_v19  ;;  %v6176_v9 = vpop.permute.xlu0 %1253 }
 0x271   :  { %8991 = vst [vmem:[#allocation361_spill] sm:$0xff] %v6176_v9  ;;  %1445 = vrot.lane.b32.xlu1 %v5167_v20, %s3777_s28  ;;  %v1331_v9 = vrot.slane %v5650_v40, 2 }
 0x272   :  { %1443 = vrot.lane.b32.xlu0 %v8992_v47, %s3777_s28 }
 0x273   :  { %v6182_v54 = vpop.permute.xlu1 %1259 }
 0x274   :  { %8993 = vst [vmem:[#allocation362_spill] sm:$0xff] %v6182_v54  ;;  %v6184_v46 = vpop.permute.xlu0 %1257  ;;  %v1333_v54 = vrot.slane %v5916_v17, 2 }
 0x275   :  { %8994 = vst [vmem:[#allocation363_spill] sm:$0xff] %v6184_v46  ;;  %1449 = vrot.lane.b32.xlu1 %v5184_v26, %s3777_s28  ;;  %v1330_v46 = vrot.slane %v5657_v15, 2 }
 0x276   :  { %1447 = vrot.lane.b32.xlu0 %v8995_v52, %s3777_s28 }
 0x277   :  { %v6190_v16 = vpop.permute.xlu1 %1337 }
 0x278   :  { %v6192_v19 = vpop.permute.xlu0 %1335 }
 0x279   :  { %1453 = vrot.lane.b32.xlu1 %v5201_v53, %s3777_s28  ;;  %v6210_v53 = vsel %vm572_vm1, %v1331_v9, %v1333_v54  ;;  %v9000_v54 = vld [vmem:[#allocation185_spill] sm:$0xff] }
 0x27a   :  { %1451 = vrot.lane.b32.xlu0 %v5208_v58, %s3777_s28  ;;  %8996 = vst [vmem:[#allocation364_spill] sm:$0xff] %v6210_v53  ;;  %v6215_v58 = vsel %vm572_vm1, %v1330_v46, %v1331_v9 }
 0x27b   :  { %v6201_v26 = vpop.permute.xlu1 %1341  ;;  %8997 = vst [vmem:[#allocation365_spill] sm:$0xff] %v6215_v58 }
 0x27c   :  { %v6203_v20 = vpop.permute.xlu0 %1339 }
 0x27d   :  { %1457 = vrot.lane.b32.xlu1 %v5218_v34, %s3777_s28 }
 0x27e   :  { %1455 = vrot.lane.b32.xlu0 %v5223_v21, %s3777_s28  ;;  %v9001_v21 = vld [vmem:[#allocation186_spill] sm:$0xff] }
 0x27f   :  { %v6212_v40 = vpop.permute.xlu1 %1345 }
 0x280   :  { %v6217_v17 = vpop.permute.xlu0 %1343 }
 0x281   :  { %1461 = vrot.lane.b32.xlu1 %v6210_v53, %s3777_s28  ;;  %v9004_v53 = vld [vmem:[#allocation189_spill] sm:$0xff] }
 0x282   :  { %1459 = vrot.lane.b32.xlu0 %v6215_v58, %s3777_s28  ;;  %v9005_v58 = vld [vmem:[#allocation190_spill] sm:$0xff] }
 0x283   :  { %v6223_v15 = vpop.permute.xlu1 %1349 }
 0x284   :  { %8998 = vst [vmem:[#allocation366_spill] sm:$0xff] %v6223_v15  ;;  %v6225_v34 = vpop.permute.xlu0 %1347 }
 0x285   :  { %8999 = vst [vmem:[#allocation367_spill] sm:$0xff] %v6225_v34  ;;  %1533 = vrot.lane.b32.xlu1 %v9000_v54, %s3778_s29  ;;  %v9009_v54 = vld [vmem:[#allocation194_spill] sm:$0xff] }
 0x286   :  { %1531 = vrot.lane.b32.xlu0 %v9001_v21, %s3778_s29 }
 0x287   :  { %v6231_v46 = vpop.permute.xlu1 %1353 }
 0x288   :  { %9002 = vst [vmem:[#allocation185_spill] sm:$0xff] %v6231_v46  ;;  %v6233_v9 = vpop.permute.xlu0 %1351 }
 0x289   :  { %9003 = vst [vmem:[#allocation186_spill] sm:$0xff] %v6233_v9  ;;  %1537 = vrot.lane.b32.xlu1 %v9004_v53, %s3778_s29  ;;  %v9012_v9 = vld [vmem:[#allocation197_spill] sm:$0xff]  ;;  %v9013_v53 = vld [vmem:[#allocation198_spill] sm:$0xff] }
 0x28a   :  { %1535 = vrot.lane.b32.xlu0 %v9005_v58, %s3778_s29 }
 0x28b   :  { %v6239_v52 = vpop.permute.xlu1 %1357 }
 0x28c   :  { %9006 = vst [vmem:[#allocation189_spill] sm:$0xff] %v6239_v52  ;;  %v6241_v47 = vpop.permute.xlu0 %1355 }
 0x28d   :  { %9007 = vst [vmem:[#allocation190_spill] sm:$0xff] %v6241_v47  ;;  %1541 = vrot.lane.b32.xlu1 %v9008_v6, %s3778_s29  ;;  %v9016_v47 = vld [vmem:[#allocation201_spill] sm:$0xff]  ;;  %v9017_v6 = vld [vmem:[#allocation202_spill] sm:$0xff] }
 0x28e   :  { %1539 = vrot.lane.b32.xlu0 %v9009_v54, %s3778_s29 }
 0x28f   :  { %v6247_v21 = vpop.permute.xlu1 %1361 }
 0x290   :  { %9010 = vst [vmem:[#allocation193_spill] sm:$0xff] %v6247_v21  ;;  %v6249_v46 = vpop.permute.xlu0 %1359 }
 0x291   :  { %9011 = vst [vmem:[#allocation194_spill] sm:$0xff] %v6249_v46  ;;  %1545 = vrot.lane.b32.xlu1 %v9012_v9, %s3778_s29  ;;  %v9020_v46 = vld [vmem:[#allocation205_spill] sm:$0xff]  ;;  %v9021_v9 = vld [vmem:[#allocation206_spill] sm:$0xff] }
 0x292   :  { %1543 = vrot.lane.b32.xlu0 %v9013_v53, %s3778_s29 }
 0x293   :  { %v6255_v58 = vpop.permute.xlu1 %1365 }
 0x294   :  { %9014 = vst [vmem:[#allocation197_spill] sm:$0xff] %v6255_v58  ;;  %v6257_v52 = vpop.permute.xlu0 %1363 }
 0x295   :  { %9015 = vst [vmem:[#allocation198_spill] sm:$0xff] %v6257_v52  ;;  %1549 = vrot.lane.b32.xlu1 %v9016_v47, %s3778_s29  ;;  %v9024_v52 = vld [vmem:[#allocation209_spill] sm:$0xff]  ;;  %v9025_v47 = vld [vmem:[#allocation210_spill] sm:$0xff] }
 0x296   :  { %1547 = vrot.lane.b32.xlu0 %v9017_v6, %s3778_s29 }
 0x297   :  { %v6263_v54 = vpop.permute.xlu1 %1369 }
 0x298   :  { %9018 = vst [vmem:[#allocation201_spill] sm:$0xff] %v6263_v54  ;;  %v6265_v21 = vpop.permute.xlu0 %1367 }
 0x299   :  { %9019 = vst [vmem:[#allocation202_spill] sm:$0xff] %v6265_v21  ;;  %1553 = vrot.lane.b32.xlu1 %v9020_v46, %s3778_s29  ;;  %v9028_v21 = vld [vmem:[#allocation213_spill] sm:$0xff]  ;;  %v9029_v46 = vld [vmem:[#allocation214_spill] sm:$0xff] }
 0x29a   :  { %1551 = vrot.lane.b32.xlu0 %v9021_v9, %s3778_s29 }
 0x29b   :  { %v6271_v53 = vpop.permute.xlu1 %1373 }
 0x29c   :  { %9022 = vst [vmem:[#allocation205_spill] sm:$0xff] %v6271_v53  ;;  %v6273_v58 = vpop.permute.xlu0 %1371 }
 0x29d   :  { %9023 = vst [vmem:[#allocation206_spill] sm:$0xff] %v6273_v58  ;;  %1557 = vrot.lane.b32.xlu1 %v9024_v52, %s3778_s29  ;;  %v9032_v58 = vld [vmem:[#allocation217_spill] sm:$0xff]  ;;  %v9033_v52 = vld [vmem:[#allocation218_spill] sm:$0xff] }
 0x29e   :  { %1555 = vrot.lane.b32.xlu0 %v9025_v47, %s3778_s29 }
 0x29f   :  { %v6279_v6 = vpop.permute.xlu1 %1377 }
 0x2a0   :  { %9026 = vst [vmem:[#allocation209_spill] sm:$0xff] %v6279_v6  ;;  %v6281_v54 = vpop.permute.xlu0 %1375 }
 0x2a1   :  { %9027 = vst [vmem:[#allocation210_spill] sm:$0xff] %v6281_v54  ;;  %1561 = vrot.lane.b32.xlu1 %v9028_v21, %s3778_s29  ;;  %v9036_v54 = vld [vmem:[#allocation221_spill] sm:$0xff]  ;;  %v9037_v21 = vld [vmem:[#allocation222_spill] sm:$0xff] }
 0x2a2   :  { %1559 = vrot.lane.b32.xlu0 %v9029_v46, %s3778_s29 }
 0x2a3   :  { %v6287_v9 = vpop.permute.xlu1 %1381 }
 0x2a4   :  { %9030 = vst [vmem:[#allocation213_spill] sm:$0xff] %v6287_v9  ;;  %v6289_v53 = vpop.permute.xlu0 %1379 }
 0x2a5   :  { %9031 = vst [vmem:[#allocation214_spill] sm:$0xff] %v6289_v53  ;;  %1565 = vrot.lane.b32.xlu1 %v9032_v58, %s3778_s29  ;;  %v9040_v53 = vld [vmem:[#allocation225_spill] sm:$0xff]  ;;  %v9041_v58 = vld [vmem:[#allocation226_spill] sm:$0xff] }
 0x2a6   :  { %1563 = vrot.lane.b32.xlu0 %v9033_v52, %s3778_s29 }
 0x2a7   :  { %v6295_v47 = vpop.permute.xlu1 %1385 }
 0x2a8   :  { %9034 = vst [vmem:[#allocation217_spill] sm:$0xff] %v6295_v47  ;;  %v6297_v6 = vpop.permute.xlu0 %1383 }
 0x2a9   :  { %9035 = vst [vmem:[#allocation218_spill] sm:$0xff] %v6297_v6  ;;  %1569 = vrot.lane.b32.xlu1 %v9036_v54, %s3778_s29  ;;  %v9044_v6 = vld [vmem:[#allocation229_spill] sm:$0xff]  ;;  %v9045_v54 = vld [vmem:[#allocation230_spill] sm:$0xff] }
 0x2aa   :  { %1567 = vrot.lane.b32.xlu0 %v9037_v21, %s3778_s29 }
 0x2ab   :  { %v6303_v46 = vpop.permute.xlu1 %1389 }
 0x2ac   :  { %9038 = vst [vmem:[#allocation221_spill] sm:$0xff] %v6303_v46  ;;  %v6305_v9 = vpop.permute.xlu0 %1387 }
 0x2ad   :  { %9039 = vst [vmem:[#allocation222_spill] sm:$0xff] %v6305_v9  ;;  %1573 = vrot.lane.b32.xlu1 %v9040_v53, %s3778_s29  ;;  %v9048_v9 = vld [vmem:[#allocation233_spill] sm:$0xff]  ;;  %v9049_v53 = vld [vmem:[#allocation234_spill] sm:$0xff] }
 0x2ae   :  { %1571 = vrot.lane.b32.xlu0 %v9041_v58, %s3778_s29 }
 0x2af   :  { %v6311_v52 = vpop.permute.xlu1 %1393 }
 0x2b0   :  { %9042 = vst [vmem:[#allocation225_spill] sm:$0xff] %v6311_v52  ;;  %v6313_v47 = vpop.permute.xlu0 %1391 }
 0x2b1   :  { %9043 = vst [vmem:[#allocation226_spill] sm:$0xff] %v6313_v47  ;;  %1577 = vrot.lane.b32.xlu1 %v9044_v6, %s3778_s29  ;;  %v9050_v47 = vld [vmem:[#allocation237_spill] sm:$0xff]  ;;  %v9051_v6 = vld [vmem:[#allocation238_spill] sm:$0xff] }
 0x2b2   :  { %1575 = vrot.lane.b32.xlu0 %v9045_v54, %s3778_s29  ;;  %v2653_v54 = vld [vmem:[%s8120_s1 + $0x20] sm:$0xf] }
 0x2b3   :  { %v6319_v21 = vpop.permute.xlu1 %1397  ;;  %3522 = vmatprep.subr.msk.mxu0 %vm2854_vm2, %v2653_v54  ;;  %3628 = vmatprep.subr.msk.mxu1 %vm2854_vm2, %v2653_v54 }
 0x2b4   :  { %9046 = vst [vmem:[#allocation229_spill] sm:$0xff] %v6319_v21  ;;  %v6321_v46 = vpop.permute.xlu0 %1395  ;;  %3523 = vmatpush3.msk.msra.mxu0 %vm2854_vm2, %v2653_v54  ;;  %3633 = vmatpush3.msk.msra.mxu1 %vm2854_vm2, %v2653_v54  ;;  %v66_v54 = vld [vmem:[%s8119_s0 + $0x198] sm:$0xff] }
 0x2b5   :  { %9047 = vst [vmem:[#allocation230_spill] sm:$0xff] %v6321_v46  ;;  %1581 = vrot.lane.b32.xlu1 %v9048_v9, %s3778_s29  ;;  %v2649_v46 = vld [vmem:[%s8120_s1] sm:$0xff] }
 0x2b6   :  { %1579 = vrot.lane.b32.xlu0 %v9049_v53, %s3778_s29  ;;  %v2651_v53 = vld [vmem:[%s8120_s1 + $0x10] sm:$0xff] }
 0x2b7   :  { %v6327_v58 = vpop.permute.xlu1 %1401 }
 0x2b8   :  { %v6329_v52 = vpop.permute.xlu0 %1399 }
 0x2b9   :  { %1585 = vrot.lane.b32.xlu1 %v9050_v47, %s3778_s29  ;;  %v2652_v47 = vld [vmem:[%s8120_s1 + $0x18] sm:$0xff] }
 0x2ba   :  { %1583 = vrot.lane.b32.xlu0 %v9051_v6, %s3778_s29  ;;  %3524 = vmatprep.subr.mxu0 %v2652_v47 }
 0x2bb   :  { %v6338_v21 = vpop.permute.xlu1 %1405  ;;  %3525 = vmatpush3.msra.mxu0 %v2652_v47  ;;  %3629 = vmatprep.subr.mxu1 %v2652_v47 }
 0x2bc   :  { %v6340_v9 = vpop.permute.xlu0 %1403  ;;  %3526 = vmatprep.subr.mxu0 %v2651_v53  ;;  %3634 = vmatpush3.msra.mxu1 %v2652_v47 }
 0x2bd   :  { %1589 = vrot.lane.b32.xlu1 %v5498_v13, %s3778_s29  ;;  %3527 = vmatpush3.msra.mxu0 %v2651_v53 }
 0x2be   :  { %1587 = vrot.lane.b32.xlu0 %v5505_v18, %s3778_s29  ;;  %v2650_v18 = vld [vmem:[%s8120_s1 + $0x8] sm:$0xff]  ;;  %3630 = vmatprep.subr.mxu1 %v2651_v53  ;;  %s3780_s1 = smov 32  }
 0x2bf   :  { %v6352_v6 = vpop.permute.xlu1 %1409  ;;  %3528 = vmatprep.subr.mxu0 %v2650_v18  ;;  %3635 = vmatpush3.msra.mxu1 %v2651_v53 }
 0x2c0   :  { %v6357_v13 = vpop.permute.xlu0 %1407  ;;  %3529 = vmatpush3.msra.mxu0 %v2650_v18  ;;  %3631 = vmatprep.subr.mxu1 %v2650_v18 }
 0x2c1   :  { %1595 = vrot.lane.b32.xlu1 %v5539_v35, %s3778_s29  ;;  %3530 = vmatprep.subr.mxu0 %v2649_v46  ;;  %v9052_v35 = vld [vmem:[#allocation245_spill] sm:$0xff] }
 0x2c2   :  { %1591 = vrot.lane.b32.xlu0 %v66_v54, %s3778_s29  ;;  %3531 = vmatpush3.msra.mxu0 %v2649_v46 }
 0x2c3   :  { %v6368_v15 = vpop.permute.xlu1 %1413  ;;  %3636 = vmatpush3.msra.mxu1 %v2650_v18 }
 0x2c4   :  { %v6370_v47 = vpop.permute.xlu0 %1411  ;;  %3632 = vmatprep.subr.mxu1 %v2649_v46 }
 0x2c5   :  { %1735 = vrot.lane.b32.xlu1 %v8785_v41, %s3779_s16  ;;  %3637 = vmatpush3.msra.mxu1 %v2649_v46 }
 0x2c6   :  { %1597 = vrot.lane.b32.xlu0 %v9052_v35, %s3778_s29 }
 0x2c7   :  { %v6376_v54 = vpop.permute.xlu1 %1417 }
 0x2c8   :  { %v6378_v34 = vpop.permute.xlu0 %1415 }
 0x2c9   :  { %1737 = vrot.lane.b32.xlu1 %v8784_v50, %s3779_s16 }
 0x2ca   :  { %1799 = vrot.lane.b32.xlu0 %v8849_v60, %s3779_s16 }
 0x2cb   :  { %v6384_v53 = vpop.permute.xlu1 %1421 }
 0x2cc   :  { %v6386_v41 = vpop.permute.xlu0 %1419 }
 0x2cd   :  { %1937 = vrot.lane.b32.xlu1 %v4738_v10, %s3780_s1  ;;  %v6407_v10 = vld [vmem:[%s8119_s0 + $0x1f8] sm:$0xff] }
 0x2ce   :  { %1801 = vrot.lane.b32.xlu0 %v8848_v32, %s3779_s16 }
 0x2cf   :  { %v6392_v18 = vpop.permute.xlu1 %1425 }
 0x2d0   :  { %v6394_v35 = vpop.permute.xlu0 %1423 }
 0x2d1   :  { %1939 = vrot.lane.b32.xlu1 %v4731_v5, %s3780_s1 }
 0x2d2   :  { %2001 = vrot.lane.b32.xlu0 %v8953_v27, %s3780_s1  ;;  %v6422_v27 = vld [vmem:[%s8119_s0 + $0x200] sm:$0xff] }
 0x2d3   :  { %v6400_v60 = vpop.permute.xlu1 %1429 }
 0x2d4   :  { %9053 = vst [vmem:[#allocation233_spill] sm:$0xff] %v6400_v60  ;;  %v6402_v50 = vpop.permute.xlu0 %1427 }
 0x2d5   :  { %9054 = vst [vmem:[#allocation234_spill] sm:$0xff] %v6402_v50  ;;  %1599 = vrot.lane.b32.xlu1 %v6407_v10, %s3778_s29 }
 0x2d6   :  { %2003 = vrot.lane.b32.xlu0 %v8952_v62, %s3780_s1 }
 0x2d7   :  { %v6413_v32 = vpop.permute.xlu1 %1433 }
 0x2d8   :  { %9055 = vst [vmem:[#allocation237_spill] sm:$0xff] %v6413_v32  ;;  %v6415_v5 = vpop.permute.xlu0 %1431 }
 0x2d9   :  { %9056 = vst [vmem:[#allocation238_spill] sm:$0xff] %v6415_v5  ;;  %1739 = vrot.lane.b32.xlu1 %v8789_v56, %s3779_s16  ;;  %v3694_v5 = vld [vmem:[%s8119_s0 + $0x8] sm:$0xff] }
 0x2da   :  { %1601 = vrot.lane.b32.xlu0 %v6422_v27, %s3778_s29 }
 0x2db   :  { %v6426_v46 = vpop.permute.xlu1 %1437 }
 0x2dc   :  { %9057 = vst [vmem:[#allocation245_spill] sm:$0xff] %v6426_v46  ;;  %v6428_v60 = vpop.permute.xlu0 %1435 }
 0x2dd   :  { %9058 = vst [vmem:[#allocation368_spill] sm:$0xff] %v6428_v60  ;;  %1741 = vrot.lane.b32.xlu1 %v8788_v37, %s3779_s16 }
 0x2de   :  { %1803 = vrot.lane.b32.xlu0 %v8853_v51, %s3779_s16 }
 0x2df   :  { %v6434_v62 = vpop.permute.xlu1 %1441 }
 0x2e0   :  { %9059 = vst [vmem:[#allocation369_spill] sm:$0xff] %v6434_v62  ;;  %v6436_v56 = vpop.permute.xlu0 %1439  ;;  %v9077_v62 = vld [vmem:[#allocation68_spill] sm:$0xff] }
 0x2e1   :  { %9060 = vst [vmem:[#allocation370_spill] sm:$0xff] %v6436_v56  ;;  %1941 = vrot.lane.b32.xlu1 %v4755_v1, %s3780_s1  ;;  %v6457_v1 = vld [vmem:[%s8119_s0 + $0x210] sm:$0xff] }
 0x2e2   :  { %1805 = vrot.lane.b32.xlu0 %v8852_v0, %s3779_s16 }
 0x2e3   :  { %v6442_v32 = vpop.permute.xlu1 %1445 }
 0x2e4   :  { %9061 = vst [vmem:[#allocation371_spill] sm:$0xff] %v6442_v32  ;;  %v6444_v46 = vpop.permute.xlu0 %1443 }
 0x2e5   :  { %9062 = vst [vmem:[#allocation372_spill] sm:$0xff] %v6444_v46  ;;  %1943 = vrot.lane.b32.xlu1 %v4748_v2, %s3780_s1 }
 0x2e6   :  { %2005 = vrot.lane.b32.xlu0 %v8957_v28, %s3780_s1  ;;  %v6472_v28 = vld [vmem:[%s8119_s0 + $0x218] sm:$0xff] }
 0x2e7   :  { %v6450_v37 = vpop.permute.xlu1 %1449 }
 0x2e8   :  { %9063 = vst [vmem:[#allocation373_spill] sm:$0xff] %v6450_v37  ;;  %v6452_v51 = vpop.permute.xlu0 %1447 }
 0x2e9   :  { %9064 = vst [vmem:[#allocation374_spill] sm:$0xff] %v6452_v51  ;;  %1603 = vrot.lane.b32.xlu1 %v6457_v1, %s3778_s29 }
 0x2ea   :  { %2007 = vrot.lane.b32.xlu0 %v8956_v45, %s3780_s1 }
 0x2eb   :  { %v6463_v0 = vpop.permute.xlu1 %1453 }
 0x2ec   :  { %9065 = vst [vmem:[#allocation375_spill] sm:$0xff] %v6463_v0  ;;  %v6465_v2 = vpop.permute.xlu0 %1451 }
 0x2ed   :  { %9066 = vst [vmem:[#allocation376_spill] sm:$0xff] %v6465_v2  ;;  %1743 = vrot.lane.b32.xlu1 %v8793_v49, %s3779_s16 }
 0x2ee   :  { %1605 = vrot.lane.b32.xlu0 %v6472_v28, %s3778_s29 }
 0x2ef   :  { %v6476_v37 = vpop.permute.xlu1 %1457 }
 0x2f0   :  { %9067 = vst [vmem:[#allocation377_spill] sm:$0xff] %v6476_v37  ;;  %v6478_v51 = vpop.permute.xlu0 %1455 }
 0x2f1   :  { %9068 = vst [vmem:[#allocation378_spill] sm:$0xff] %v6478_v51  ;;  %1745 = vrot.lane.b32.xlu1 %v8792_v44, %s3779_s16 }
 0x2f2   :  { %1807 = vrot.lane.b32.xlu0 %v8857_v3, %s3779_s16 }
 0x2f3   :  { %v6484_v45 = vpop.permute.xlu1 %1461 }
 0x2f4   :  { %9069 = vst [vmem:[#allocation379_spill] sm:$0xff] %v6484_v45  ;;  %v6486_v49 = vpop.permute.xlu0 %1459 }
 0x2f5   :  { %9070 = vst [vmem:[#allocation380_spill] sm:$0xff] %v6486_v49  ;;  %1945 = vrot.lane.b32.xlu1 %v4772_v11, %s3780_s1  ;;  %v6507_v11 = vld [vmem:[%s8119_s0 + $0x228] sm:$0xff] }
 0x2f6   :  { %1809 = vrot.lane.b32.xlu0 %v8856_v4, %s3779_s16 }
 0x2f7   :  { %v6492_v0 = vpop.permute.xlu1 %1533 }
 0x2f8   :  { %v6494_v37 = vpop.permute.xlu0 %1531 }
 0x2f9   :  { %1947 = vrot.lane.b32.xlu1 %v4765_v14, %s3780_s1 }
 0x2fa   :  { %2009 = vrot.lane.b32.xlu0 %v8961_v7, %s3780_s1  ;;  %v6522_v7 = vld [vmem:[%s8119_s0 + $0x230] sm:$0xff] }
 0x2fb   :  { %v6500_v44 = vpop.permute.xlu1 %1537 }
 0x2fc   :  { %v6502_v3 = vpop.permute.xlu0 %1535 }
 0x2fd   :  { %1607 = vrot.lane.b32.xlu1 %v6507_v11, %s3778_s29 }
 0x2fe   :  { %2011 = vrot.lane.b32.xlu0 %v8960_v24, %s3780_s1 }
 0x2ff   :  { %v6513_v4 = vpop.permute.xlu1 %1541 }
 0x300   :  { %v6515_v14 = vpop.permute.xlu0 %1539 }
 0x301   :  { %1747 = vrot.lane.b32.xlu1 %v8797_v61, %s3779_s16 }
 0x302   :  { %1609 = vrot.lane.b32.xlu0 %v6522_v7, %s3778_s29 }
 0x303   :  { %v6526_v45 = vpop.permute.xlu1 %1545 }
 0x304   :  { %v6528_v49 = vpop.permute.xlu0 %1543 }
 0x305   :  { %1749 = vrot.lane.b32.xlu1 %v8796_v42, %s3779_s16 }
 0x306   :  { %1811 = vrot.lane.b32.xlu0 %v8861_v43, %s3779_s16 }
 0x307   :  { %v6534_v24 = vpop.permute.xlu1 %1549 }
 0x308   :  { %v6536_v61 = vpop.permute.xlu0 %1547 }
 0x309   :  { %1949 = vrot.lane.b32.xlu1 %v4789_v22, %s3780_s1  ;;  %v6557_v22 = vld [vmem:[%s8119_s0 + $0x240] sm:$0xff] }
 0x30a   :  { %1813 = vrot.lane.b32.xlu0 %v8860_v33, %s3779_s16 }
 0x30b   :  { %v6542_v51 = vpop.permute.xlu1 %1553 }
 0x30c   :  { %v6544_v2 = vpop.permute.xlu0 %1551 }
 0x30d   :  { %1951 = vrot.lane.b32.xlu1 %v4782_v23, %s3780_s1 }
 0x30e   :  { %2013 = vrot.lane.b32.xlu0 %v8965_v55, %s3780_s1  ;;  %v6572_v55 = vld [vmem:[%s8119_s0 + $0x248] sm:$0xff] }
 0x30f   :  { %v6550_v43 = vpop.permute.xlu1 %1557 }
 0x310   :  { %v6552_v42 = vpop.permute.xlu0 %1555 }
 0x311   :  { %1611 = vrot.lane.b32.xlu1 %v6557_v22, %s3778_s29 }
 0x312   :  { %2015 = vrot.lane.b32.xlu0 %v8964_v12, %s3780_s1 }
 0x313   :  { %v6563_v33 = vpop.permute.xlu1 %1561 }
 0x314   :  { %9071 = vst [vmem:[#allocation381_spill] sm:$0xff] %v6563_v33  ;;  %v6565_v23 = vpop.permute.xlu0 %1559 }
 0x315   :  { %9072 = vst [vmem:[#allocation382_spill] sm:$0xff] %v6565_v23  ;;  %1751 = vrot.lane.b32.xlu1 %v8801_v36, %s3779_s16 }
 0x316   :  { %1613 = vrot.lane.b32.xlu0 %v6572_v55, %s3778_s29 }
 0x317   :  { %v6576_v32 = vpop.permute.xlu1 %1565 }
 0x318   :  { %9073 = vst [vmem:[#allocation383_spill] sm:$0xff] %v6576_v32  ;;  %v6578_v46 = vpop.permute.xlu0 %1563 }
 0x319   :  { %9074 = vst [vmem:[#allocation384_spill] sm:$0xff] %v6578_v46  ;;  %1753 = vrot.lane.b32.xlu1 %v8800_v48, %s3779_s16  ;;  %v9099_v46 = vld [vmem:[#allocation110_spill] sm:$0xff] }
 0x31a   :  { %1815 = vrot.lane.b32.xlu0 %v8865_v59, %s3779_s16 }
 0x31b   :  { %v6584_v12 = vpop.permute.xlu1 %1569 }
 0x31c   :  { %9075 = vst [vmem:[#allocation385_spill] sm:$0xff] %v6584_v12  ;;  %v6586_v36 = vpop.permute.xlu0 %1567 }
 0x31d   :  { %9076 = vst [vmem:[#allocation386_spill] sm:$0xff] %v6586_v36  ;;  %1953 = vrot.lane.b32.xlu1 %v4806_v30, %s3780_s1  ;;  %v6607_v30 = vld [vmem:[%s8119_s0 + $0x258] sm:$0xff] }
 0x31e   :  { %1817 = vrot.lane.b32.xlu0 %v9077_v62, %s3779_s16 }
 0x31f   :  { %v6592_v56 = vpop.permute.xlu1 %1573 }
 0x320   :  { %9078 = vst [vmem:[#allocation68_spill] sm:$0xff] %v6592_v56  ;;  %v6594_v60 = vpop.permute.xlu0 %1571 }
 0x321   :  { %9079 = vst [vmem:[#allocation387_spill] sm:$0xff] %v6594_v60  ;;  %1955 = vrot.lane.b32.xlu1 %v4799_v31, %s3780_s1  ;;  %v9092_v60 = vld [vmem:[#allocation73_spill] sm:$0xff] }
 0x322   :  { %2017 = vrot.lane.b32.xlu0 %v8969_v57, %s3780_s1  ;;  %v9084_v57 = vld [vmem:[#allocation18_spill] sm:$0xff] }
 0x323   :  { %v6600_v48 = vpop.permute.xlu1 %1577 }
 0x324   :  { %9080 = vst [vmem:[#allocation388_spill] sm:$0xff] %v6600_v48  ;;  %v6602_v59 = vpop.permute.xlu0 %1575  ;;  %v6622_v48 = vld [vmem:[%s8119_s0 + $0x260] sm:$0xff] }
 0x325   :  { %9081 = vst [vmem:[#allocation389_spill] sm:$0xff] %v6602_v59  ;;  %1615 = vrot.lane.b32.xlu1 %v6607_v30, %s3778_s29  ;;  %9085 = vst [vmem:[#allocation18_spill] sm:$0xff] %v6622_v48 }
 0x326   :  { %2019 = vrot.lane.b32.xlu0 %v8968_v25, %s3780_s1  ;;  %v9088_v25 = vld [vmem:[#allocation17_spill] sm:$0xff] }
 0x327   :  { %v6613_v62 = vpop.permute.xlu1 %1581 }
 0x328   :  { %9082 = vst [vmem:[#allocation390_spill] sm:$0xff] %v6613_v62  ;;  %v6615_v31 = vpop.permute.xlu0 %1579  ;;  %v9089_v62 = vld [vmem:[#allocation74_spill] sm:$0xff] }
 0x329   :  { %9083 = vst [vmem:[#allocation391_spill] sm:$0xff] %v6615_v31  ;;  %1755 = vrot.lane.b32.xlu1 %v9084_v57, %s3779_s16 }
 0x32a   :  { %1617 = vrot.lane.b32.xlu0 %v6622_v48, %s3778_s29 }
 0x32b   :  { %v6626_v59 = vpop.permute.xlu1 %1585 }
 0x32c   :  { %9086 = vst [vmem:[#allocation392_spill] sm:$0xff] %v6626_v59  ;;  %v6628_v56 = vpop.permute.xlu0 %1583 }
 0x32d   :  { %9087 = vst [vmem:[#allocation393_spill] sm:$0xff] %v6628_v56  ;;  %1757 = vrot.lane.b32.xlu1 %v9088_v25, %s3779_s16 }
 0x32e   :  { %1819 = vrot.lane.b32.xlu0 %v9089_v62, %s3779_s16 }
 0x32f   :  { %v6634_v31 = vpop.permute.xlu1 %1589 }
 0x330   :  { %9090 = vst [vmem:[#allocation17_spill] sm:$0xff] %v6634_v31  ;;  %v6636_v57 = vpop.permute.xlu0 %1587  ;;  %v9094_v31 = vld [vmem:[#allocation106_spill] sm:$0xff] }
 0x331   :  { %9091 = vst [vmem:[#allocation74_spill] sm:$0xff] %v6636_v57  ;;  %1957 = vrot.lane.b32.xlu1 %v4823_v38, %s3780_s1  ;;  %v3692_v38 = vld [vmem:[%s8119_s0] sm:$0xff] }
 0x332   :  { %1821 = vrot.lane.b32.xlu0 %v9092_v60, %s3779_s16  ;;  %v2130_v60 = vsel %vm2129_vm3, %v3692_v38, %v9094_v31  ;;  %v9097_v57 = vld [vmem:[#allocation269_spill] sm:$0xff]  ;;  %v9098_v38 = vld [vmem:[#allocation312_spill] sm:$0xff] }
 0x333   :  { %v1596_v12 = vpop.permute.xlu1 %1595 }
 0x334   :  { %v6642_v59 = vpop.permute.xlu0 %1591 }
 0x335   :  { %9093 = vst [vmem:[#allocation73_spill] sm:$0xff] %v6642_v59  ;;  %1959 = vrot.lane.b32.xlu1 %v4816_v39, %s3780_s1  ;;  %v6656_v39 = vld [vmem:[%s8119_s0 + $0x270] sm:$0xff] }
 0x336   :  { %2021 = vrot.lane.b32.xlu0 %v8973_v8, %s3780_s1  ;;  %9095 = vst [vmem:[#allocation106_spill] sm:$0xff] %v6656_v39  ;;  %v9096_v8 = vld [vmem:[#allocation102_spill] sm:$0xff] }
 0x337   :  { %v1736_v62 = vpop.permute.xlu1 %1735  ;;  %v2195_v59 = vsel %vm2194_vm4, %v2130_v60, %v9096_v8  ;;  %v2131_v60 = vsel %vm2129_vm3, %v3694_v5, %v9099_v46  ;;  %v9100_v8 = vld [vmem:[#allocation20_spill] sm:$0xff] }
 0x338   :  { %v1598_v25 = vpop.permute.xlu0 %1597  ;;  %v2260_v56 = vsel %vm2259_vm5, %v2195_v59, %v9097_v57  ;;  %v9101_v59 = vld [vmem:[#allocation154_spill] sm:$0xff]  ;;  %v9104_v46 = vld [vmem:[#allocation232_spill] sm:$0xff] }
 0x339   :  { %1619 = vrot.lane.b32.xlu1 %v6656_v39, %s3778_s29  ;;  %v2325_v36 = vsel %vm2324_vm6, %v2260_v56, %v9098_v38  ;;  %v3695_v56 = vld [vmem:[%s8119_s0 + $0x1b0] sm:$0xff]  ;;  %v9102_v38 = vld [vmem:[#allocation100_spill] sm:$0xff] }
 0x33a   :  { %2023 = vrot.lane.b32.xlu0 %v8972_v29, %s3780_s1  ;;  %v2390_v29 = vsel %vm2389_vm7, %v2325_v36, %v6192_v19  ;;  %v2162_v57 = vsel %vm2129_vm3, %v3695_v56, %v9101_v59  ;;  %v2196_v39 = vsel %vm2194_vm4, %v2131_v60, %v9102_v38  ;;  %v6689_v19 = vld [vmem:[%s8119_s0 + $0x278] sm:$0xff]  ;;  %v9106_v38 = vld [vmem:[#allocation289_spill] sm:$0xff] }
 0x33b   :  { %v1738_v31 = vpop.permute.xlu1 %1737  ;;  %v2455_v5 = vsel %vm2454_vm8, %v2390_v29, %v6494_v37  ;;  %9103 = vst [vmem:[#allocation102_spill] sm:$0xff] %v6689_v19  ;;  %v2227_v36 = vsel %vm2194_vm4, %v2162_v57, %v9104_v46  ;;  %v9107_v29 = vld [vmem:[#allocation311_spill] sm:$0xff] }
 0x33c   :  { %v1800_v32 = vpop.permute.xlu0 %1799  ;;  %v2520_v60 = vsel %vm2519_vm9, %v2455_v5, %v1736_v62  ;;  %v2292_v37 = vsel %vm2259_vm5, %v2227_v36, %v9106_v38  ;;  %v3697_v62 = vld [vmem:[%s8119_s0 + $0x1b8] sm:$0xff] }
 0x33d   :  { %1759 = vrot.lane.b32.xlu1 %v9100_v8, %s3779_s16  ;;  %v9105_v8 = vld [vmem:[#allocation268_spill] sm:$0xff] }
 0x33e   :  { %1621 = vrot.lane.b32.xlu0 %v6689_v19, %s3778_s29  ;;  %v2261_v56 = vsel %vm2259_vm5, %v2196_v39, %v9105_v8  ;;  %v9108_v19 = vld [vmem:[#allocation346_spill] sm:$0xff]  ;;  %v9109_v39 = vld [vmem:[#allocation19_spill] sm:$0xff]  ;;  %v9110_v5 = vld [vmem:[#allocation152_spill] sm:$0xff] }
 0x33f   :  { %v1938_v59 = vpop.permute.xlu1 %1937  ;;  %v2326_v33 = vsel %vm2324_vm6, %v2261_v56, %v9107_v29  ;;  %v2357_v23 = vsel %vm2324_vm6, %v2292_v37, %v9108_v19  ;;  %v2163_v46 = vsel %vm2129_vm3, %v3697_v62, %v9110_v5 }
 0x340   :  { %v1802_v50 = vpop.permute.xlu0 %1801  ;;  %v2585_v48 = vsel %vm2584_vm10, %v2520_v60, %v1938_v59  ;;  %v2391_v57 = vsel %vm2389_vm7, %v2326_v33, %v6190_v16  ;;  %v2422_v36 = vsel %vm2389_vm7, %v2357_v23, %v6329_v52  ;;  %v9111_v16 = vld [vmem:[#allocation79_spill] sm:$0xff]  ;;  %v9113_v59 = vld [vmem:[#allocation288_spill] sm:$0xff] }
 0x341   :  { %1761 = vrot.lane.b32.xlu1 %v9109_v39, %s3779_s16  ;;  %3532 = vmatprep.mubr.msk.f32.mxu0 %vm2661_vm11, %v2585_v48  ;;  %v2456_v19 = vsel %vm2454_vm8, %v2391_v57, %v6492_v0  ;;  %v9112_v33 = vld [vmem:[#allocation231_spill] sm:$0xff]  ;;  %v2487_v48 = vsel %vm2454_vm8, %v2422_v36, %v1596_v12  ;;  %v9114_v0 = vld [vmem:[#allocation345_spill] sm:$0xff]  ;;  %v9116_v39 = vld [vmem:[#allocation78_spill] sm:$0xff] }
 0x342   :  { %1823 = vrot.lane.b32.xlu0 %v9111_v16, %s3779_s16  ;;  %v2228_v8 = vsel %vm2194_vm4, %v2163_v46, %v9112_v33  ;;  %v2521_v56 = vsel %vm2519_vm9, %v2456_v19, %v1738_v31  ;;  %v2552_v37 = vsel %vm2519_vm9, %v2487_v48, %v1800_v32  ;;  %v9115_v57 = vld [vmem:[#allocation133_spill] sm:$0xff]  ;;  %v9117_v19 = vld [vmem:[#allocation131_spill] sm:$0xff]  ;;  %v9118_v16 = vld [vmem:[#allocation76_spill] sm:$0xff] }
 0x343   :  { %v1940_v60 = vpop.permute.xlu1 %1939  ;;  %v2293_v38 = vsel %vm2259_vm5, %v2228_v8, %v9113_v59  ;;  %v9119_v8 = vld [vmem:[#allocation104_spill] sm:$0xff]  ;;  %v6756_v48 = vld [vmem:[%s8119_s0 + $0x288] sm:$0xff]  ;;  %v9121_v59 = vld [vmem:[#allocation167_spill] sm:$0xff] }
 0x344   :  { %v2586_v52 = vsel %vm2584_vm10, %v2521_v56, %v1940_v60  ;;  %v2002_v23 = vpop.permute.xlu0 %2001  ;;  %v2358_v29 = vsel %vm2324_vm6, %v2293_v38, %v9114_v0  ;;  %v9120_v56 = vld [vmem:[#allocation176_spill] sm:$0xff]  ;;  %v9122_v38 = vld [vmem:[#allocation271_spill] sm:$0xff] }
 0x345   :  { %1961 = vrot.lane.b32.xlu1 %v9115_v57, %s3780_s1  ;;  %3533 = vmatmul.mubr.msk.f32.vlgmr.msra.gmra.mxu0 %vm2661_vm11, %v2586_v52  ;;  %v2617_v12 = vsel %vm2584_vm10, %v2552_v37, %v2002_v23  ;;  %v2423_v31 = vsel %vm2389_vm7, %v2358_v29, %v6327_v58  ;;  %v9123_v23 = vld [vmem:[#allocation314_spill] sm:$0xff]  ;;  %v3700_v57 = vld [vmem:[%s8119_s0 + $0x20] sm:$0xff] }
 0x346   :  { %1825 = vrot.lane.b32.xlu0 %v9116_v39, %s3779_s16  ;;  %3580 = vmatprep.mubr.msk.f32.mxu1 %vm2661_vm11, %v2617_v12  ;;  %v2488_v32 = vsel %vm2454_vm8, %v2423_v31, %v1598_v25  ;;  %v3698_v25 = vld [vmem:[%s8119_s0 + $0x18] sm:$0xff] }
 0x347   :  { %v1600_v62 = vpop.permute.xlu1 %1599  ;;  %v2553_v5 = vsel %vm2519_vm9, %v2488_v32, %v1802_v50  ;;  %v2132_v50 = vsel %vm2129_vm3, %v3698_v25, %v9119_v8  ;;  %v9124_v12 = vld [vmem:[#allocation108_spill] sm:$0xff]  ;;  %v9125_v32 = vld [vmem:[#allocation22_spill] sm:$0xff] }
 0x348   :  { %v2004_v46 = vpop.permute.xlu0 %2003  ;;  %v2197_v60 = vsel %vm2194_vm4, %v2132_v50, %v9120_v56  ;;  %v2133_v31 = vsel %vm2129_vm3, %v3700_v57, %v9124_v12  ;;  %v9128_v8 = vld [vmem:[#allocation236_spill] sm:$0xff]  ;;  %v9129_v56 = vld [vmem:[#allocation270_spill] sm:$0xff] }
 0x349   :  { %v2618_v36 = vsel %vm2584_vm10, %v2553_v5, %v2004_v46  ;;  %1963 = vrot.lane.b32.xlu1 %v9117_v19, %s3780_s1  ;;  %v2262_v37 = vsel %vm2259_vm5, %v2197_v60, %v9122_v38  ;;  %v3701_v5 = vld [vmem:[%s8119_s0 + $0x1c8] sm:$0xff] }
 0x34a   :  { %2025 = vrot.lane.b32.xlu0 %v9118_v16, %s3780_s1  ;;  %3581 = vmatmul.mubr.msk.f32.vlgmr.msra.gmra.mxu1 %vm2661_vm11, %v2618_v36  ;;  %v2327_v0 = vsel %vm2324_vm6, %v2262_v37, %v9123_v23  ;;  %v9126_v46 = vld [vmem:[#allocation158_spill] sm:$0xff]  ;;  %v9130_v37 = vld [vmem:[#allocation291_spill] sm:$0xff]  ;;  %v9131_v23 = vld [vmem:[#allocation313_spill] sm:$0xff] }
 0x34b   :  { %v1740_v58 = vpop.permute.xlu1 %1739  ;;  %v2392_v39 = vsel %vm2389_vm7, %v2327_v0, %v6203_v20  ;;  %v2164_v36 = vsel %vm2129_vm3, %v3701_v5, %v9126_v46  ;;  %v9127_v19 = vld [vmem:[#allocation174_spill] sm:$0xff]  ;;  %v6789_v20 = vld [vmem:[%s8119_s0 + $0x290] sm:$0xff]  ;;  %v9133_v5 = vld [vmem:[#allocation21_spill] sm:$0xff] }
 0x34c   :  { %v1602_v33 = vpop.permute.xlu0 %1601  ;;  %v2198_v16 = vsel %vm2194_vm4, %v2133_v31, %v9127_v19  ;;  %v2457_v25 = vsel %vm2454_vm8, %v2392_v39, %v6502_v3  ;;  %v2229_v50 = vsel %vm2194_vm4, %v2164_v36, %v9128_v8  ;;  %v9132_v31 = vld [vmem:[#allocation348_spill] sm:$0xff] }
 0x34d   :  { %1623 = vrot.lane.b32.xlu1 %v6756_v48, %s3778_s29  ;;  %v2263_v60 = vsel %vm2259_vm5, %v2198_v16, %v9129_v56  ;;  %v2294_v3 = vsel %vm2259_vm5, %v2229_v50, %v9130_v37  ;;  %v9134_v46 = vld [vmem:[#allocation156_spill] sm:$0xff] }
 0x34e   :  { %2027 = vrot.lane.b32.xlu0 %v9121_v59, %s3780_s1  ;;  %v2522_v59 = vsel %vm2519_vm9, %v2457_v25, %v1740_v58  ;;  %v2328_v0 = vsel %vm2324_vm6, %v2263_v60, %v9131_v23  ;;  %v2359_v39 = vsel %vm2324_vm6, %v2294_v3, %v9132_v31  ;;  %v3703_v58 = vld [vmem:[%s8119_s0 + $0x1d0] sm:$0xff] }
 0x34f   :  { %v1742_v52 = vpop.permute.xlu1 %1741  ;;  %v2165_v36 = vsel %vm2129_vm3, %v3703_v58, %v9134_v46  ;;  %v2424_v19 = vsel %vm2389_vm7, %v2359_v39, %v6340_v9  ;;  %v9136_v25 = vld [vmem:[#allocation235_spill] sm:$0xff]  ;;  %v9142_v46 = vld [vmem:[#allocation81_spill] sm:$0xff] }
 0x350   :  { %v1804_v29 = vpop.permute.xlu0 %1803  ;;  %v2230_v8 = vsel %vm2194_vm4, %v2165_v36, %v9136_v25  ;;  %v2489_v50 = vsel %vm2454_vm8, %v2424_v19, %v1600_v62  ;;  %v9141_v58 = vld [vmem:[#allocation135_spill] sm:$0xff]  ;;  %v9143_v19 = vld [vmem:[#allocation114_spill] sm:$0xff] }
 0x351   :  { %1763 = vrot.lane.b32.xlu1 %v9125_v32, %s3779_s16  ;;  %v2393_v32 = vsel %vm2389_vm7, %v2328_v0, %v6201_v26  ;;  %v9135_v26 = vld [vmem:[#allocation84_spill] sm:$0xff]  ;;  %v2554_v37 = vsel %vm2519_vm9, %v2489_v50, %v1804_v29  ;;  %v9146_v50 = vld [vmem:[#allocation273_spill] sm:$0xff] }
 0x352   :  { %1625 = vrot.lane.b32.xlu0 %v6789_v20, %s3778_s29  ;;  %v2458_v16 = vsel %vm2454_vm8, %v2393_v32, %v6500_v44  ;;  %v9138_v44 = vld [vmem:[#allocation347_spill] sm:$0xff] }
 0x353   :  { %v1942_v38 = vpop.permute.xlu1 %1941  ;;  %v2523_v56 = vsel %vm2519_vm9, %v2458_v16, %v1742_v52  ;;  %v9140_v52 = vld [vmem:[#allocation83_spill] sm:$0xff]  ;;  %v6856_v16 = vld [vmem:[%s8119_s0 + $0x2a0] sm:$0xff] }
 0x354   :  { %v2587_v57 = vsel %vm2584_vm10, %v2522_v59, %v1942_v38  ;;  %v1806_v12 = vpop.permute.xlu0 %1805  ;;  %v9137_v59 = vld [vmem:[#allocation290_spill] sm:$0xff] }
 0x355   :  { %1765 = vrot.lane.b32.xlu1 %v9133_v5, %s3779_s16  ;;  %3535 = vmatprep.mubr.msk.f32.mxu0 %vm2661_vm11, %v2587_v57  ;;  %v2295_v38 = vsel %vm2259_vm5, %v2230_v8, %v9137_v59  ;;  %v9139_v57 = vld [vmem:[#allocation137_spill] sm:$0xff]  ;;  %v9145_v8 = vld [vmem:[#allocation168_spill] sm:$0xff]  ;;  %v9147_v59 = vld [vmem:[#allocation318_spill] sm:$0xff] }
 0x356   :  { %1827 = vrot.lane.b32.xlu0 %v9135_v26, %s3779_s16  ;;  %v2360_v23 = vsel %vm2324_vm6, %v2295_v38, %v9138_v44  ;;  %v9144_v26 = vld [vmem:[#allocation180_spill] sm:$0xff] }
 0x357   :  { %v1944_v60 = vpop.permute.xlu1 %1943  ;;  %v2425_v62 = vsel %vm2389_vm7, %v2360_v23, %v6338_v21 }
 0x358   :  { %v2588_v9 = vsel %vm2584_vm10, %v2523_v56, %v1944_v60  ;;  %v2006_v3 = vpop.permute.xlu0 %2005  ;;  %v2490_v29 = vsel %vm2454_vm8, %v2425_v62, %v1602_v33  ;;  %v3704_v33 = vld [vmem:[%s8119_s0 + $0x30] sm:$0xff]  ;;  %v9150_v62 = vld [vmem:[#allocation34_spill] sm:$0xff] }
 0x359   :  { %v2619_v0 = vsel %vm2584_vm10, %v2554_v37, %v2006_v3  ;;  %1965 = vrot.lane.b32.xlu1 %v9139_v57, %s3780_s1  ;;  %3536 = vmatmul.mubr.msk.f32.gmra.mxu0 %vm2661_vm11, %v2588_v9  ;;  %v2555_v39 = vsel %vm2519_vm9, %v2490_v29, %v1806_v12  ;;  %v2134_v12 = vsel %vm2129_vm3, %v3704_v33, %v9143_v19  ;;  %v3706_v9 = vld [vmem:[%s8119_s0 + $0x38] sm:$0xff]  ;;  %v3707_v57 = vld [vmem:[%s8119_s0 + $0x1e0] sm:$0xff]  ;;  %v9151_v29 = vld [vmem:[#allocation178_spill] sm:$0xff] }
 0x35a   :  { %1829 = vrot.lane.b32.xlu0 %v9140_v52, %s3779_s16  ;;  %3583 = vmatprep.mubr.msk.f32.mxu1 %vm2661_vm11, %v2619_v0  ;;  %v2199_v25 = vsel %vm2194_vm4, %v2134_v12, %v9144_v26  ;;  %v9148_v3 = vld [vmem:[#allocation112_spill] sm:$0xff]  ;;  %v2166_v52 = vsel %vm2129_vm3, %v3707_v57, %v9150_v62  ;;  %v9154_v26 = vld [vmem:[#allocation295_spill] sm:$0xff] }
 0x35b   :  { %v1604_v31 = vpop.permute.xlu1 %1603  ;;  %v2264_v56 = vsel %vm2259_vm5, %v2199_v25, %v9146_v50  ;;  %v2135_v44 = vsel %vm2129_vm3, %v3706_v9, %v9148_v3  ;;  %v9149_v0 = vld [vmem:[#allocation24_spill] sm:$0xff]  ;;  %v9157_v3 = vld [vmem:[#allocation23_spill] sm:$0xff] }
 0x35c   :  { %v2008_v32 = vpop.permute.xlu0 %2007  ;;  %v2329_v38 = vsel %vm2324_vm6, %v2264_v56, %v9147_v59  ;;  %v9155_v25 = vld [vmem:[#allocation316_spill] sm:$0xff]  ;;  %v9160_v62 = vld [vmem:[#allocation239_spill] sm:$0xff] }
 0x35d   :  { %v2620_v5 = vsel %vm2584_vm10, %v2555_v39, %v2008_v32  ;;  %1967 = vrot.lane.b32.xlu1 %v9141_v58, %s3780_s1  ;;  %v2394_v23 = vsel %vm2389_vm7, %v2329_v38, %v6217_v17  ;;  %v2200_v39 = vsel %vm2194_vm4, %v2135_v44, %v9151_v29  ;;  %v6889_v17 = vld [vmem:[%s8119_s0 + $0x2a8] sm:$0xff]  ;;  %v9156_v59 = vld [vmem:[#allocation352_spill] sm:$0xff]  ;;  %v9158_v44 = vld [vmem:[#allocation33_spill] sm:$0xff] }
 0x35e   :  { %2029 = vrot.lane.b32.xlu0 %v9142_v46, %s3780_s1  ;;  %3584 = vmatmul.mubr.msk.f32.gmra.mxu1 %vm2661_vm11, %v2620_v5  ;;  %v2459_v32 = vsel %vm2454_vm8, %v2394_v23, %v6515_v14  ;;  %v9152_v5 = vld [vmem:[#allocation240_spill] sm:$0xff] }
 0x35f   :  { %v1744_v21 = vpop.permute.xlu1 %1743  ;;  %v2231_v58 = vsel %vm2194_vm4, %v2166_v52, %v9152_v5  ;;  %v9153_v46 = vld [vmem:[#allocation272_spill] sm:$0xff]  ;;  %v9161_v5 = vld [vmem:[#allocation293_spill] sm:$0xff] }
 0x360   :  { %v1606_v36 = vpop.permute.xlu0 %1605  ;;  %v2265_v33 = vsel %vm2259_vm5, %v2200_v39, %v9153_v46  ;;  %v2524_v19 = vsel %vm2519_vm9, %v2459_v32, %v1744_v21  ;;  %v2296_v14 = vsel %vm2259_vm5, %v2231_v58, %v9154_v26  ;;  %v3709_v21 = vld [vmem:[%s8119_s0 + $0x1e8] sm:$0xff]  ;;  %v9163_v26 = vld [vmem:[#allocation141_spill] sm:$0xff] }
 0x361   :  { %1627 = vrot.lane.b32.xlu1 %v6856_v16, %s3778_s29  ;;  %v2361_v38 = vsel %vm2324_vm6, %v2296_v14, %v9156_v59  ;;  %v2167_v23 = vsel %vm2129_vm3, %v3709_v21, %v9158_v44  ;;  %v9165_v59 = vld [vmem:[#allocation139_spill] sm:$0xff]  ;;  %v9168_v44 = vld [vmem:[#allocation169_spill] sm:$0xff] }
 0x362   :  { %2031 = vrot.lane.b32.xlu0 %v9145_v8, %s3780_s1  ;;  %v2330_v8 = vsel %vm2324_vm6, %v2265_v33, %v9155_v25  ;;  %v2232_v52 = vsel %vm2194_vm4, %v2167_v23, %v9160_v62  ;;  %v9169_v23 = vld [vmem:[#allocation275_spill] sm:$0xff] }
 0x363   :  { %v1746_v60 = vpop.permute.xlu1 %1745  ;;  %v2395_v9 = vsel %vm2389_vm7, %v2330_v8, %v6212_v40  ;;  %v9159_v40 = vld [vmem:[#allocation89_spill] sm:$0xff]  ;;  %v2297_v58 = vsel %vm2259_vm5, %v2232_v52, %v9161_v5  ;;  %v9172_v5 = vld [vmem:[#allocation367_spill] sm:$0xff] }
 0x364   :  { %v1808_v37 = vpop.permute.xlu0 %1807  ;;  %v2460_v57 = vsel %vm2454_vm8, %v2395_v9, %v6513_v4  ;;  %v9162_v4 = vld [vmem:[#allocation350_spill] sm:$0xff]  ;;  %v9166_v9 = vld [vmem:[#allocation116_spill] sm:$0xff] }
 0x365   :  { %1767 = vrot.lane.b32.xlu1 %v9149_v0, %s3779_s16  ;;  %v2426_v0 = vsel %vm2389_vm7, %v2361_v38, %v6357_v13  ;;  %v2525_v39 = vsel %vm2519_vm9, %v2460_v57, %v1746_v60  ;;  %v9164_v60 = vld [vmem:[#allocation88_spill] sm:$0xff] }
 0x366   :  { %1629 = vrot.lane.b32.xlu0 %v6889_v17, %s3778_s29  ;;  %v2491_v29 = vsel %vm2454_vm8, %v2426_v0, %v1604_v31 }
 0x367   :  { %v1946_v12 = vpop.permute.xlu1 %1945  ;;  %v2556_v46 = vsel %vm2519_vm9, %v2491_v29, %v1808_v37  ;;  %v3712_v29 = vld [vmem:[%s8119_s0 + $0x50] sm:$0xff] }
 0x368   :  { %v2589_v50 = vsel %vm2584_vm10, %v2524_v19, %v1946_v12  ;;  %v1810_v56 = vpop.permute.xlu0 %1809  ;;  %v2362_v19 = vsel %vm2324_vm6, %v2297_v58, %v9162_v4  ;;  %v9175_v4 = vld [vmem:[#allocation181_spill] sm:$0xff] }
 0x369   :  { %1769 = vrot.lane.b32.xlu1 %v9157_v3, %s3779_s16  ;;  %3538 = vmatprep.mubr.msk.f32.mxu0 %vm2661_vm11, %v2589_v50  ;;  %v2427_v31 = vsel %vm2389_vm7, %v2362_v19, %v6352_v6  ;;  %v6956_v3 = vld [vmem:[%s8119_s0 + $0x2b8] sm:$0xff] }
 0x36a   :  { %1831 = vrot.lane.b32.xlu0 %v9159_v40, %s3779_s16  ;;  %v2492_v37 = vsel %vm2454_vm8, %v2427_v31, %v1606_v36  ;;  %v3710_v36 = vld [vmem:[%s8119_s0 + $0x48] sm:$0xff]  ;;  %v9170_v40 = vld [vmem:[#allocation320_spill] sm:$0xff] }
 0x36b   :  { %v1948_v32 = vpop.permute.xlu1 %1947  ;;  %v2557_v25 = vsel %vm2519_vm9, %v2492_v37, %v1810_v56  ;;  %v2136_v56 = vsel %vm2129_vm3, %v3710_v36, %v9166_v9  ;;  %v9176_v31 = vld [vmem:[#allocation242_spill] sm:$0xff] }
 0x36c   :  { %v2590_v13 = vsel %vm2584_vm10, %v2525_v39, %v1948_v32  ;;  %v2010_v33 = vpop.permute.xlu0 %2009  ;;  %v9171_v39 = vld [vmem:[#allocation115_spill] sm:$0xff]  ;;  %v9177_v37 = vld [vmem:[#allocation274_spill] sm:$0xff] }
 0x36d   :  { %v2621_v12 = vsel %vm2584_vm10, %v2556_v46, %v2010_v33  ;;  %1969 = vrot.lane.b32.xlu1 %v9163_v26, %s3780_s1  ;;  %3539 = vmatmul.mubr.msk.f32.gmra.mxu0 %vm2661_vm11, %v2590_v13  ;;  %v2137_v32 = vsel %vm2129_vm3, %v3712_v29, %v9171_v39  ;;  %v9173_v46 = vld [vmem:[#allocation26_spill] sm:$0xff]  ;;  %v6987_v26 = vld [vmem:[%s8119_s0 + $0x2c0] sm:$0xff] }
 0x36e   :  { %1833 = vrot.lane.b32.xlu0 %v9164_v60, %s3779_s16  ;;  %3586 = vmatprep.mubr.msk.f32.mxu1 %vm2661_vm11, %v2621_v12  ;;  %v9174_v13 = vld [vmem:[#allocation38_spill] sm:$0xff]  ;;  %v2202_v19 = vsel %vm2194_vm4, %v2137_v32, %v9175_v4  ;;  %v9185_v32 = vld [vmem:[#allocation241_spill] sm:$0xff] }
 0x36f   :  { %v1608_v14 = vpop.permute.xlu1 %1607  ;;  %v2168_v33 = vsel %vm2129_vm3, %v6407_v10, %v9174_v13  ;;  %v2267_v10 = vsel %vm2259_vm5, %v2202_v19, %v9177_v37  ;;  %v9184_v39 = vld [vmem:[#allocation94_spill] sm:$0xff] }
 0x370   :  { %v2012_v8 = vpop.permute.xlu0 %2011  ;;  %v2233_v60 = vsel %vm2194_vm4, %v2168_v33, %v9176_v31  ;;  %v9186_v33 = vld [vmem:[#allocation296_spill] sm:$0xff] }
 0x371   :  { %v2622_v50 = vsel %vm2584_vm10, %v2557_v25, %v2012_v8  ;;  %1971 = vrot.lane.b32.xlu1 %v9165_v59, %s3780_s1  ;;  %v9179_v59 = vld [vmem:[#allocation319_spill] sm:$0xff] }
 0x372   :  { %2033 = vrot.lane.b32.xlu0 %v8985_v63, %s3780_s1  ;;  %3587 = vmatmul.mubr.msk.f32.gmra.mxu1 %vm2661_vm11, %v2622_v50  ;;  %v9167_v63 = vld [vmem:[#allocation182_spill] sm:$0xff]  ;;  %v9178_v50 = vld [vmem:[#allocation297_spill] sm:$0xff]  ;;  %v2332_v36 = vsel %vm2324_vm6, %v2267_v10, %v9179_v59 }
 0x373   :  { %v1748_v6 = vpop.permute.xlu1 %1747  ;;  %v2201_v21 = vsel %vm2194_vm4, %v2136_v56, %v9167_v63  ;;  %v9180_v63 = vld [vmem:[#allocation354_spill] sm:$0xff] }
 0x374   :  { %v1610_v38 = vpop.permute.xlu0 %1609  ;;  %v2266_v0 = vsel %vm2259_vm5, %v2201_v21, %v9169_v23 }
 0x375   :  { %1631 = vrot.lane.b32.xlu1 %v6956_v3, %s3778_s29  ;;  %v2331_v62 = vsel %vm2324_vm6, %v2266_v0, %v9170_v40  ;;  %v9182_v0 = vld [vmem:[#allocation25_spill] sm:$0xff] }
 0x376   :  { %2035 = vrot.lane.b32.xlu0 %v9168_v44, %s3780_s1  ;;  %v2396_v58 = vsel %vm2389_vm7, %v2331_v62, %v9172_v5  ;;  %v9181_v44 = vld [vmem:[#allocation366_spill] sm:$0xff] }
 0x377   :  { %v1750_v57 = vpop.permute.xlu1 %1749  ;;  %v2461_v12 = vsel %vm2454_vm8, %v2396_v58, %v6528_v49  ;;  %v2298_v49 = vsel %vm2259_vm5, %v2233_v60, %v9178_v50  ;;  %v2397_v23 = vsel %vm2389_vm7, %v2332_v36, %v9181_v44  ;;  %v9188_v60 = vld [vmem:[#allocation145_spill] sm:$0xff]  ;;  %v9190_v50 = vld [vmem:[#allocation143_spill] sm:$0xff]  ;;  %v9192_v36 = vld [vmem:[#allocation118_spill] sm:$0xff] }
 0x378   :  { %v1812_v52 = vpop.permute.xlu0 %1811  ;;  %v2526_v25 = vsel %vm2519_vm9, %v2461_v12, %v1748_v6  ;;  %v2363_v21 = vsel %vm2324_vm6, %v2298_v49, %v9180_v63  ;;  %v9183_v6 = vld [vmem:[#allocation37_spill] sm:$0xff]  ;;  %v2462_v29 = vsel %vm2454_vm8, %v2397_v23, %v6526_v45  ;;  %v9191_v49 = vld [vmem:[#allocation91_spill] sm:$0xff]  ;;  %v9193_v63 = vld [vmem:[#allocation184_spill] sm:$0xff] }
 0x379   :  { %1771 = vrot.lane.b32.xlu1 %v9173_v46, %s3779_s16  ;;  %v2169_v40 = vsel %vm2129_vm3, %v6422_v27, %v9183_v6  ;;  %v2428_v62 = vsel %vm2389_vm7, %v2363_v21, %v6370_v47  ;;  %v2527_v46 = vsel %vm2519_vm9, %v2462_v29, %v1750_v57  ;;  %v9187_v45 = vld [vmem:[#allocation353_spill] sm:$0xff]  ;;  %v9194_v44 = vld [vmem:[#allocation170_spill] sm:$0xff] }
 0x37a   :  { %1633 = vrot.lane.b32.xlu0 %v6987_v26, %s3778_s29  ;;  %v2234_v5 = vsel %vm2194_vm4, %v2169_v40, %v9185_v32  ;;  %v2493_v58 = vsel %vm2454_vm8, %v2428_v62, %v1608_v14  ;;  %v9189_v57 = vld [vmem:[#allocation93_spill] sm:$0xff]  ;;  %v9196_v40 = vld [vmem:[#allocation322_spill] sm:$0xff] }
 0x37b   :  { %v1950_v8 = vpop.permute.xlu1 %1949  ;;  %v2299_v27 = vsel %vm2259_vm5, %v2234_v5, %v9186_v33  ;;  %v2558_v4 = vsel %vm2519_vm9, %v2493_v58, %v1812_v52  ;;  %v9195_v23 = vld [vmem:[#allocation5_spill] sm:$0xff]  ;;  %v9198_v58 = vld [vmem:[#allocation186_spill] sm:$0xff] }
 0x37c   :  { %v2591_v9 = vsel %vm2584_vm10, %v2526_v25, %v1950_v8  ;;  %v1814_v56 = vpop.permute.xlu0 %1813  ;;  %v2364_v12 = vsel %vm2324_vm6, %v2299_v27, %v9187_v45  ;;  %v9197_v32 = vld [vmem:[#allocation117_spill] sm:$0xff]  ;;  %v9200_v33 = vld [vmem:[#allocation42_spill] sm:$0xff]  ;;  %v7083_v45 = vld [vmem:[%s8119_s0 + $0x2d8] sm:$0xff] }
 0x37d   :  { %1773 = vrot.lane.b32.xlu1 %v9182_v0, %s3779_s16  ;;  %3541 = vmatprep.mubr.msk.f32.mxu0 %vm2661_vm11, %v2591_v9  ;;  %v2429_v14 = vsel %vm2389_vm7, %v2364_v12, %v6368_v15  ;;  %v2170_v27 = vsel %vm2129_vm3, %v6457_v1, %v9200_v33  ;;  %v9202_v12 = vld [vmem:[#allocation244_spill] sm:$0xff] }
 0x37e   :  { %1835 = vrot.lane.b32.xlu0 %v9184_v39, %s3779_s16  ;;  %v2494_v52 = vsel %vm2454_vm8, %v2429_v14, %v1610_v38  ;;  %v3714_v38 = vld [vmem:[%s8119_s0 + $0x60] sm:$0xff]  ;;  %v3716_v39 = vld [vmem:[%s8119_s0 + $0x68] sm:$0xff] }
 0x37f   :  { %v1952_v13 = vpop.permute.xlu1 %1951  ;;  %v2559_v10 = vsel %vm2519_vm9, %v2494_v52, %v1814_v56  ;;  %v2138_v9 = vsel %vm2129_vm3, %v3714_v38, %v9192_v36  ;;  %v7052_v56 = vld [vmem:[%s8119_s0 + $0x2d0] sm:$0xff]  ;;  %v2139_v5 = vsel %vm2129_vm3, %v3716_v39, %v9197_v32  ;;  %v9204_v52 = vld [vmem:[#allocation44_spill] sm:$0xff]  ;;  %v9207_v36 = vld [vmem:[#allocation185_spill] sm:$0xff] }
 0x380   :  { %v2592_v47 = vsel %vm2584_vm10, %v2527_v46, %v1952_v13  ;;  %v2014_v19 = vpop.permute.xlu0 %2013  ;;  %v2203_v21 = vsel %vm2194_vm4, %v2138_v9, %v9193_v63  ;;  %v9199_v13 = vld [vmem:[#allocation28_spill] sm:$0xff]  ;;  %v9208_v63 = vld [vmem:[#allocation27_spill] sm:$0xff] }
 0x381   :  { %v2623_v31 = vsel %vm2584_vm10, %v2558_v4, %v2014_v19  ;;  %1973 = vrot.lane.b32.xlu1 %v9188_v60, %s3780_s1  ;;  %3542 = vmatmul.mubr.msk.f32.gmra.mxu0 %vm2661_vm11, %v2592_v47  ;;  %v2268_v0 = vsel %vm2259_vm5, %v2203_v21, %v9195_v23  ;;  %v9201_v4 = vld [vmem:[#allocation183_spill] sm:$0xff]  ;;  %v9203_v60 = vld [vmem:[#allocation6_spill] sm:$0xff] }
 0x382   :  { %1837 = vrot.lane.b32.xlu0 %v9189_v57, %s3779_s16  ;;  %3589 = vmatprep.mubr.msk.f32.mxu1 %vm2661_vm11, %v2623_v31  ;;  %v2333_v62 = vsel %vm2324_vm6, %v2268_v0, %v9196_v40  ;;  %v2204_v47 = vsel %vm2194_vm4, %v2139_v5, %v9201_v4  ;;  %v2235_v31 = vsel %vm2194_vm4, %v2170_v27, %v9202_v12  ;;  %v9210_v0 = vld [vmem:[#allocation99_spill] sm:$0xff]  ;;  %v9214_v4 = vld [vmem:[#allocation149_spill] sm:$0xff] }
 0x383   :  { %v1612_v37 = vpop.permute.xlu1 %1611  ;;  %v2398_v46 = vsel %vm2389_vm7, %v2333_v62, %v9198_v58  ;;  %v2269_v1 = vsel %vm2259_vm5, %v2204_v47, %v9203_v60  ;;  %v9211_v40 = vld [vmem:[#allocation243_spill] sm:$0xff] }
 0x384   :  { %v2016_v25 = vpop.permute.xlu0 %2015  ;;  %v2463_v19 = vsel %vm2454_vm8, %v2398_v46, %v6536_v61  ;;  %v2300_v61 = vsel %vm2259_vm5, %v2235_v31, %v9204_v52  ;;  %v9212_v58 = vld [vmem:[#allocation43_spill] sm:$0xff] }
 0x385   :  { %v2624_v8 = vsel %vm2584_vm10, %v2559_v10, %v2016_v25  ;;  %1975 = vrot.lane.b32.xlu1 %v9190_v50, %s3780_s1  ;;  %v9205_v10 = vld [vmem:[#allocation321_spill] sm:$0xff]  ;;  %v9216_v60 = vld [vmem:[#allocation147_spill] sm:$0xff] }
 0x386   :  { %2037 = vrot.lane.b32.xlu0 %v9191_v49, %s3780_s1  ;;  %3590 = vmatmul.mubr.msk.f32.gmra.mxu1 %vm2661_vm11, %v2624_v8  ;;  %v2334_v25 = vsel %vm2324_vm6, %v2269_v1, %v9205_v10  ;;  %v9206_v49 = vld [vmem:[#allocation41_spill] sm:$0xff]  ;;  %v9217_v1 = vld [vmem:[#allocation96_spill] sm:$0xff] }
 0x387   :  { %v1752_v15 = vpop.permute.xlu1 %1751  ;;  %v2365_v38 = vsel %vm2324_vm6, %v2300_v61, %v9206_v49  ;;  %v2399_v9 = vsel %vm2389_vm7, %v2334_v25, %v9207_v36  ;;  %v7148_v61 = vld [vmem:[%s8119_s0 + $0x2e8] sm:$0xff]  ;;  %v9219_v10 = vld [vmem:[#allocation188_spill] sm:$0xff] }
 0x388   :  { %v1614_v59 = vpop.permute.xlu0 %1613  ;;  %v2528_v14 = vsel %vm2519_vm9, %v2463_v19, %v1752_v15  ;;  %v9209_v15 = vld [vmem:[#allocation40_spill] sm:$0xff]  ;;  %v2464_v23 = vsel %vm2454_vm8, %v2399_v9, %v6534_v24  ;;  %v9213_v24 = vld [vmem:[#allocation39_spill] sm:$0xff] }
 0x389   :  { %1635 = vrot.lane.b32.xlu1 %v7052_v56, %s3778_s29  ;;  %v2171_v21 = vsel %vm2129_vm3, %v6472_v28, %v9209_v15  ;;  %v9222_v36 = vld [vmem:[#allocation324_spill] sm:$0xff]  ;;  %v3720_v15 = vld [vmem:[%s8119_s0 + $0x80] sm:$0xff] }
 0x38a   :  { %2039 = vrot.lane.b32.xlu0 %v9194_v44, %s3780_s1  ;;  %v2430_v44 = vsel %vm2389_vm7, %v2365_v38, %v6378_v34  ;;  %v2236_v62 = vsel %vm2194_vm4, %v2171_v21, %v9211_v40  ;;  %v9223_v21 = vld [vmem:[#allocation119_spill] sm:$0xff]  ;;  %v9225_v40 = vld [vmem:[#allocation30_spill] sm:$0xff] }
 0x38b   :  { %v1754_v6 = vpop.permute.xlu1 %1753  ;;  %v2495_v39 = vsel %vm2454_vm8, %v2430_v44, %v1612_v37  ;;  %v2301_v28 = vsel %vm2259_vm5, %v2236_v62, %v9212_v58  ;;  %v2141_v44 = vsel %vm2129_vm3, %v3720_v15, %v9223_v21  ;;  %v9226_v62 = vld [vmem:[#allocation47_spill] sm:$0xff] }
 0x38c   :  { %v1816_v29 = vpop.permute.xlu0 %1815  ;;  %v2529_v32 = vsel %vm2519_vm9, %v2464_v23, %v1754_v6  ;;  %v2366_v33 = vsel %vm2324_vm6, %v2301_v28, %v9213_v24  ;;  %v9215_v6 = vld [vmem:[#allocation98_spill] sm:$0xff]  ;;  %v7179_v28 = vld [vmem:[%s8119_s0 + $0x2f0] sm:$0xff] }
 0x38d   :  { %1775 = vrot.lane.b32.xlu1 %v9199_v13, %s3779_s16  ;;  %v2560_v46 = vsel %vm2519_vm9, %v2495_v39, %v1816_v29  ;;  %v2431_v37 = vsel %vm2389_vm7, %v2366_v33, %v6376_v54  ;;  %v9224_v23 = vld [vmem:[#allocation190_spill] sm:$0xff]  ;;  %v2172_v39 = vsel %vm2129_vm3, %v6507_v11, %v9226_v62 }
 0x38e   :  { %1637 = vrot.lane.b32.xlu0 %v7083_v45, %s3778_s29  ;;  %v2496_v29 = vsel %vm2454_vm8, %v2431_v37, %v1614_v59  ;;  %v3718_v59 = vld [vmem:[%s8119_s0 + $0x78] sm:$0xff] }
 0x38f   :  { %v1954_v57 = vpop.permute.xlu1 %1953 }
 0x390   :  { %v2593_v8 = vsel %vm2584_vm10, %v2528_v14, %v1954_v57  ;;  %v1818_v50 = vpop.permute.xlu0 %1817  ;;  %v9218_v57 = vld [vmem:[#allocation120_spill] sm:$0xff] }
 0x391   :  { %1777 = vrot.lane.b32.xlu1 %v9208_v63, %s3779_s16  ;;  %3544 = vmatprep.mubr.msk.f32.mxu0 %vm2661_vm11, %v2593_v8  ;;  %v2561_v19 = vsel %vm2519_vm9, %v2496_v29, %v1818_v50  ;;  %v2140_v52 = vsel %vm2129_vm3, %v3718_v59, %v9218_v57  ;;  %v9220_v8 = vld [vmem:[#allocation171_spill] sm:$0xff]  ;;  %v9221_v50 = vld [vmem:[#allocation8_spill] sm:$0xff] }
 0x392   :  { %1839 = vrot.lane.b32.xlu0 %v9210_v0, %s3779_s16  ;;  %v2205_v25 = vsel %vm2194_vm4, %v2140_v52, %v9219_v10  ;;  %v9236_v10 = vld [vmem:[#allocation105_spill] sm:$0xff] }
 0x393   :  { %v1956_v5 = vpop.permute.xlu1 %1955  ;;  %v2270_v49 = vsel %vm2259_vm5, %v2205_v25, %v9221_v50  ;;  %v9237_v25 = vld [vmem:[#allocation246_spill] sm:$0xff] }
 0x394   :  { %v2594_v34 = vsel %vm2584_vm10, %v2529_v32, %v1956_v5  ;;  %v2018_v13 = vpop.permute.xlu0 %2017  ;;  %v2335_v9 = vsel %vm2324_vm6, %v2270_v49, %v9222_v36  ;;  %v9227_v32 = vld [vmem:[#allocation187_spill] sm:$0xff] }
 0x395   :  { %v2625_v27 = vsel %vm2584_vm10, %v2560_v46, %v2018_v13  ;;  %1977 = vrot.lane.b32.xlu1 %v9214_v4, %s3780_s1  ;;  %3545 = vmatmul.mubr.msk.f32.gmra.mxu0 %vm2661_vm11, %v2594_v34  ;;  %v2400_v0 = vsel %vm2389_vm7, %v2335_v9, %v9224_v23  ;;  %v2206_v5 = vsel %vm2194_vm4, %v2141_v44, %v9227_v32  ;;  %v9228_v46 = vld [vmem:[#allocation247_spill] sm:$0xff]  ;;  %v9238_v9 = vld [vmem:[#allocation48_spill] sm:$0xff] }
 0x396   :  { %1841 = vrot.lane.b32.xlu0 %v9215_v6, %s3779_s16  ;;  %3592 = vmatprep.mubr.msk.f32.mxu1 %vm2661_vm11, %v2625_v27  ;;  %v2465_v58 = vsel %vm2454_vm8, %v2400_v0, %v6544_v2  ;;  %v2237_v34 = vsel %vm2194_vm4, %v2172_v39, %v9228_v46  ;;  %v9229_v13 = vld [vmem:[#allocation7_spill] sm:$0xff]  ;;  %v9230_v27 = vld [vmem:[#allocation49_spill] sm:$0xff] }
 0x397   :  { %v1616_v47 = vpop.permute.xlu1 %1615  ;;  %v2271_v11 = vsel %vm2259_vm5, %v2206_v5, %v9229_v13  ;;  %v2302_v2 = vsel %vm2259_vm5, %v2237_v34, %v9230_v27  ;;  %v9231_v4 = vld [vmem:[#allocation323_spill] sm:$0xff]  ;;  %v9240_v0 = vld [vmem:[#allocation153_spill] sm:$0xff]  ;;  %v9244_v34 = vld [vmem:[#allocation122_spill] sm:$0xff] }
 0x398   :  { %v2020_v12 = vpop.permute.xlu0 %2019  ;;  %v2336_v37 = vsel %vm2324_vm6, %v2271_v11, %v9231_v4  ;;  %v9242_v5 = vld [vmem:[#allocation151_spill] sm:$0xff]  ;;  %v7244_v11 = vld [vmem:[%s8119_s0 + $0x300] sm:$0xff]  ;;  %v9246_v27 = vld [vmem:[#allocation172_spill] sm:$0xff] }
 0x399   :  { %v2626_v31 = vsel %vm2584_vm10, %v2561_v19, %v2020_v12  ;;  %1979 = vrot.lane.b32.xlu1 %v9216_v60, %s3780_s1  ;;  %v9232_v19 = vld [vmem:[#allocation46_spill] sm:$0xff] }
 0x39a   :  { %2041 = vrot.lane.b32.xlu0 %v9217_v1, %s3780_s1  ;;  %3593 = vmatmul.mubr.msk.f32.gmra.mxu1 %vm2661_vm11, %v2626_v31  ;;  %v2367_v12 = vsel %vm2324_vm6, %v2302_v2, %v9232_v19  ;;  %v9233_v31 = vld [vmem:[#allocation189_spill] sm:$0xff]  ;;  %v9247_v2 = vld [vmem:[#allocation10_spill] sm:$0xff] }
 0x39b   :  { %v1756_v54 = vpop.permute.xlu1 %1755  ;;  %v2401_v60 = vsel %vm2389_vm7, %v2336_v37, %v9233_v31  ;;  %v9234_v1 = vld [vmem:[#allocation29_spill] sm:$0xff]  ;;  %v2432_v57 = vsel %vm2389_vm7, %v2367_v12, %v6386_v41  ;;  %v3724_v12 = vld [vmem:[%s8119_s0 + $0x98] sm:$0xff] }
 0x39c   :  { %v1618_v14 = vpop.permute.xlu0 %1617  ;;  %v2530_v24 = vsel %vm2519_vm9, %v2465_v58, %v1756_v54  ;;  %v9235_v54 = vld [vmem:[#allocation45_spill] sm:$0xff]  ;;  %v2466_v52 = vsel %vm2454_vm8, %v2401_v60, %v6542_v51  ;;  %v2497_v50 = vsel %vm2454_vm8, %v2432_v57, %v1616_v47  ;;  %v9252_v57 = vld [vmem:[#allocation52_spill] sm:$0xff] }
 0x39d   :  { %1639 = vrot.lane.b32.xlu1 %v7148_v61, %s3778_s29  ;;  %v2173_v59 = vsel %vm2129_vm3, %v6522_v7, %v9235_v54  ;;  %v9239_v51 = vld [vmem:[#allocation161_spill] sm:$0xff] }
 0x39e   :  { %2043 = vrot.lane.b32.xlu0 %v9220_v8, %s3780_s1  ;;  %v2238_v8 = vsel %vm2194_vm4, %v2173_v59, %v9237_v25  ;;  %v9243_v58 = vld [vmem:[#allocation101_spill] sm:$0xff]  ;;  %v9251_v59 = vld [vmem:[#allocation32_spill] sm:$0xff] }
 0x39f   :  { %v1758_v38 = vpop.permute.xlu1 %1757  ;;  %v2303_v7 = vsel %vm2259_vm5, %v2238_v8, %v9238_v9  ;;  %v9249_v31 = vld [vmem:[#allocation121_spill] sm:$0xff] }
 0x3a0   :  { %v1820_v63 = vpop.permute.xlu0 %1819  ;;  %v2531_v49 = vsel %vm2519_vm9, %v2466_v52, %v1758_v38  ;;  %v2368_v44 = vsel %vm2324_vm6, %v2303_v7, %v9239_v51  ;;  %v9241_v38 = vld [vmem:[#allocation103_spill] sm:$0xff]  ;;  %v2143_v60 = vsel %vm2129_vm3, %v3724_v12, %v9249_v31  ;;  %v2174_v52 = vsel %vm2129_vm3, %v6557_v22, %v9252_v57  ;;  %v9255_v9 = vld [vmem:[#allocation9_spill] sm:$0xff] }
 0x3a1   :  { %1779 = vrot.lane.b32.xlu1 %v9225_v40, %s3779_s16  ;;  %v2562_v15 = vsel %vm2519_vm9, %v2497_v50, %v1820_v63  ;;  %v2433_v47 = vsel %vm2389_vm7, %v2368_v44, %v6384_v53  ;;  %v3725_v50 = vld [vmem:[%s8119_s0 + $0x308] sm:$0xff]  ;;  %v9257_v51 = vld [vmem:[#allocation325_spill] sm:$0xff]  ;;  %v9269_v57 = vld [vmem:[#allocation175_spill] sm:$0xff] }
 0x3a2   :  { %1641 = vrot.lane.b32.xlu0 %v7179_v28, %s3778_s29  ;;  %v2498_v63 = vsel %vm2454_vm8, %v2433_v47, %v1618_v14  ;;  %v3722_v14 = vld [vmem:[%s8119_s0 + $0x90] sm:$0xff]  ;;  %v9266_v12 = vld [vmem:[#allocation157_spill] sm:$0xff] }
 0x3a3   :  { %v1958_v33 = vpop.permute.xlu1 %1957  ;;  %v2142_v13 = vsel %vm2129_vm3, %v3722_v14, %v9244_v34  ;;  %v9263_v14 = vld [vmem:[#allocation248_spill] sm:$0xff] }
 0x3a4   :  { %v2595_v6 = vsel %vm2584_vm10, %v2530_v24, %v1958_v33  ;;  %v1822_v29 = vpop.permute.xlu0 %1821  ;;  %v9245_v24 = vld [vmem:[#allocation192_spill] sm:$0xff] }
 0x3a5   :  { %1781 = vrot.lane.b32.xlu1 %v9234_v1, %s3779_s16  ;;  %3547 = vmatprep.mubr.msk.f32.mxu0 %vm2661_vm11, %v2595_v6  ;;  %v2563_v62 = vsel %vm2519_vm9, %v2498_v63, %v1822_v29  ;;  %v2207_v33 = vsel %vm2194_vm4, %v2142_v13, %v9245_v24  ;;  %v9248_v6 = vld [vmem:[#allocation326_spill] sm:$0xff] }
 0x3a6   :  { %1843 = vrot.lane.b32.xlu0 %v9236_v10, %s3779_s16  ;;  %v2272_v4 = vsel %vm2259_vm5, %v2207_v33, %v9247_v2  ;;  %v9250_v1 = vld [vmem:[#allocation194_spill] sm:$0xff]  ;;  %v9253_v10 = vld [vmem:[#allocation191_spill] sm:$0xff] }
 0x3a7   :  { %v1960_v36 = vpop.permute.xlu1 %1959  ;;  %v2337_v29 = vsel %vm2324_vm6, %v2272_v4, %v9248_v6  ;;  %v2208_v25 = vsel %vm2194_vm4, %v2143_v60, %v9253_v10  ;;  %v9270_v10 = vld [vmem:[#allocation124_spill] sm:$0xff] }
 0x3a8   :  { %v2596_v41 = vsel %vm2584_vm10, %v2531_v49, %v1960_v36  ;;  %v2022_v21 = vpop.permute.xlu0 %2021  ;;  %v2402_v54 = vsel %vm2389_vm7, %v2337_v29, %v9250_v1  ;;  %v9254_v49 = vld [vmem:[#allocation249_spill] sm:$0xff]  ;;  %v2273_v7 = vsel %vm2259_vm5, %v2208_v25, %v9255_v9  ;;  %v9273_v9 = vld [vmem:[#allocation12_spill] sm:$0xff] }
 0x3a9   :  { %v2627_v23 = vsel %vm2584_vm10, %v2562_v15, %v2022_v21  ;;  %1981 = vrot.lane.b32.xlu1 %v9240_v0, %s3780_s1  ;;  %3548 = vmatmul.mubr.msk.f32.gmra.mxu0 %vm2661_vm11, %v2596_v41  ;;  %v2467_v8 = vsel %vm2454_vm8, %v2402_v54, %v6552_v42  ;;  %v2239_v36 = vsel %vm2194_vm4, %v2174_v52, %v9254_v49  ;;  %v9256_v41 = vld [vmem:[#allocation54_spill] sm:$0xff]  ;;  %v9258_v0 = vld [vmem:[#allocation51_spill] sm:$0xff] }
 0x3aa   :  { %1845 = vrot.lane.b32.xlu0 %v9241_v38, %s3779_s16  ;;  %3595 = vmatprep.mubr.msk.f32.mxu1 %vm2661_vm11, %v2627_v23  ;;  %v2304_v21 = vsel %vm2259_vm5, %v2239_v36, %v9256_v41  ;;  %v2338_v42 = vsel %vm2324_vm6, %v2273_v7, %v9257_v51  ;;  %v9259_v38 = vld [vmem:[#allocation193_spill] sm:$0xff]  ;;  %v3728_v51 = vld [vmem:[%s8119_s0 + $0xb0] sm:$0xff] }
 0x3ab   :  { %v1620_v40 = vpop.permute.xlu1 %1619  ;;  %v2369_v47 = vsel %vm2324_vm6, %v2304_v21, %v9258_v0  ;;  %v2403_v63 = vsel %vm2389_vm7, %v2338_v42, %v9259_v38  ;;  %v9272_v36 = vld [vmem:[#allocation173_spill] sm:$0xff]  ;;  %v9275_v42 = vld [vmem:[#allocation123_spill] sm:$0xff] }
 0x3ac   :  { %v2024_v39 = vpop.permute.xlu0 %2023  ;;  %v9278_v38 = vld [vmem:[#allocation57_spill] sm:$0xff] }
 0x3ad   :  { %v2628_v32 = vsel %vm2584_vm10, %v2563_v62, %v2024_v39  ;;  %1983 = vrot.lane.b32.xlu1 %v9242_v5, %s3780_s1  ;;  %v9260_v62 = vld [vmem:[#allocation31_spill] sm:$0xff]  ;;  %v9261_v39 = vld [vmem:[#allocation50_spill] sm:$0xff]  ;;  %v2434_v5 = vsel %vm2389_vm7, %v2369_v47, %v6394_v35  ;;  %v9277_v47 = vld [vmem:[#allocation36_spill] sm:$0xff] }
 0x3ae   :  { %2045 = vrot.lane.b32.xlu0 %v9243_v58, %s3780_s1  ;;  %3596 = vmatmul.mubr.msk.f32.gmra.mxu1 %vm2661_vm11, %v2628_v32  ;;  %v2175_v32 = vsel %vm2129_vm3, %v6572_v55, %v9261_v39  ;;  %v2468_v58 = vsel %vm2454_vm8, %v2403_v63, %v6550_v43  ;;  %v2499_v13 = vsel %vm2454_vm8, %v2434_v5, %v1620_v40  ;;  %v9265_v43 = vld [vmem:[#allocation162_spill] sm:$0xff] }
 0x3af   :  { %v1760_v53 = vpop.permute.xlu1 %1759  ;;  %v2240_v34 = vsel %vm2194_vm4, %v2175_v32, %v9263_v14  ;;  %v2176_v63 = vsel %vm2129_vm3, %v6607_v30, %v9278_v38  ;;  %v9280_v32 = vld [vmem:[#allocation382_spill] sm:$0xff] }
 0x3b0   :  { %v1622_v46 = vpop.permute.xlu0 %1621  ;;  %v2532_v22 = vsel %vm2519_vm9, %v2467_v8, %v1760_v53  ;;  %v9262_v53 = vld [vmem:[#allocation109_spill] sm:$0xff]  ;;  %v7337_v8 = vld [vmem:[%s8119_s0 + $0x318] sm:$0xff] }
 0x3b1   :  { %1643 = vrot.lane.b32.xlu1 %v7244_v11, %s3778_s29 }
 0x3b2   :  { %2047 = vrot.lane.b32.xlu0 %v9246_v27, %s3780_s1  ;;  %v9264_v27 = vld [vmem:[#allocation53_spill] sm:$0xff] }
 0x3b3   :  { %v1762_v37 = vpop.permute.xlu1 %1761  ;;  %v2305_v55 = vsel %vm2259_vm5, %v2240_v34, %v9264_v27  ;;  %v9282_v34 = vld [vmem:[#allocation11_spill] sm:$0xff] }
 0x3b4   :  { %v1824_v19 = vpop.permute.xlu0 %1823  ;;  %v2533_v24 = vsel %vm2519_vm9, %v2468_v58, %v1762_v37  ;;  %v2370_v6 = vsel %vm2324_vm6, %v2305_v55, %v9265_v43  ;;  %v9267_v37 = vld [vmem:[#allocation107_spill] sm:$0xff]  ;;  %v7368_v58 = vld [vmem:[%s8119_s0 + $0x320] sm:$0xff]  ;;  %v9285_v43 = vld [vmem:[#allocation56_spill] sm:$0xff] }
 0x3b5   :  { %1783 = vrot.lane.b32.xlu1 %v9251_v59, %s3779_s16  ;;  %v2564_v2 = vsel %vm2519_vm9, %v2499_v13, %v1824_v19  ;;  %v2435_v40 = vsel %vm2389_vm7, %v2370_v6, %v6392_v18  ;;  %v9268_v59 = vld [vmem:[#allocation155_spill] sm:$0xff] }
 0x3b6   :  { %1645 = vrot.lane.b32.xlu0 %v3725_v50, %s3778_s29  ;;  %v2500_v19 = vsel %vm2454_vm8, %v2435_v40, %v1622_v46  ;;  %v3726_v46 = vld [vmem:[%s8119_s0 + $0xa8] sm:$0xff]  ;;  %v9271_v50 = vld [vmem:[#allocation196_spill] sm:$0xff]  ;;  %v9284_v55 = vld [vmem:[#allocation327_spill] sm:$0xff] }
 0x3b7   :  { %v1962_v15 = vpop.permute.xlu1 %1961  ;;  %v2144_v25 = vsel %vm2129_vm3, %v3726_v46, %v9270_v10  ;;  %v9287_v40 = vld [vmem:[#allocation35_spill] sm:$0xff]  ;;  %v9293_v46 = vld [vmem:[#allocation250_spill] sm:$0xff] }
 0x3b8   :  { %v2597_v44 = vsel %vm2584_vm10, %v2532_v22, %v1962_v15  ;;  %v1826_v23 = vpop.permute.xlu0 %1825  ;;  %v2209_v49 = vsel %vm2194_vm4, %v2144_v25, %v9271_v50  ;;  %v9274_v15 = vld [vmem:[#allocation328_spill] sm:$0xff] }
 0x3b9   :  { %1785 = vrot.lane.b32.xlu1 %v9260_v62, %s3779_s16  ;;  %3550 = vmatprep.mubr.msk.f32.mxu0 %vm2661_vm11, %v2597_v44  ;;  %v2565_v60 = vsel %vm2519_vm9, %v2500_v19, %v1826_v23  ;;  %v2274_v7 = vsel %vm2259_vm5, %v2209_v49, %v9273_v9  ;;  %v2145_v44 = vsel %vm2129_vm3, %v3728_v51, %v9275_v42  ;;  %v9276_v23 = vld [vmem:[#allocation198_spill] sm:$0xff]  ;;  %v9279_v62 = vld [vmem:[#allocation195_spill] sm:$0xff] }
 0x3ba   :  { %1847 = vrot.lane.b32.xlu0 %v9262_v53, %s3779_s16  ;;  %v2339_v41 = vsel %vm2324_vm6, %v2274_v7, %v9274_v15  ;;  %v2210_v39 = vsel %vm2194_vm4, %v2145_v44, %v9279_v62  ;;  %v9281_v53 = vld [vmem:[#allocation251_spill] sm:$0xff]  ;;  %v9289_v19 = vld [vmem:[#allocation18_spill] sm:$0xff] }
 0x3bb   :  { %v1964_v33 = vpop.permute.xlu1 %1963  ;;  %v2404_v0 = vsel %vm2389_vm7, %v2339_v41, %v9276_v23  ;;  %v2241_v14 = vsel %vm2194_vm4, %v2176_v63, %v9281_v53  ;;  %v2275_v30 = vsel %vm2259_vm5, %v2210_v39, %v9282_v34  ;;  %v9295_v51 = vld [vmem:[#allocation163_spill] sm:$0xff]  ;;  %v9296_v23 = vld [vmem:[#allocation160_spill] sm:$0xff] }
 0x3bc   :  { %v2598_v35 = vsel %vm2584_vm10, %v2533_v24, %v1964_v33  ;;  %v2026_v4 = vpop.permute.xlu0 %2025  ;;  %v2469_v5 = vsel %vm2454_vm8, %v2404_v0, %v9280_v32  ;;  %v9283_v33 = vld [vmem:[#allocation59_spill] sm:$0xff] }
 0x3bd   :  { %v2629_v29 = vsel %vm2584_vm10, %v2564_v2, %v2026_v4  ;;  %1985 = vrot.lane.b32.xlu1 %v9266_v12, %s3780_s1  ;;  %3551 = vmatmul.mubr.msk.f32.gmra.mxu0 %vm2661_vm11, %v2598_v35  ;;  %v2306_v27 = vsel %vm2259_vm5, %v2241_v14, %v9283_v33  ;;  %v2340_v2 = vsel %vm2324_vm6, %v2275_v30, %v9284_v55  ;;  %v9298_v0 = vld [vmem:[#allocation111_spill] sm:$0xff]  ;;  %v9301_v14 = vld [vmem:[#allocation126_spill] sm:$0xff]  ;;  %v9303_v33 = vld [vmem:[#allocation177_spill] sm:$0xff] }
 0x3be   :  { %1849 = vrot.lane.b32.xlu0 %v9267_v37, %s3779_s16  ;;  %3598 = vmatprep.mubr.msk.f32.mxu1 %vm2661_vm11, %v2629_v29  ;;  %v2371_v6 = vsel %vm2324_vm6, %v2306_v27, %v9285_v43  ;;  %v9286_v29 = vld [vmem:[#allocation197_spill] sm:$0xff]  ;;  %v9288_v37 = vld [vmem:[#allocation55_spill] sm:$0xff]  ;;  %v9304_v27 = vld [vmem:[#allocation14_spill] sm:$0xff] }
 0x3bf   :  { %v1624_v31 = vpop.permute.xlu1 %1623  ;;  %v2405_v12 = vsel %vm2389_vm7, %v2340_v2, %v9286_v29  ;;  %v9299_v39 = vld [vmem:[#allocation159_spill] sm:$0xff]  ;;  %v9306_v29 = vld [vmem:[#allocation125_spill] sm:$0xff] }
 0x3c0   :  { %v2028_v1 = vpop.permute.xlu0 %2027  ;;  %v9300_v32 = vld [vmem:[#allocation179_spill] sm:$0xff] }
 0x3c1   :  { %v2630_v54 = vsel %vm2584_vm10, %v2565_v60, %v2028_v1  ;;  %1987 = vrot.lane.b32.xlu1 %v9268_v59, %s3780_s1  ;;  %v2177_v60 = vsel %vm2129_vm3, %v9289_v19, %v9288_v37  ;;  %v9290_v1 = vld [vmem:[#allocation234_spill] sm:$0xff]  ;;  %v9291_v59 = vld [vmem:[#allocation381_spill] sm:$0xff]  ;;  %v3731_v30 = vld [vmem:[%s8119_s0 + $0x330] sm:$0xff] }
 0x3c2   :  { %2049 = vrot.lane.b32.xlu0 %v9269_v57, %s3780_s1  ;;  %3599 = vmatmul.mubr.msk.f32.gmra.mxu1 %vm2661_vm11, %v2630_v54  ;;  %v2436_v54 = vsel %vm2389_vm7, %v2371_v6, %v9290_v1  ;;  %v2470_v57 = vsel %vm2454_vm8, %v2405_v12, %v9291_v59  ;;  %v2242_v10 = vsel %vm2194_vm4, %v2177_v60, %v9293_v46  ;;  %v3732_v6 = vld [vmem:[%s8119_s0 + $0xc8] sm:$0xff]  ;;  %v9311_v59 = vld [vmem:[#allocation199_spill] sm:$0xff] }
 0x3c3   :  { %v1764_v18 = vpop.permute.xlu1 %1763  ;;  %v2501_v25 = vsel %vm2454_vm8, %v2436_v54, %v1624_v31  ;;  %v9297_v31 = vld [vmem:[#allocation233_spill] sm:$0xff]  ;;  %v2147_v12 = vsel %vm2129_vm3, %v3732_v6, %v9306_v29  ;;  %v9308_v19 = vld [vmem:[#allocation294_spill] sm:$0xff] }
 0x3c4   :  { %v1626_v52 = vpop.permute.xlu0 %1625  ;;  %v2534_v13 = vsel %vm2519_vm9, %v2469_v5, %v1764_v18  ;;  %v9292_v18 = vld [vmem:[#allocation113_spill] sm:$0xff]  ;;  %v9309_v60 = vld [vmem:[#allocation62_spill] sm:$0xff] }
 0x3c5   :  { %1647 = vrot.lane.b32.xlu1 %v7337_v8, %s3778_s29  ;;  %v9310_v1 = vld [vmem:[#allocation106_spill] sm:$0xff] }
 0x3c6   :  { %2051 = vrot.lane.b32.xlu0 %v9272_v36, %s3780_s1  ;;  %v9294_v36 = vld [vmem:[#allocation58_spill] sm:$0xff]  ;;  %v2178_v54 = vsel %vm2129_vm3, %v9310_v1, %v9309_v60  ;;  %v9330_v60 = vld [vmem:[#allocation315_spill] sm:$0xff] }
 0x3c7   :  { %v1766_v22 = vpop.permute.xlu1 %1765  ;;  %v2307_v9 = vsel %vm2259_vm5, %v2242_v10, %v9294_v36  ;;  %v3733_v10 = vld [vmem:[%s8119_s0 + $0x338] sm:$0xff] }
 0x3c8   :  { %v1828_v21 = vpop.permute.xlu0 %1827  ;;  %v2535_v50 = vsel %vm2519_vm9, %v2470_v57, %v1766_v22  ;;  %v2372_v42 = vsel %vm2324_vm6, %v2307_v9, %v9295_v51  ;;  %v2212_v57 = vsel %vm2194_vm4, %v2147_v12, %v9311_v59  ;;  %v9316_v51 = vld [vmem:[#allocation329_spill] sm:$0xff]  ;;  %v9327_v12 = vld [vmem:[#allocation164_spill] sm:$0xff] }
 0x3c9   :  { %1787 = vrot.lane.b32.xlu1 %v9277_v47, %s3779_s16  ;;  %v2566_v7 = vsel %vm2519_vm9, %v2501_v25, %v1828_v21  ;;  %v2437_v22 = vsel %vm2389_vm7, %v2372_v42, %v9297_v31  ;;  %v9313_v25 = vld [vmem:[#allocation253_spill] sm:$0xff] }
 0x3ca   :  { %1649 = vrot.lane.b32.xlu0 %v7368_v58, %s3778_s29  ;;  %v2502_v21 = vsel %vm2454_vm8, %v2437_v22, %v1626_v52  ;;  %v3730_v52 = vld [vmem:[%s8119_s0 + $0xc0] sm:$0xff] }
 0x3cb   :  { %v1966_v24 = vpop.permute.xlu1 %1965  ;;  %v2146_v34 = vsel %vm2129_vm3, %v3730_v52, %v9301_v14  ;;  %v9317_v31 = vld [vmem:[#allocation61_spill] sm:$0xff]  ;;  %v9323_v52 = vld [vmem:[#allocation383_spill] sm:$0xff] }
 0x3cc   :  { %v2599_v35 = vsel %vm2584_vm10, %v2534_v13, %v1966_v24  ;;  %v1830_v4 = vpop.permute.xlu0 %1829  ;;  %v9302_v13 = vld [vmem:[#allocation200_spill] sm:$0xff] }
 0x3cd   :  { %1789 = vrot.lane.b32.xlu1 %v9287_v40, %s3779_s16  ;;  %3553 = vmatprep.mubr.msk.f32.mxu0 %vm2661_vm11, %v2599_v35  ;;  %v2567_v38 = vsel %vm2519_vm9, %v2502_v21, %v1830_v4  ;;  %v2211_v24 = vsel %vm2194_vm4, %v2146_v34, %v9302_v13  ;;  %v9305_v35 = vld [vmem:[#allocation330_spill] sm:$0xff]  ;;  %v9324_v34 = vld [vmem:[#allocation317_spill] sm:$0xff] }
 0x3ce   :  { %1851 = vrot.lane.b32.xlu0 %v9292_v18, %s3779_s16  ;;  %v2276_v55 = vsel %vm2259_vm5, %v2211_v24, %v9304_v27  ;;  %v9307_v40 = vld [vmem:[#allocation202_spill] sm:$0xff]  ;;  %v9312_v18 = vld [vmem:[#allocation384_spill] sm:$0xff] }
 0x3cf   :  { %v1968_v49 = vpop.permute.xlu1 %1967  ;;  %v2341_v4 = vsel %vm2324_vm6, %v2276_v55, %v9305_v35  ;;  %v9326_v55 = vld [vmem:[#allocation63_spill] sm:$0xff] }
 0x3d0   :  { %v2600_v15 = vsel %vm2584_vm10, %v2535_v50, %v1968_v49  ;;  %v2030_v41 = vpop.permute.xlu0 %2029  ;;  %v2406_v37 = vsel %vm2389_vm7, %v2341_v4, %v9307_v40  ;;  %v2243_v50 = vsel %vm2194_vm4, %v2178_v54, %v9313_v25  ;;  %v9314_v49 = vld [vmem:[#allocation13_spill] sm:$0xff]  ;;  %v7523_v25 = vld [vmem:[%s8119_s0 + $0x350] sm:$0xff] }
 0x3d1   :  { %v2631_v44 = vsel %vm2584_vm10, %v2566_v7, %v2030_v41  ;;  %1989 = vrot.lane.b32.xlu1 %v9296_v23, %s3780_s1  ;;  %3554 = vmatmul.mubr.msk.f32.gmra.mxu0 %vm2661_vm11, %v2600_v15  ;;  %v2471_v46 = vsel %vm2454_vm8, %v2406_v37, %v9312_v18  ;;  %v2277_v36 = vsel %vm2259_vm5, %v2212_v57, %v9314_v49  ;;  %v9315_v15 = vld [vmem:[#allocation64_spill] sm:$0xff]  ;;  %v9331_v18 = vld [vmem:[#allocation349_spill] sm:$0xff] }
 0x3d2   :  { %1853 = vrot.lane.b32.xlu0 %v9298_v0, %s3779_s16  ;;  %3601 = vmatprep.mubr.msk.f32.mxu1 %vm2661_vm11, %v2631_v44  ;;  %v2308_v41 = vsel %vm2259_vm5, %v2243_v50, %v9315_v15  ;;  %v2342_v42 = vsel %vm2324_vm6, %v2277_v36, %v9316_v51  ;;  %v9318_v0 = vld [vmem:[#allocation201_spill] sm:$0xff]  ;;  %v3734_v36 = vld [vmem:[%s8119_s0 + $0xd8] sm:$0xff] }
 0x3d3   :  { %v1628_v47 = vpop.permute.xlu1 %1627  ;;  %v2373_v22 = vsel %vm2324_vm6, %v2308_v41, %v9317_v31  ;;  %v2407_v21 = vsel %vm2389_vm7, %v2342_v42, %v9318_v0  ;;  %v7530_v49 = vld [vmem:[%s8119_s0 + $0x1a0] sm:$0xff]  ;;  %v9334_v15 = vld [vmem:[#allocation204_spill] sm:$0xff] }
 0x3d4   :  { %v2032_v63 = vpop.permute.xlu0 %2031  ;;  %v2472_v14 = vsel %vm2454_vm8, %v2407_v21, %v9323_v52  ;;  %v9335_v42 = vld [vmem:[#allocation364_spill] sm:$0xff] }
 0x3d5   :  { %v2632_v62 = vsel %vm2584_vm10, %v2567_v38, %v2032_v63  ;;  %1991 = vrot.lane.b32.xlu1 %v9299_v39, %s3780_s1  ;;  %v9319_v38 = vld [vmem:[#allocation292_spill] sm:$0xff] }
 0x3d6   :  { %2053 = vrot.lane.b32.xlu0 %v9300_v32, %s3780_s1  ;;  %3602 = vmatmul.mubr.msk.f32.gmra.mxu1 %vm2661_vm11, %v2632_v62  ;;  %v9320_v63 = vld [vmem:[#allocation60_spill] sm:$0xff]  ;;  %v9321_v62 = vld [vmem:[#allocation102_spill] sm:$0xff] }
 0x3d7   :  { %v1768_v5 = vpop.permute.xlu1 %1767  ;;  %v2179_v39 = vsel %vm2129_vm3, %v9321_v62, %v9320_v63  ;;  %v9322_v32 = vld [vmem:[#allocation238_spill] sm:$0xff]  ;;  %v7557_v63 = vld [vmem:[%s8119_s0 + $0x358] sm:$0x3]  ;;  %v3736_v62 = vld [vmem:[%s8119_s0 + $0xe0] sm:$0xff] }
 0x3d8   :  { %v1630_v53 = vpop.permute.xlu0 %1629  ;;  %v2536_v9 = vsel %vm2519_vm9, %v2471_v46, %v1768_v5  ;;  %v2438_v5 = vsel %vm2389_vm7, %v2373_v22, %v9322_v32  ;;  %v9332_v46 = vld [vmem:[#allocation365_spill] sm:$0xff]  ;;  %v7550_v22 = vld [vmem:[%s8119_s0 + $0x198] sm:$0xff] }
 0x3d9   :  { %1651 = vrot.lane.b32.xlu1 %v3731_v30, %s3778_s29  ;;  %v9325_v30 = vld [vmem:[#allocation252_spill] sm:$0xff]  ;;  %v2503_v24 = vsel %vm2454_vm8, %v2438_v5, %v1628_v47  ;;  %v9329_v47 = vld [vmem:[#allocation237_spill] sm:$0xff]  ;;  %v1725_v0 = vrot.slane %v7550_v22, 1  ;;  %v9338_v5 = vld [vmem:[#allocation67_spill] sm:$0xff] }
 0x3da   :  { %2055 = vrot.lane.b32.xlu0 %v9303_v33, %s3780_s1  ;;  %v2244_v13 = vsel %vm2194_vm4, %v2179_v39, %v9325_v30  ;;  %v9337_v39 = vld [vmem:[#allocation127_spill] sm:$0xff]  ;;  %v2180_v52 = vsel %vm2129_vm3, %v6756_v48, %v9338_v5 }
 0x3db   :  { %v1770_v2 = vpop.permute.xlu1 %1769  ;;  %v2309_v35 = vsel %vm2259_vm5, %v2244_v13, %v9326_v55  ;;  %v2149_v32 = vsel %vm2129_vm3, %v3736_v62, %v9337_v39  ;;  %v7572_v13 = vld [vmem:[%s8119_s0 + $0x1a8] sm:$0x3]  ;;  %v9343_v48 = vld [vmem:[#allocation15_spill] sm:$0xff] }
 0x3dc   :  { %v1832_v43 = vpop.permute.xlu0 %1831  ;;  %v2537_v33 = vsel %vm2519_vm9, %v2472_v14, %v1770_v2  ;;  %v2374_v40 = vsel %vm2324_vm6, %v2309_v35, %v9327_v12  ;;  %v9339_v14 = vld [vmem:[#allocation332_spill] sm:$0xff]  ;;  %v9342_v35 = vld [vmem:[#allocation206_spill] sm:$0xff] }
 0x3dd   :  { %1791 = vrot.lane.b32.xlu1 %v9308_v19, %s3779_s16  ;;  %v2568_v4 = vsel %vm2519_vm9, %v2503_v24, %v1832_v43  ;;  %v9328_v19 = vld [vmem:[#allocation351_spill] sm:$0xff]  ;;  %v2439_v2 = vsel %vm2389_vm7, %v2374_v40, %v9329_v47 }
 0x3de   :  { %1653 = vrot.lane.b32.xlu0 %v3733_v10, %s3778_s29  ;;  %v2504_v43 = vsel %vm2454_vm8, %v2439_v2, %v1630_v53  ;;  %v7518_v10 = vld [vmem:[%s8119_s0 + $0x348] sm:$0xff]  ;;  %v9340_v24 = vld [vmem:[#allocation203_spill] sm:$0xff] }
 0x3df   :  { %v1970_v7 = vpop.permute.xlu1 %1969  ;;  %v1730_v51 = vrot.slane %v7518_v10, 1  ;;  %v1932_v39 = vrot.slane %v7518_v10, 2 }
 0x3e0   :  { %v2601_v44 = vsel %vm2584_vm10, %v2536_v9, %v1970_v7  ;;  %v1834_v23 = vpop.permute.xlu0 %1833  ;;  %v9333_v9 = vld [vmem:[#allocation128_spill] sm:$0xff] }
 0x3e1   :  { %1793 = vrot.lane.b32.xlu1 %v9319_v38, %s3779_s16  ;;  %3556 = vmatprep.mubr.msk.f32.mxu0 %vm2661_vm11, %v2601_v44  ;;  %v2569_v54 = vsel %vm2519_vm9, %v2504_v43, %v1834_v23  ;;  %v2148_v7 = vsel %vm2129_vm3, %v3734_v36, %v9333_v9  ;;  %v1731_v44 = vrot.slane %v7523_v25, 1  ;;  %v9336_v23 = vld [vmem:[#allocation16_spill] sm:$0xff]  ;;  %v1726_v38 = vrot.slane %v7530_v49, 1  ;;  %v9348_v36 = vld [vmem:[#allocation66_spill] sm:$0xff] }
 0x3e2   :  { %1855 = vrot.lane.b32.xlu0 %v9324_v34, %s3779_s16  ;;  %v2213_v41 = vsel %vm2194_vm4, %v2148_v7, %v9334_v15 }
 0x3e3   :  { %v1972_v27 = vpop.permute.xlu1 %1971  ;;  %v2278_v31 = vsel %vm2259_vm5, %v2213_v41, %v9336_v23  ;;  %v1732_v40 = vsel %vm219_vm0, %v1730_v51, %v1731_v44  ;;  %v1727_v43 = vsel %vm219_vm0, %v1725_v0, %v1726_v38  ;;  %v9349_v41 = vld [vmem:[#allocation254_spill] sm:$0xff]  ;;  %v9350_v51 = vld [vmem:[#allocation205_spill] sm:$0xff]  ;;  %v1927_v23 = vrot.slane %v7550_v22, 2 }
 0x3e4   :  { %v2602_v6 = vsel %vm2584_vm10, %v2537_v33, %v1972_v27  ;;  %v2034_v29 = vpop.permute.xlu0 %2033  ;;  %v2343_v34 = vsel %vm2324_vm6, %v2278_v31, %v9339_v14  ;;  %v2214_v33 = vsel %vm2194_vm4, %v2149_v32, %v9340_v24  ;;  %v9341_v27 = vld [vmem:[#allocation255_spill] sm:$0xff]  ;;  %v9351_v31 = vld [vmem:[#allocation368_spill] sm:$0xff]  ;;  %v9352_v0 = vld [vmem:[#allocation385_spill] sm:$0xff]  ;;  %v1933_v32 = vrot.slane %v7523_v25, 2 }
 0x3e5   :  { %v2633_v37 = vsel %vm2584_vm10, %v2568_v4, %v2034_v29  ;;  %1993 = vrot.lane.b32.xlu1 %v9328_v19, %s3780_s1  ;;  %3557 = vmatmul.mubr.msk.f32.gmra.mxu0 %vm2661_vm11, %v2602_v6  ;;  %v2245_v55 = vsel %vm2194_vm4, %v2180_v52, %v9341_v27  ;;  %v2408_v4 = vsel %vm2389_vm7, %v2343_v34, %v9342_v35  ;;  %v9344_v29 = vld [vmem:[#allocation386_spill] sm:$0xff]  ;;  %v1928_v14 = vrot.slane %v7530_v49, 2  ;;  %v9354_v35 = vld [vmem:[#allocation165_spill] sm:$0xff] }
 0x3e6   :  { %1857 = vrot.lane.b32.xlu0 %v9330_v60, %s3779_s16  ;;  %3604 = vmatprep.mubr.msk.f32.mxu1 %vm2661_vm11, %v2633_v37  ;;  %v2279_v6 = vsel %vm2259_vm5, %v2214_v33, %v9343_v48  ;;  %v2473_v12 = vsel %vm2454_vm8, %v2408_v4, %v9344_v29  ;;  %v1733_v37 = vrot.slane %v7557_v63, 1  ;;  %v9345_v19 = vld [vmem:[#allocation298_spill] sm:$0xff]  ;;  %v9353_v33 = vld [vmem:[#allocation69_spill] sm:$0xff]  ;;  %v1930_v29 = vrot.slane %v7572_v13, 2 }
 0x3e7   :  { %v1632_v1 = vpop.permute.xlu1 %1631  ;;  %v2310_v47 = vsel %vm2259_vm5, %v2245_v55, %v9345_v19 }
 0x3e8   :  { %v2036_v59 = vpop.permute.xlu0 %2035  ;;  %v2375_v9 = vsel %vm2324_vm6, %v2310_v47, %v9348_v36  ;;  %v1734_v5 = vsel %vm219_vm0, %v1731_v44, %v1733_v37  ;;  %v9359_v36 = vld [vmem:[#allocation334_spill] sm:$0xff] }
 0x3e9   :  { %v2634_v57 = vsel %vm2584_vm10, %v2569_v54, %v2036_v59  ;;  %1995 = vrot.lane.b32.xlu1 %v9331_v18, %s3780_s1  ;;  %v1728_v54 = vrot.slane %v7572_v13, 1  ;;  %v9346_v59 = vld [vmem:[#allocation65_spill] sm:$0xff]  ;;  %v9347_v18 = vld [vmem:[#allocation331_spill] sm:$0xff] }
 0x3ea   :  { %2057 = vrot.lane.b32.xlu0 %v9332_v46, %s3780_s1  ;;  %3605 = vmatmul.mubr.msk.f32.gmra.mxu1 %vm2661_vm11, %v2634_v57  ;;  %v2181_v57 = vsel %vm2129_vm3, %v6789_v20, %v9346_v59  ;;  %v2344_v46 = vsel %vm2324_vm6, %v2279_v6, %v9347_v18  ;;  %v2440_v20 = vsel %vm2389_vm7, %v2375_v9, %v9351_v31  ;;  %v3737_v13 = vld [vmem:[%s8119_s0 + $0xf0] sm:$0xff]  ;;  %v9358_v59 = vld [vmem:[#allocation277_spill] sm:$0xff] }
 0x3eb   :  { %v1772_v53 = vpop.permute.xlu1 %1771  ;;  %v2505_v22 = vsel %vm2454_vm8, %v2440_v20, %v1632_v1  ;;  %v1729_v24 = vsel %vm219_vm0, %v1726_v38, %v1728_v54  ;;  %v1934_v38 = vsel %vm572_vm1, %v1932_v39, %v1933_v32  ;;  %v1929_v6 = vsel %vm572_vm1, %v1927_v23, %v1928_v14  ;;  %v9362_v23 = vld [vmem:[#allocation210_spill] sm:$0xff]  ;;  %v9364_v39 = vld [vmem:[#allocation257_spill] sm:$0xff] }
 0x3ec   :  { %v7525_v50 = vpop.permute.xlu0 %1633  ;;  %v2538_v2 = vsel %vm2519_vm9, %v2473_v12, %v1772_v53  ;;  %v2246_v53 = vsel %vm2194_vm4, %v2181_v57, %v9349_v41  ;;  %v9360_v41 = vld [vmem:[#allocation129_spill] sm:$0xff] }
 0x3ed   :  { %1655 = vrot.lane.b32.xlu1 %v7518_v10, %s3778_s29  ;;  %v2311_v27 = vsel %vm2259_vm5, %v2246_v53, %v9353_v33 }
 0x3ee   :  { %2059 = vrot.lane.b32.xlu0 %v9335_v42, %s3780_s1  ;;  %v2409_v42 = vsel %vm2389_vm7, %v2344_v46, %v9350_v51  ;;  %v2376_v44 = vsel %vm2324_vm6, %v2311_v27, %v9354_v35  ;;  %v7662_v46 = vld [vmem:[%s8121_s2] ss:$0 sm:$0xff]  ;;  %v9361_v51 = vld [vmem:[#allocation72_spill] sm:$0xff] }
 0x3ef   :  { %v1774_v21 = vpop.permute.xlu1 %1773  ;;  %v2474_v62 = vsel %vm2454_vm8, %v2409_v42, %v9352_v0  ;;  %v2182_v42 = vsel %vm2129_vm3, %v6856_v16, %v9361_v51  ;;  %v9363_v0 = vld [vmem:[#allocation207_spill] sm:$0xff] }
 0x3f0   :  { %v1836_v30 = vpop.permute.xlu0 %1835  ;;  %v2539_v52 = vsel %vm2519_vm9, %v2474_v62, %v1774_v21 }
 0x3f1   :  { %1657 = vrot.lane.b32.xlu1 %v7523_v25, %s3778_s29  ;;  %v2570_v10 = vsel %vm2519_vm9, %v2505_v22, %v1836_v30  ;;  %v1935_v30 = vrot.slane %v7557_v63, 2 }
 0x3f2   :  { %1593 = vrot.lane.b32.xlu0 %v7530_v49, %s3778_s29  ;;  %v9355_v49 = vld [vmem:[#allocation245_spill] sm:$0xff] }
 0x3f3   :  { %v1974_v60 = vpop.permute.xlu1 %1973  ;;  %v2441_v21 = vsel %vm2389_vm7, %v2376_v44, %v9355_v49  ;;  %v1936_v63 = vsel %vm572_vm1, %v1933_v32, %v1935_v30  ;;  %v2247_v32 = vsel %vm2194_vm4, %v2182_v42, %v9364_v39  ;;  %v9370_v30 = vld [vmem:[#allocation209_spill] sm:$0xff] }
 0x3f4   :  { %v2603_v7 = vsel %vm2584_vm10, %v2538_v2, %v1974_v60  ;;  %v1838_v15 = vpop.permute.xlu0 %1837  ;;  %v2506_v4 = vsel %vm2454_vm8, %v2441_v21, %v7525_v50  ;;  %v1931_v50 = vsel %vm572_vm1, %v1928_v14, %v1930_v29  ;;  %v9356_v2 = vld [vmem:[#allocation130_spill] sm:$0xff]  ;;  %v9366_v14 = vld [vmem:[#allocation276_spill] sm:$0xff]  ;;  %v9369_v21 = vld [vmem:[#allocation71_spill] sm:$0xff] }
 0x3f5   :  { %1859 = vrot.lane.b32.xlu1 %v1732_v40, %s3779_s16  ;;  %3559 = vmatprep.mubr.msk.f32.mxu0 %vm2661_vm11, %v2603_v7  ;;  %v2571_v12 = vsel %vm2519_vm9, %v2506_v4, %v1838_v15  ;;  %v2150_v60 = vsel %vm2129_vm3, %v3737_v13, %v9356_v2  ;;  %v3738_v15 = vld [vmem:[%s8119_s0 + $0xf8] sm:$0xff] }
 0x3f6   :  { %1795 = vrot.lane.b32.xlu0 %v1727_v43, %s3779_s16  ;;  %v9357_v43 = vld [vmem:[#allocation208_spill] sm:$0xff]  ;;  %v2151_v53 = vsel %vm2129_vm3, %v3738_v15, %v9360_v41 }
 0x3f7   :  { %v1976_v34 = vpop.permute.xlu1 %1975  ;;  %v2215_v54 = vsel %vm2194_vm4, %v2150_v60, %v9357_v43  ;;  %v2216_v62 = vsel %vm2194_vm4, %v2151_v53, %v9363_v0  ;;  %v9374_v13 = vld [vmem:[#allocation256_spill] sm:$0xff]  ;;  %v9376_v53 = vld [vmem:[#allocation166_spill] sm:$0xff] }
 0x3f8   :  { %v2604_v25 = vsel %vm2584_vm10, %v2539_v52, %v1976_v34  ;;  %v2038_v55 = vpop.permute.xlu0 %2037  ;;  %v2280_v57 = vsel %vm2259_vm5, %v2215_v54, %v9358_v59  ;;  %v2281_v34 = vsel %vm2259_vm5, %v2216_v62, %v9366_v14  ;;  %v9378_v14 = vld [vmem:[#allocation134_spill] sm:$0xff] }
 0x3f9   :  { %v2635_v1 = vsel %vm2584_vm10, %v2570_v10, %v2038_v55  ;;  %1861 = vrot.lane.b32.xlu1 %v1734_v5, %s3779_s16  ;;  %3560 = vmatmul.mubr.msk.f32.gmra.mxu0 %vm2661_vm11, %v2604_v25  ;;  %v2345_v9 = vsel %vm2324_vm6, %v2280_v57, %v9359_v36  ;;  %v9365_v5 = vld [vmem:[#allocation387_spill] sm:$0xff]  ;;  %v9368_v25 = vld [vmem:[#allocation333_spill] sm:$0xff] }
 0x3fa   :  { %1797 = vrot.lane.b32.xlu0 %v1729_v24, %s3779_s16  ;;  %3607 = vmatprep.mubr.msk.f32.mxu1 %vm2661_vm11, %v2635_v1  ;;  %v2410_v31 = vsel %vm2389_vm7, %v2345_v9, %v9362_v23  ;;  %v9367_v24 = vld [vmem:[#allocation300_spill] sm:$0xff]  ;;  %v2346_v55 = vsel %vm2324_vm6, %v2281_v34, %v9368_v25  ;;  %v9377_v23 = vld [vmem:[#allocation369_spill] sm:$0xff] }
 0x3fb   :  { %v1636_v48 = vpop.permute.xlu1 %1635  ;;  %v2475_v22 = vsel %vm2454_vm8, %v2410_v31, %v9365_v5  ;;  %v2312_v16 = vsel %vm2259_vm5, %v2247_v32, %v9367_v24  ;;  %v2411_v4 = vsel %vm2389_vm7, %v2346_v55, %v9370_v30  ;;  %v9379_v34 = vld [vmem:[#allocation212_spill] sm:$0xff] }
 0x3fc   :  { %v2040_v40 = vpop.permute.xlu0 %2039 }
 0x3fd   :  { %v2636_v37 = vsel %vm2584_vm10, %v2571_v12, %v2040_v40  ;;  %2061 = vrot.lane.b32.xlu1 %v1934_v38, %s3780_s1  ;;  %v2377_v38 = vsel %vm2324_vm6, %v2312_v16, %v9369_v21  ;;  %v9372_v12 = vld [vmem:[#allocation370_spill] sm:$0xff]  ;;  %v9380_v16 = vld [vmem:[#allocation279_spill] sm:$0xff] }
 0x3fe   :  { %1997 = vrot.lane.b32.xlu0 %v1929_v6, %s3780_s1  ;;  %3608 = vmatmul.mubr.msk.f32.gmra.mxu1 %vm2661_vm11, %v2636_v37  ;;  %v9371_v6 = vld [vmem:[#allocation70_spill] sm:$0xff]  ;;  %v2442_v40 = vsel %vm2389_vm7, %v2377_v38, %v9372_v12  ;;  %v9373_v37 = vld [vmem:[#allocation68_spill] sm:$0xff]  ;;  %v9386_v12 = vld [vmem:[#allocation259_spill] sm:$0xff] }
 0x3ff   :  { %v1776_v19 = vpop.permute.xlu1 %1775  ;;  %v2183_v29 = vsel %vm2129_vm3, %v6889_v17, %v9371_v6  ;;  %v2507_v60 = vsel %vm2454_vm8, %v2442_v40, %v1636_v48  ;;  %v9375_v17 = vld [vmem:[#allocation299_spill] sm:$0xff]  ;;  %v9384_v38 = vld [vmem:[#allocation214_spill] sm:$0xff] }
 0x400   :  { %v1638_v47 = vpop.permute.xlu0 %1637  ;;  %v2540_v33 = vsel %vm2519_vm9, %v2475_v22, %v1776_v19  ;;  %v2248_v2 = vsel %vm2194_vm4, %v2183_v29, %v9374_v13  ;;  %v9385_v6 = vld [vmem:[#allocation211_spill] sm:$0xff] }
 0x401   :  { %2063 = vrot.lane.b32.xlu1 %v1936_v63, %s3780_s1  ;;  %v2476_v63 = vsel %vm2454_vm8, %v2411_v4, %v9373_v37  ;;  %v2313_v57 = vsel %vm2259_vm5, %v2248_v2, %v9375_v17  ;;  %v9387_v37 = vld [vmem:[#allocation389_spill] sm:$0xff]  ;;  %v9389_v2 = vld [vmem:[#allocation302_spill] sm:$0xff] }
 0x402   :  { %1999 = vrot.lane.b32.xlu0 %v1931_v50, %s3780_s1  ;;  %v2378_v51 = vsel %vm2324_vm6, %v2313_v57, %v9376_v53 }
 0x403   :  { %v1778_v18 = vpop.permute.xlu1 %1777  ;;  %v2443_v31 = vsel %vm2389_vm7, %v2378_v51, %v9377_v23  ;;  %v9392_v51 = vld [vmem:[#allocation213_spill] sm:$0xff]  ;;  %v9394_v23 = vld [vmem:[#allocation372_spill] sm:$0xff] }
 0x404   :  { %v1840_v7 = vpop.permute.xlu0 %1839  ;;  %v2541_v43 = vsel %vm2519_vm9, %v2476_v63, %v1778_v18 }
 0x405   :  { %v3534_v20 = vpop.f32.mrf.mxu0  ;;  %v2572_v36 = vsel %vm2519_vm9, %v2507_v60, %v1840_v7  ;;  %v2508_v7 = vsel %vm2454_vm8, %v2443_v31, %v1638_v47 }
 0x406   :  { %v2930_v52 = vadd.f32 %v3534_v20, %v7662_v46 }
 0x407   :  { %v1978_v27 = vpop.permute.xlu1 %1977  ;;  %v2924_v10 = vpop.f32.mrf.mxu0 }
 0x408   :  { %v3244_v35 = vmax.f32 %v2930_v52, 0.0  ;;  %v2605_v44 = vsel %vm2584_vm10, %v2540_v33, %v1978_v27  ;;  %v2925_v1 = vadd.f32 %v7662_v46, %v2924_v10  ;;  %v1842_v49 = vpop.permute.xlu0 %1841  ;;  %v3739_v52 = vld [vmem:[%s8119_s0 + $0x108] sm:$0xff]  ;;  %v9381_v10 = vld [vmem:[#allocation336_spill] sm:$0xff] }
 0x409   :  { %3562 = vmatprep.mubr.msk.f32.mxu0 %vm2661_vm11, %v2605_v44  ;;  %v2573_v62 = vsel %vm2519_vm9, %v2508_v7, %v1842_v49  ;;  %v2152_v47 = vsel %vm2129_vm3, %v3739_v52, %v9378_v14  ;;  %v9382_v44 = vld [vmem:[#allocation132_spill] sm:$0xff]  ;;  %v9383_v49 = vld [vmem:[#allocation77_spill] sm:$0xff] }
 0x40a   :  { %3308 = vst [vmem:[#allocation2 + $0x8] sm:$0xff] %v3244_v35  ;;  %v3243_v19 = vmax.f32 %v2925_v1, 0.0  ;;  %v3582_v50 = vpop.f32.mrf.mxu1  ;;  %v2217_v24 = vsel %vm2194_vm4, %v2152_v47, %v9379_v34  ;;  %v3740_v35 = vld [vmem:[%s8119_s0 + $0x110] sm:$0xff]  ;;  %v2184_v21 = vsel %vm2129_vm3, %v6956_v3, %v9383_v49  ;;  %v9395_v7 = vld [vmem:[#allocation388_spill] sm:$0xff] }
 0x40b   :  { %v3090_v54 = vadd.f32 %v3582_v50, %v7662_v46  ;;  %v1980_v59 = vpop.permute.xlu1 %1979  ;;  %v2282_v33 = vsel %vm2259_vm5, %v2217_v24, %v9380_v16  ;;  %v2153_v1 = vsel %vm2129_vm3, %v3740_v35, %v9382_v44  ;;  %v2249_v40 = vsel %vm2194_vm4, %v2184_v21, %v9386_v12  ;;  %v9388_v50 = vld [vmem:[#allocation278_spill] sm:$0xff]  ;;  %v9398_v35 = vld [vmem:[#allocation355_spill] sm:$0xff] }
 0x40c   :  { %3307 = vst [vmem:[#allocation2] sm:$0xff] %v3243_v19  ;;  %v2606_v9 = vsel %vm2584_vm10, %v2541_v43, %v1980_v59  ;;  %v3084_v15 = vpop.f32.mrf.mxu1  ;;  %v2042_v41 = vpop.permute.xlu0 %2041  ;;  %v2347_v25 = vsel %vm2324_vm6, %v2282_v33, %v9381_v10  ;;  %v2218_v29 = vsel %vm2194_vm4, %v2153_v1, %v9385_v6  ;;  %v2314_v3 = vsel %vm2259_vm5, %v2249_v40, %v9389_v2  ;;  %v9390_v59 = vld [vmem:[#allocation335_spill] sm:$0xff] }
 0x40d   :  { %v3276_v42 = vmax.f32 %v3090_v54, 0.0  ;;  %v3085_v48 = vadd.f32 %v7662_v46, %v3084_v15  ;;  %v2637_v18 = vsel %vm2584_vm10, %v2572_v36, %v2042_v41  ;;  %3563 = vmatmul.mubr.msk.f32.gmra.mxu0 %vm2661_vm11, %v2606_v9  ;;  %v2412_v30 = vsel %vm2389_vm7, %v2347_v25, %v9384_v38  ;;  %v9391_v41 = vld [vmem:[#allocation356_spill] sm:$0xff]  ;;  %v9399_v49 = vld [vmem:[#allocation371_spill] sm:$0xff] }
 0x40e   :  { %3610 = vmatprep.mubr.msk.f32.mxu1 %vm2661_vm11, %v2637_v18  ;;  %v2477_v63 = vsel %vm2454_vm8, %v2412_v30, %v9387_v37  ;;  %v2283_v13 = vsel %vm2259_vm5, %v2218_v29, %v9388_v50  ;;  %v2379_v53 = vsel %vm2324_vm6, %v2314_v3, %v9391_v41  ;;  %v3741_v37 = vld [vmem:[%s8119_s0 + $0x120] sm:$0xff] }
 0x40f   :  { %3340 = vst [vmem:[#allocation2 + $0x108] sm:$0xff] %v3276_v42  ;;  %v3275_v20 = vmax.f32 %v3085_v48, 0.0  ;;  %v1640_v0 = vpop.permute.xlu1 %1639  ;;  %v2348_v17 = vsel %vm2324_vm6, %v2283_v13, %v9390_v59  ;;  %v9393_v48 = vld [vmem:[#allocation75_spill] sm:$0xff]  ;;  %v2444_v31 = vsel %vm2389_vm7, %v2379_v53, %v9394_v23  ;;  %v9402_v13 = vld [vmem:[#allocation281_spill] sm:$0xff]  ;;  %v3742_v59 = vld [vmem:[%s8119_s0 + $0x128] sm:$0xff] }
 0x410   :  { %v2044_v39 = vpop.permute.xlu0 %2043  ;;  %v2413_v42 = vsel %vm2389_vm7, %v2348_v17, %v9392_v51  ;;  %v2185_v18 = vsel %vm2129_vm3, %v6987_v26, %v9393_v48  ;;  %v2509_v52 = vsel %vm2454_vm8, %v2444_v31, %v1640_v0  ;;  %v9397_v26 = vld [vmem:[#allocation301_spill] sm:$0xff]  ;;  %v9404_v17 = vld [vmem:[#allocation136_spill] sm:$0xff]  ;;  %v9407_v51 = vld [vmem:[#allocation215_spill] sm:$0xff] }
 0x411   :  { %3339 = vst [vmem:[#allocation2 + $0x100] sm:$0xff] %v3275_v20  ;;  %v2638_v32 = vsel %vm2584_vm10, %v2573_v62, %v2044_v39  ;;  %v2478_v20 = vsel %vm2454_vm8, %v2413_v42, %v9395_v7  ;;  %v9408_v48 = vld [vmem:[#allocation261_spill] sm:$0xff]  ;;  %v9409_v23 = vld [vmem:[#allocation391_spill] sm:$0xff] }
 0x412   :  { %3611 = vmatmul.mubr.msk.f32.gmra.mxu1 %vm2661_vm11, %v2638_v32  ;;  %v9396_v32 = vld [vmem:[#allocation258_spill] sm:$0xff] }
 0x413   :  { %v1780_v5 = vpop.permute.xlu1 %1779 }
 0x414   :  { %v1642_v22 = vpop.permute.xlu0 %1641  ;;  %v2542_v60 = vsel %vm2519_vm9, %v2477_v63, %v1780_v5  ;;  %v2250_v5 = vsel %vm2194_vm4, %v2185_v18, %v9396_v32  ;;  %v9400_v63 = vld [vmem:[#allocation138_spill] sm:$0xff] }
 0x415   :  { %v2315_v24 = vsel %vm2259_vm5, %v2250_v5, %v9397_v26 }
 0x416   :  { %v2380_v44 = vsel %vm2324_vm6, %v2315_v24, %v9398_v35 }
 0x417   :  { %v1782_v27 = vpop.permute.xlu1 %1781  ;;  %v2445_v21 = vsel %vm2389_vm7, %v2380_v44, %v9399_v49  ;;  %v9415_v44 = vld [vmem:[#allocation80_spill] sm:$0xff]  ;;  %v9417_v49 = vld [vmem:[#allocation390_spill] sm:$0xff] }
 0x418   :  { %v1844_v55 = vpop.permute.xlu0 %1843  ;;  %v2543_v14 = vsel %vm2519_vm9, %v2478_v20, %v1782_v27  ;;  %v9410_v20 = vld [vmem:[#allocation280_spill] sm:$0xff] }
 0x419   :  { %v3537_v4 = vpop.f32.mrf.mxu0  ;;  %v2574_v16 = vsel %vm2519_vm9, %v2509_v52, %v1844_v55  ;;  %v2510_v55 = vsel %vm2454_vm8, %v2445_v21, %v1642_v22  ;;  %v2154_v22 = vsel %vm2129_vm3, %v3741_v37, %v9400_v63 }
 0x41a   :  { %v2940_v19 = vadd.f32 %v3537_v4, %v7662_v46 }
 0x41b   :  { %v1982_v43 = vpop.permute.xlu1 %1981  ;;  %v2934_v54 = vpop.f32.mrf.mxu0 }
 0x41c   :  { %v3246_v57 = vmax.f32 %v2940_v19, 0.0  ;;  %v2607_v36 = vsel %vm2584_vm10, %v2542_v60, %v1982_v43  ;;  %v2935_v9 = vadd.f32 %v7662_v46, %v2934_v54  ;;  %v1846_v15 = vpop.permute.xlu0 %1845  ;;  %v9401_v19 = vld [vmem:[#allocation216_spill] sm:$0xff]  ;;  %v9403_v60 = vld [vmem:[#allocation338_spill] sm:$0xff] }
 0x41d   :  { %3565 = vmatprep.mubr.msk.f32.mxu0 %vm2661_vm11, %v2607_v36  ;;  %v2575_v4 = vsel %vm2519_vm9, %v2510_v55, %v1846_v15  ;;  %v2219_v50 = vsel %vm2194_vm4, %v2154_v22, %v9401_v19  ;;  %v9405_v36 = vld [vmem:[#allocation82_spill] sm:$0xff] }
 0x41e   :  { %3310 = vst [vmem:[#allocation2 + $0x18] sm:$0xff] %v3246_v57  ;;  %v3245_v62 = vmax.f32 %v2935_v9, 0.0  ;;  %v3585_v39 = vpop.f32.mrf.mxu1  ;;  %v2284_v2 = vsel %vm2259_vm5, %v2219_v50, %v9402_v13  ;;  %v2155_v57 = vsel %vm2129_vm3, %v3742_v59, %v9404_v17  ;;  %v2186_v9 = vsel %vm2129_vm3, %v7052_v56, %v9405_v36  ;;  %v9406_v15 = vld [vmem:[#allocation218_spill] sm:$0xff]  ;;  %v9421_v17 = vld [vmem:[#allocation373_spill] sm:$0xff] }
 0x41f   :  { %v3100_v47 = vadd.f32 %v3585_v39, %v7662_v46  ;;  %v1984_v34 = vpop.permute.xlu1 %1983  ;;  %v2349_v43 = vsel %vm2324_vm6, %v2284_v2, %v9403_v60  ;;  %v2220_v42 = vsel %vm2194_vm4, %v2155_v57, %v9407_v51  ;;  %v2251_v18 = vsel %vm2194_vm4, %v2186_v9, %v9408_v48  ;;  %v9411_v39 = vld [vmem:[#allocation304_spill] sm:$0xff]  ;;  %v9420_v60 = vld [vmem:[#allocation357_spill] sm:$0xff] }
 0x420   :  { %3309 = vst [vmem:[#allocation2 + $0x10] sm:$0xff] %v3245_v62  ;;  %v2608_v33 = vsel %vm2584_vm10, %v2543_v14, %v1984_v34  ;;  %v3094_v10 = vpop.f32.mrf.mxu1  ;;  %v2046_v25 = vpop.permute.xlu0 %2045  ;;  %v2414_v41 = vsel %vm2389_vm7, %v2349_v43, %v9406_v15  ;;  %v2285_v62 = vsel %vm2259_vm5, %v2220_v42, %v9410_v20  ;;  %v2316_v56 = vsel %vm2259_vm5, %v2251_v18, %v9411_v39  ;;  %v9412_v14 = vld [vmem:[#allocation337_spill] sm:$0xff]  ;;  %v3743_v48 = vld [vmem:[%s8119_s0 + $0x138] sm:$0xff]  ;;  %v9422_v18 = vld [vmem:[#allocation142_spill] sm:$0xff] }
 0x421   :  { %v3278_v1 = vmax.f32 %v3100_v47, 0.0  ;;  %v3095_v0 = vadd.f32 %v7662_v46, %v3094_v10  ;;  %v2639_v27 = vsel %vm2584_vm10, %v2574_v16, %v2046_v25  ;;  %3566 = vmatmul.mubr.msk.f32.gmra.mxu0 %vm2661_vm11, %v2608_v33  ;;  %v2479_v31 = vsel %vm2454_vm8, %v2414_v41, %v9409_v23  ;;  %v9413_v33 = vld [vmem:[#allocation358_spill] sm:$0xff]  ;;  %v9414_v25 = vld [vmem:[#allocation217_spill] sm:$0xff]  ;;  %v9423_v23 = vld [vmem:[#allocation220_spill] sm:$0xff] }
 0x422   :  { %3613 = vmatprep.mubr.msk.f32.mxu1 %vm2661_vm11, %v2639_v27  ;;  %v2350_v47 = vsel %vm2324_vm6, %v2285_v62, %v9412_v14  ;;  %v2381_v10 = vsel %vm2324_vm6, %v2316_v56, %v9413_v33  ;;  %v9425_v39 = vld [vmem:[#allocation340_spill] sm:$0xff]  ;;  %v9429_v33 = vld [vmem:[#allocation219_spill] sm:$0xff] }
 0x423   :  { %3342 = vst [vmem:[#allocation2 + $0x118] sm:$0xff] %v3278_v1  ;;  %v3277_v38 = vmax.f32 %v3095_v0, 0.0  ;;  %v1644_v30 = vpop.permute.xlu1 %1643  ;;  %v2415_v35 = vsel %vm2389_vm7, %v2350_v47, %v9414_v25  ;;  %v2187_v1 = vsel %vm2129_vm3, %v7083_v45, %v9415_v44  ;;  %v9416_v0 = vld [vmem:[#allocation374_spill] sm:$0xff]  ;;  %v9419_v45 = vld [vmem:[#allocation303_spill] sm:$0xff]  ;;  %v9431_v44 = vld [vmem:[#allocation393_spill] sm:$0xff] }
 0x424   :  { %v2048_v6 = vpop.permute.xlu0 %2047  ;;  %v2446_v27 = vsel %vm2389_vm7, %v2381_v10, %v9416_v0  ;;  %v2480_v21 = vsel %vm2454_vm8, %v2415_v35, %v9417_v49  ;;  %v9427_v47 = vld [vmem:[#allocation87_spill] sm:$0xff] }
 0x425   :  { %3341 = vst [vmem:[#allocation2 + $0x110] sm:$0xff] %v3277_v38  ;;  %v2640_v29 = vsel %vm2584_vm10, %v2575_v4, %v2048_v6  ;;  %v9418_v4 = vld [vmem:[#allocation260_spill] sm:$0xff]  ;;  %v9430_v25 = vld [vmem:[#allocation263_spill] sm:$0xff] }
 0x426   :  { %3614 = vmatmul.mubr.msk.f32.gmra.mxu1 %vm2661_vm11, %v2640_v29  ;;  %v2252_v6 = vsel %vm2194_vm4, %v2187_v1, %v9418_v4  ;;  %v2511_v29 = vsel %vm2454_vm8, %v2446_v27, %v1644_v30  ;;  %v9432_v27 = vld [vmem:[#allocation282_spill] sm:$0xff] }
 0x427   :  { %v1784_v12 = vpop.permute.xlu1 %1783  ;;  %v2317_v22 = vsel %vm2259_vm5, %v2252_v6, %v9419_v45  ;;  %v9434_v6 = vld [vmem:[#allocation339_spill] sm:$0xff] }
 0x428   :  { %v1646_v40 = vpop.permute.xlu0 %1645  ;;  %v2544_v32 = vsel %vm2519_vm9, %v2479_v31, %v1784_v12  ;;  %v2382_v43 = vsel %vm2324_vm6, %v2317_v22, %v9420_v60  ;;  %v9435_v22 = vld [vmem:[#allocation359_spill] sm:$0xff] }
 0x429   :  { %v2447_v57 = vsel %vm2389_vm7, %v2382_v43, %v9421_v17  ;;  %v9438_v43 = vld [vmem:[#allocation376_spill] sm:$0xff] }
 0x42b   :  { %v1786_v3 = vpop.permute.xlu1 %1785 }
 0x42c   :  { %v1848_v54 = vpop.permute.xlu0 %1847  ;;  %v2545_v12 = vsel %vm2519_vm9, %v2480_v21, %v1786_v3  ;;  %v9433_v21 = vld [vmem:[#allocation306_spill] sm:$0xff] }
 0x42d   :  { %v3540_v53 = vpop.f32.mrf.mxu0  ;;  %v2576_v19 = vsel %vm2519_vm9, %v2511_v29, %v1848_v54  ;;  %v2512_v54 = vsel %vm2454_vm8, %v2447_v57, %v1646_v40  ;;  %v2156_v40 = vsel %vm2129_vm3, %v3743_v48, %v9422_v18 }
 0x42e   :  { %v2950_v7 = vadd.f32 %v3540_v53, %v7662_v46  ;;  %v2221_v31 = vsel %vm2194_vm4, %v2156_v40, %v9423_v23 }
 0x42f   :  { %v1986_v5 = vpop.permute.xlu1 %1985  ;;  %v2944_v52 = vpop.f32.mrf.mxu0 }
 0x430   :  { %v3248_v34 = vmax.f32 %v2950_v7, 0.0  ;;  %v2609_v26 = vsel %vm2584_vm10, %v2544_v32, %v1986_v5  ;;  %v2945_v24 = vadd.f32 %v7662_v46, %v2944_v52  ;;  %v1850_v16 = vpop.permute.xlu0 %1849  ;;  %v9424_v7 = vld [vmem:[#allocation283_spill] sm:$0xff]  ;;  %v3744_v5 = vld [vmem:[%s8119_s0 + $0x140] sm:$0xff]  ;;  %v9426_v52 = vld [vmem:[#allocation140_spill] sm:$0xff] }
 0x431   :  { %3568 = vmatprep.mubr.msk.f32.mxu0 %vm2661_vm11, %v2609_v26  ;;  %v2577_v15 = vsel %vm2519_vm9, %v2512_v54, %v1850_v16  ;;  %v2286_v20 = vsel %vm2259_vm5, %v2221_v31, %v9424_v7  ;;  %v2157_v14 = vsel %vm2129_vm3, %v3744_v5, %v9426_v52  ;;  %v9428_v26 = vld [vmem:[#allocation222_spill] sm:$0xff] }
 0x432   :  { %3312 = vst [vmem:[#allocation2 + $0x28] sm:$0xff] %v3248_v34  ;;  %v3247_v55 = vmax.f32 %v2945_v24, 0.0  ;;  %v3588_v38 = vpop.f32.mrf.mxu1  ;;  %v2351_v56 = vsel %vm2324_vm6, %v2286_v20, %v9425_v39  ;;  %v2188_v34 = vsel %vm2129_vm3, %v7148_v61, %v9427_v47  ;;  %v2222_v10 = vsel %vm2194_vm4, %v2157_v14, %v9429_v33  ;;  %v9440_v54 = vld [vmem:[#allocation262_spill] sm:$0xff]  ;;  %v3745_v33 = vld [vmem:[%s8119_s0 + $0x150] sm:$0xff] }
 0x433   :  { %v3110_v37 = vadd.f32 %v3588_v38, %v7662_v46  ;;  %v1988_v63 = vpop.permute.xlu1 %1987  ;;  %v2416_v24 = vsel %vm2389_vm7, %v2351_v56, %v9428_v26  ;;  %v2253_v35 = vsel %vm2194_vm4, %v2188_v34, %v9430_v25  ;;  %v2287_v49 = vsel %vm2259_vm5, %v2222_v10, %v9432_v27  ;;  %v9442_v7 = vld [vmem:[#allocation86_spill] sm:$0xff]  ;;  %v9443_v56 = vld [vmem:[#allocation375_spill] sm:$0xff]  ;;  %v9445_v25 = vld [vmem:[#allocation224_spill] sm:$0xff] }
 0x434   :  { %3311 = vst [vmem:[#allocation2 + $0x20] sm:$0xff] %v3247_v55  ;;  %v2610_v50 = vsel %vm2584_vm10, %v2545_v12, %v1988_v63  ;;  %v3104_v13 = vpop.f32.mrf.mxu1  ;;  %v2050_v2 = vpop.permute.xlu0 %2049  ;;  %v2481_v1 = vsel %vm2454_vm8, %v2416_v24, %v9431_v44  ;;  %v2318_v61 = vsel %vm2259_vm5, %v2253_v35, %v9433_v21  ;;  %v2352_v29 = vsel %vm2324_vm6, %v2287_v49, %v9434_v6  ;;  %v9444_v10 = vld [vmem:[#allocation146_spill] sm:$0xff]  ;;  %v9446_v44 = vld [vmem:[#allocation285_spill] sm:$0xff] }
 0x435   :  { %v3280_v59 = vmax.f32 %v3110_v37, 0.0  ;;  %v3105_v30 = vadd.f32 %v7662_v46, %v3104_v13  ;;  %v2641_v3 = vsel %vm2584_vm10, %v2576_v19, %v2050_v2  ;;  %3569 = vmatmul.mubr.msk.f32.gmra.mxu0 %vm2661_vm11, %v2610_v50  ;;  %v2383_v19 = vsel %vm2324_vm6, %v2318_v61, %v9435_v22  ;;  %v9436_v50 = vld [vmem:[#allocation221_spill] sm:$0xff]  ;;  %v9447_v27 = vld [vmem:[#allocation342_spill] sm:$0xff]  ;;  %v3746_v61 = vld [vmem:[%s8119_s0 + $0x158] sm:$0xff] }
 0x436   :  { %3616 = vmatprep.mubr.msk.f32.mxu1 %vm2661_vm11, %v2641_v3  ;;  %v2417_v13 = vsel %vm2389_vm7, %v2352_v29, %v9436_v50  ;;  %v9437_v2 = vld [vmem:[#allocation85_spill] sm:$0xff]  ;;  %v9450_v29 = vld [vmem:[#allocation226_spill] sm:$0xff] }
 0x437   :  { %3344 = vst [vmem:[#allocation2 + $0x128] sm:$0xff] %v3280_v59  ;;  %v3279_v36 = vmax.f32 %v3105_v30, 0.0  ;;  %v1648_v9 = vpop.permute.xlu1 %1647  ;;  %v2189_v60 = vsel %vm2129_vm3, %v7179_v28, %v9437_v2  ;;  %v2448_v59 = vsel %vm2389_vm7, %v2383_v19, %v9438_v43  ;;  %v9439_v30 = vld [vmem:[#allocation392_spill] sm:$0xff]  ;;  %v9441_v28 = vld [vmem:[#allocation305_spill] sm:$0xff]  ;;  %v9453_v50 = vld [vmem:[#allocation74_spill] sm:$0xff] }
 0x438   :  { %v2052_v41 = vpop.permute.xlu0 %2051  ;;  %v2482_v3 = vsel %vm2454_vm8, %v2417_v13, %v9439_v30  ;;  %v9452_v22 = vld [vmem:[#allocation265_spill] sm:$0xff] }
 0x439   :  { %3343 = vst [vmem:[#allocation2 + $0x120] sm:$0xff] %v3279_v36  ;;  %v2642_v53 = vsel %vm2584_vm10, %v2577_v15, %v2052_v41  ;;  %v2254_v36 = vsel %vm2194_vm4, %v2189_v60, %v9440_v54  ;;  %v2513_v15 = vsel %vm2454_vm8, %v2448_v59, %v1648_v9  ;;  %v9454_v60 = vld [vmem:[#allocation284_spill] sm:$0xff] }
 0x43a   :  { %3617 = vmatmul.mubr.msk.f32.gmra.mxu1 %vm2661_vm11, %v2642_v53  ;;  %v2319_v48 = vsel %vm2259_vm5, %v2254_v36, %v9441_v28  ;;  %v9455_v59 = vld [vmem:[#allocation308_spill] sm:$0xff] }
 0x43b   :  { %v1788_v51 = vpop.permute.xlu1 %1787  ;;  %v2384_v20 = vsel %vm2324_vm6, %v2319_v48, %v9442_v7  ;;  %v9458_v48 = vld [vmem:[#allocation225_spill] sm:$0xff]  ;;  %v9460_v7 = vld [vmem:[#allocation378_spill] sm:$0xff] }
 0x43c   :  { %v1650_v42 = vpop.permute.xlu0 %1649  ;;  %v2546_v55 = vsel %vm2519_vm9, %v2481_v1, %v1788_v51  ;;  %v2449_v5 = vsel %vm2389_vm7, %v2384_v20, %v9443_v56 }
 0x43f   :  { %v1790_v62 = vpop.permute.xlu1 %1789 }
 0x440   :  { %v1852_v32 = vpop.permute.xlu0 %1851  ;;  %v2547_v41 = vsel %vm2519_vm9, %v2482_v3, %v1790_v62 }
 0x441   :  { %v3543_v16 = vpop.f32.mrf.mxu0  ;;  %v2578_v18 = vsel %vm2519_vm9, %v2513_v15, %v1852_v32  ;;  %v2514_v32 = vsel %vm2454_vm8, %v2449_v5, %v1650_v42  ;;  %v2158_v42 = vsel %vm2129_vm3, %v3745_v33, %v9444_v10  ;;  %v9462_v5 = vld [vmem:[#allocation264_spill] sm:$0xff] }
 0x442   :  { %v2960_v0 = vadd.f32 %v3543_v16, %v7662_v46  ;;  %v2223_v35 = vsel %vm2194_vm4, %v2158_v42, %v9445_v25 }
 0x443   :  { %v1990_v38 = vpop.permute.xlu1 %1989  ;;  %v2954_v4 = vpop.f32.mrf.mxu0  ;;  %v2288_v1 = vsel %vm2259_vm5, %v2223_v35, %v9446_v44  ;;  %v9464_v44 = vld [vmem:[#allocation360_spill] sm:$0xff] }
 0x444   :  { %v3250_v12 = vmax.f32 %v2960_v0, 0.0  ;;  %v2611_v37 = vsel %vm2584_vm10, %v2546_v55, %v1990_v38  ;;  %v2955_v63 = vadd.f32 %v7662_v46, %v2954_v4  ;;  %v1854_v45 = vpop.permute.xlu0 %1853  ;;  %v2353_v49 = vsel %vm2324_vm6, %v2288_v1, %v9447_v27  ;;  %v9448_v55 = vld [vmem:[#allocation144_spill] sm:$0xff] }
 0x445   :  { %3571 = vmatprep.mubr.msk.f32.mxu0 %vm2661_vm11, %v2611_v37  ;;  %v2579_v47 = vsel %vm2519_vm9, %v2514_v32, %v1854_v45  ;;  %v2159_v38 = vsel %vm2129_vm3, %v3746_v61, %v9448_v55  ;;  %v9449_v4 = vld [vmem:[#allocation92_spill] sm:$0xff] }
 0x446   :  { %3314 = vst [vmem:[#allocation2 + $0x38] sm:$0xff] %v3250_v12  ;;  %v3249_v17 = vmax.f32 %v2955_v63, 0.0  ;;  %v3591_v57 = vpop.f32.mrf.mxu1  ;;  %v2190_v6 = vsel %vm2129_vm3, %v7244_v11, %v9449_v4  ;;  %v2418_v12 = vsel %vm2389_vm7, %v2353_v49, %v9450_v29  ;;  %v9451_v63 = vld [vmem:[#allocation223_spill] sm:$0xff]  ;;  %v9465_v49 = vld [vmem:[#allocation377_spill] sm:$0xff] }
 0x447   :  { %v3120_v53 = vadd.f32 %v3591_v57, %v7662_v46  ;;  %v1992_v51 = vpop.permute.xlu1 %1991  ;;  %v2224_v45 = vsel %vm2194_vm4, %v2159_v38, %v9451_v63  ;;  %v2255_v19 = vsel %vm2194_vm4, %v2190_v6, %v9452_v22  ;;  %v2483_v13 = vsel %vm2454_vm8, %v2418_v12, %v9453_v50  ;;  %v9456_v57 = vld [vmem:[#allocation341_spill] sm:$0xff]  ;;  %v3748_v50 = vld [vmem:[%s8119_s0 + $0x168] sm:$0xff] }
 0x448   :  { %3313 = vst [vmem:[#allocation2 + $0x30] sm:$0xff] %v3249_v17  ;;  %v2612_v40 = vsel %vm2584_vm10, %v2547_v41, %v1992_v51  ;;  %v3114_v23 = vpop.f32.mrf.mxu1  ;;  %v2054_v31 = vpop.permute.xlu0 %2053  ;;  %v2289_v43 = vsel %vm2259_vm5, %v2224_v45, %v9454_v60  ;;  %v2320_v11 = vsel %vm2259_vm5, %v2255_v19, %v9455_v59  ;;  %v9457_v51 = vld [vmem:[#allocation361_spill] sm:$0xff]  ;;  %v9468_v60 = vld [vmem:[#allocation267_spill] sm:$0xff] }
 0x449   :  { %v3282_v39 = vmax.f32 %v3120_v53, 0.0  ;;  %v3115_v9 = vadd.f32 %v7662_v46, %v3114_v23  ;;  %v2643_v62 = vsel %vm2584_vm10, %v2578_v18, %v2054_v31  ;;  %3572 = vmatmul.mubr.msk.f32.gmra.mxu0 %vm2661_vm11, %v2612_v40  ;;  %v2354_v54 = vsel %vm2324_vm6, %v2289_v43, %v9456_v57  ;;  %v3747_v40 = vld [vmem:[%s8119_s0 + $0x308] sm:$0xff]  ;;  %v9466_v22 = vld [vmem:[#allocation97_spill] sm:$0xff]  ;;  %v9471_v57 = vld [vmem:[#allocation228_spill] sm:$0xff] }
 0x44a   :  { %3619 = vmatprep.mubr.msk.f32.mxu1 %vm2661_vm11, %v2643_v62  ;;  %v2385_v28 = vsel %vm2324_vm6, %v2320_v11, %v9457_v51  ;;  %v2419_v18 = vsel %vm2389_vm7, %v2354_v54, %v9458_v48  ;;  %v9459_v23 = vld [vmem:[#allocation90_spill] sm:$0xff]  ;;  %v2192_v19 = vsel %vm2129_vm3, %v7337_v8, %v9466_v22  ;;  %v3749_v11 = vld [vmem:[%s8119_s0 + $0x170] sm:$0xff] }
 0x44b   :  { %3346 = vst [vmem:[#allocation2 + $0x138] sm:$0xff] %v3282_v39  ;;  %v3281_v52 = vmax.f32 %v3115_v9, 0.0  ;;  %v1652_v14 = vpop.permute.xlu1 %1651  ;;  %v2191_v31 = vsel %vm2129_vm3, %v3747_v40, %v9459_v23  ;;  %v2450_v20 = vsel %vm2389_vm7, %v2385_v28, %v9460_v7  ;;  %v9461_v39 = vld [vmem:[#allocation17_spill] sm:$0xff]  ;;  %v2257_v43 = vsel %vm2194_vm4, %v2192_v19, %v9468_v60  ;;  %v9473_v51 = vld [vmem:[#allocation287_spill] sm:$0xff] }
 0x44c   :  { %v2056_v34 = vpop.permute.xlu0 %2055  ;;  %v2484_v9 = vsel %vm2454_vm8, %v2419_v18, %v9461_v39  ;;  %v2256_v32 = vsel %vm2194_vm4, %v2191_v31, %v9462_v5  ;;  %v9474_v48 = vld [vmem:[#allocation363_spill] sm:$0xff] }
 0x44d   :  { %3345 = vst [vmem:[#allocation2 + $0x130] sm:$0xff] %v3281_v52  ;;  %v2644_v26 = vsel %vm2584_vm10, %v2579_v47, %v2056_v34  ;;  %v2515_v52 = vsel %vm2454_vm8, %v2450_v20, %v1652_v14  ;;  %v9475_v7 = vld [vmem:[#allocation227_spill] sm:$0xff]  ;;  %v9476_v20 = vld [vmem:[#allocation266_spill] sm:$0xff] }
 0x44e   :  { %3620 = vmatmul.mubr.msk.f32.gmra.mxu1 %vm2661_vm11, %v2644_v26 }
 0x44f   :  { %v1792_v24 = vpop.permute.xlu1 %1791 }
 0x450   :  { %v1654_v16 = vpop.permute.xlu0 %1653  ;;  %v2548_v30 = vsel %vm2519_vm9, %v2483_v13, %v1792_v24  ;;  %v9463_v24 = vld [vmem:[#allocation307_spill] sm:$0xff]  ;;  %v9467_v13 = vld [vmem:[#allocation150_spill] sm:$0xff] }
 0x451   :  { %v2321_v33 = vsel %vm2259_vm5, %v2256_v32, %v9463_v24  ;;  %v9479_v32 = vld [vmem:[#allocation286_spill] sm:$0xff] }
 0x452   :  { %v2386_v1 = vsel %vm2324_vm6, %v2321_v33, %v9464_v44 }
 0x453   :  { %v1794_v0 = vpop.permute.xlu1 %1793  ;;  %v2451_v61 = vsel %vm2389_vm7, %v2386_v1, %v9465_v49  ;;  %v9484_v49 = vld [vmem:[#allocation362_spill] sm:$0xff] }
 0x454   :  { %v1856_v21 = vpop.permute.xlu0 %1855  ;;  %v2549_v47 = vsel %vm2519_vm9, %v2484_v9, %v1794_v0  ;;  %v9477_v9 = vld [vmem:[#allocation344_spill] sm:$0xff] }
 0x455   :  { %v3546_v37 = vpop.f32.mrf.mxu0  ;;  %v2580_v10 = vsel %vm2519_vm9, %v2515_v52, %v1856_v21  ;;  %v2516_v21 = vsel %vm2454_vm8, %v2451_v61, %v1654_v16 }
 0x456   :  { %v2970_v2 = vadd.f32 %v3546_v37, %v7662_v46 }
 0x457   :  { %v1994_v3 = vpop.permute.xlu1 %1993  ;;  %v2964_v17 = vpop.f32.mrf.mxu0 }
 0x458   :  { %v3252_v36 = vmax.f32 %v2970_v2, 0.0  ;;  %v2613_v15 = vsel %vm2584_vm10, %v2548_v30, %v1994_v3  ;;  %v2965_v41 = vadd.f32 %v7662_v46, %v2964_v17  ;;  %v1858_v53 = vpop.permute.xlu0 %1857  ;;  %v2160_v2 = vsel %vm2129_vm3, %v3748_v50, %v9467_v13  ;;  %v9469_v30 = vld [vmem:[#allocation148_spill] sm:$0xff]  ;;  %v9470_v3 = vld [vmem:[#allocation95_spill] sm:$0xff] }
 0x459   :  { %3574 = vmatprep.mubr.msk.f32.mxu0 %vm2661_vm11, %v2613_v15  ;;  %v2581_v4 = vsel %vm2519_vm9, %v2516_v21, %v1858_v53  ;;  %v2161_v8 = vsel %vm2129_vm3, %v3749_v11, %v9469_v30  ;;  %v2193_v17 = vsel %vm2129_vm3, %v7368_v58, %v9470_v3  ;;  %v2225_v54 = vsel %vm2194_vm4, %v2160_v2, %v9471_v57 }
 0x45a   :  { %3316 = vst [vmem:[#allocation2 + $0x48] sm:$0xff] %v3252_v36  ;;  %v3251_v62 = vmax.f32 %v2965_v41, 0.0  ;;  %v3594_v56 = vpop.f32.mrf.mxu1  ;;  %v9472_v36 = vld [vmem:[#allocation310_spill] sm:$0xff]  ;;  %v2290_v28 = vsel %vm2259_vm5, %v2225_v54, %v9473_v51  ;;  %v2226_v58 = vsel %vm2194_vm4, %v2161_v8, %v9475_v7  ;;  %v2258_v39 = vsel %vm2194_vm4, %v2193_v17, %v9476_v20 }
 0x45b   :  { %v3130_v34 = vadd.f32 %v3594_v56, %v7662_v46  ;;  %v1996_v26 = vpop.permute.xlu1 %1995  ;;  %v2322_v15 = vsel %vm2259_vm5, %v2257_v43, %v9472_v36  ;;  %v9478_v56 = vld [vmem:[#allocation380_spill] sm:$0xff]  ;;  %v2291_v52 = vsel %vm2259_vm5, %v2226_v58, %v9479_v32 }
 0x45c   :  { %3315 = vst [vmem:[#allocation2 + $0x40] sm:$0xff] %v3251_v62  ;;  %v2614_v42 = vsel %vm2584_vm10, %v2549_v47, %v1996_v26  ;;  %v3124_v25 = vpop.f32.mrf.mxu1  ;;  %v2058_v35 = vpop.permute.xlu0 %2057  ;;  %v2387_v18 = vsel %vm2324_vm6, %v2322_v15, %v9474_v48  ;;  %v2355_v62 = vsel %vm2324_vm6, %v2290_v28, %v9477_v9  ;;  %v9480_v47 = vld [vmem:[#allocation230_spill] sm:$0xff] }
 0x45d   :  { %v3284_v27 = vmax.f32 %v3130_v34, 0.0  ;;  %v3125_v14 = vadd.f32 %v7662_v46, %v3124_v25  ;;  %v2645_v0 = vsel %vm2584_vm10, %v2580_v10, %v2058_v35  ;;  %3575 = vmatmul.mubr.msk.f32.gmra.mxu0 %vm2661_vm11, %v2614_v42  ;;  %v2452_v5 = vsel %vm2389_vm7, %v2387_v18, %v9478_v56  ;;  %v9481_v10 = vld [vmem:[#allocation309_spill] sm:$0xff] }
 0x45e   :  { %3622 = vmatprep.mubr.msk.f32.mxu1 %vm2661_vm11, %v2645_v0  ;;  %v2420_v34 = vsel %vm2389_vm7, %v2355_v62, %v9480_v47  ;;  %v2323_v42 = vsel %vm2259_vm5, %v2258_v39, %v9481_v10  ;;  %v9482_v25 = vld [vmem:[#allocation73_spill] sm:$0xff] }
 0x45f   :  { %3348 = vst [vmem:[#allocation2 + $0x148] sm:$0xff] %v3284_v27  ;;  %v3283_v55 = vmax.f32 %v3125_v14, 0.0  ;;  %v1656_v38 = vpop.permute.xlu1 %1655  ;;  %v2485_v35 = vsel %vm2454_vm8, %v2420_v34, %v9482_v25  ;;  %v9483_v14 = vld [vmem:[#allocation343_spill] sm:$0xff]  ;;  %v2388_v61 = vsel %vm2324_vm6, %v2323_v42, %v9484_v49 }
 0x460   :  { %v2060_v6 = vpop.permute.xlu0 %2059  ;;  %v2517_v26 = vsel %vm2454_vm8, %v2452_v5, %v1656_v38  ;;  %v2356_v0 = vsel %vm2324_vm6, %v2291_v52, %v9483_v14 }
 0x461   :  { %3347 = vst [vmem:[#allocation2 + $0x140] sm:$0xff] %v3283_v55  ;;  %v2646_v29 = vsel %vm2584_vm10, %v2581_v4, %v2060_v6  ;;  %v9485_v6 = vld [vmem:[#allocation379_spill] sm:$0xff] }
 0x462   :  { %3623 = vmatmul.mubr.msk.f32.gmra.mxu1 %vm2661_vm11, %v2646_v29  ;;  %v2453_v29 = vsel %vm2389_vm7, %v2388_v61, %v9485_v6 }
 0x463   :  { %v1658_v12 = vpop.permute.xlu1 %1657 }
 0x464   :  { %v1594_v37 = vpop.permute.xlu0 %1593 }
 0x467   :  { %v1860_v63 = vpop.permute.xlu1 %1859 }
 0x468   :  { %v1796_v45 = vpop.permute.xlu0 %1795  ;;  %v2582_v44 = vsel %vm2519_vm9, %v2517_v26, %v1860_v63 }
 0x469   :  { %v3549_v16 = vpop.f32.mrf.mxu0  ;;  %v2550_v21 = vsel %vm2519_vm9, %v2485_v35, %v1796_v45  ;;  %v2518_v45 = vsel %vm2454_vm8, %v2453_v29, %v1658_v12 }
 0x46a   :  { %v2980_v59 = vadd.f32 %v3549_v16, %v7662_v46  ;;  %v9486_v16 = vld [vmem:[#allocation229_spill] sm:$0xff] }
 0x46b   :  { %v1862_v41 = vpop.permute.xlu1 %1861  ;;  %v2974_v53 = vpop.f32.mrf.mxu0  ;;  %v2421_v50 = vsel %vm2389_vm7, %v2356_v0, %v9486_v16 }
 0x46c   :  { %v3254_v40 = vmax.f32 %v2980_v59, 0.0  ;;  %v2975_v23 = vadd.f32 %v7662_v46, %v2974_v53  ;;  %v1798_v31 = vpop.permute.xlu0 %1797  ;;  %v2486_v13 = vsel %vm2454_vm8, %v2421_v50, %v1594_v37  ;;  %v2583_v2 = vsel %vm2519_vm9, %v2518_v45, %v1862_v41 }
 0x46d   :  { %v2551_v59 = vsel %vm2519_vm9, %v2486_v13, %v1798_v31 }
 0x46e   :  { %3318 = vst [vmem:[#allocation2 + $0x58] sm:$0xff] %v3254_v40  ;;  %v3253_v24 = vmax.f32 %v2975_v23, 0.0  ;;  %v3597_v33 = vpop.f32.mrf.mxu1 }
 0x46f   :  { %v3140_v1 = vadd.f32 %v3597_v33, %v7662_v46  ;;  %v2062_v27 = vpop.permute.xlu1 %2061 }
 0x470   :  { %3317 = vst [vmem:[#allocation2 + $0x50] sm:$0xff] %v3253_v24  ;;  %v2647_v55 = vsel %vm2584_vm10, %v2582_v44, %v2062_v27  ;;  %v3134_v38 = vpop.f32.mrf.mxu1  ;;  %v1998_v4 = vpop.permute.xlu0 %1997 }
 0x471   :  { %v3286_v63 = vmax.f32 %v3140_v1, 0.0  ;;  %v3135_v22 = vadd.f32 %v7662_v46, %v3134_v38  ;;  %v2615_v19 = vsel %vm2584_vm10, %v2550_v21, %v1998_v4  ;;  %3625 = vmatprep.mubr.msk.f32.mxu1 %vm2661_vm11, %v2647_v55 }
 0x472   :  { %3577 = vmatprep.mubr.msk.f32.mxu0 %vm2661_vm11, %v2615_v19 }
 0x473   :  { %3350 = vst [vmem:[#allocation2 + $0x158] sm:$0xff] %v3286_v63  ;;  %v3285_v60 = vmax.f32 %v3135_v22, 0.0  ;;  %v2064_v43 = vpop.permute.xlu1 %2063 }
 0x474   :  { %v2648_v11 = vsel %vm2584_vm10, %v2583_v2, %v2064_v43  ;;  %v2000_v30 = vpop.permute.xlu0 %1999 }
 0x475   :  { %3349 = vst [vmem:[#allocation2 + $0x150] sm:$0xff] %v3285_v60  ;;  %v2616_v8 = vsel %vm2584_vm10, %v2551_v59, %v2000_v30  ;;  %3626 = vmatmul.mubr.msk.f32.gmra.mxu1 %vm2661_vm11, %v2648_v11 }
 0x476   :  { %3578 = vmatmul.mubr.msk.f32.gmra.mxu0 %vm2661_vm11, %v2616_v8 }
 0x47d   :  { %v3552_v12 = vpop.f32.mrf.mxu0 }
 0x47e   :  { %v2990_v37 = vadd.f32 %v3552_v12, %v7662_v46 }
 0x47f   :  { %v2984_v3 = vpop.f32.mrf.mxu0 }
 0x480   :  { %v3256_v17 = vmax.f32 %v2990_v37, 0.0  ;;  %v2985_v57 = vadd.f32 %v7662_v46, %v2984_v3 }
 0x482   :  { %3320 = vst [vmem:[#allocation2 + $0x68] sm:$0xff] %v3256_v17  ;;  %v3255_v54 = vmax.f32 %v2985_v57, 0.0  ;;  %v3600_v36 = vpop.f32.mrf.mxu1 }
 0x483   :  { %v3150_v15 = vadd.f32 %v3600_v36, %v7662_v46 }
 0x484   :  { %3319 = vst [vmem:[#allocation2 + $0x60] sm:$0xff] %v3255_v54  ;;  %v3144_v41 = vpop.f32.mrf.mxu1 }
 0x485   :  { %v3288_v53 = vmax.f32 %v3150_v15, 0.0  ;;  %v3145_v51 = vadd.f32 %v7662_v46, %v3144_v41 }
 0x487   :  { %3352 = vst [vmem:[#allocation2 + $0x168] sm:$0xff] %v3288_v53  ;;  %v3287_v28 = vmax.f32 %v3145_v51, 0.0 }
 0x489   :  { %3351 = vst [vmem:[#allocation2 + $0x160] sm:$0xff] %v3287_v28 }
 0x491   :  { %v3555_v48 = vpop.f32.mrf.mxu0 }
 0x492   :  { %v3000_v18 = vadd.f32 %v3555_v48, %v7662_v46 }
 0x493   :  { %v2994_v40 = vpop.f32.mrf.mxu0 }
 0x494   :  { %v3258_v23 = vmax.f32 %v3000_v18, 0.0  ;;  %v2995_v31 = vadd.f32 %v7662_v46, %v2994_v40 }
 0x496   :  { %3322 = vst [vmem:[#allocation2 + $0x78] sm:$0xff] %v3258_v23  ;;  %v3257_v7 = vmax.f32 %v2995_v31, 0.0  ;;  %v3603_v58 = vpop.f32.mrf.mxu1 }
 0x497   :  { %v3160_v20 = vadd.f32 %v3603_v58, %v7662_v46 }
 0x498   :  { %3321 = vst [vmem:[#allocation2 + $0x70] sm:$0xff] %v3257_v7  ;;  %v3154_v39 = vpop.f32.mrf.mxu1 }
 0x499   :  { %v3290_v9 = vmax.f32 %v3160_v20, 0.0  ;;  %v3155_v62 = vadd.f32 %v7662_v46, %v3154_v39 }
 0x49b   :  { %3354 = vst [vmem:[#allocation2 + $0x178] sm:$0xff] %v3290_v9  ;;  %v3289_v56 = vmax.f32 %v3155_v62, 0.0 }
 0x49d   :  { %3353 = vst [vmem:[#allocation2 + $0x170] sm:$0xff] %v3289_v56 }
 0x4a5   :  { %v3558_v5 = vpop.f32.mrf.mxu0 }
 0x4a6   :  { %v3010_v32 = vadd.f32 %v3558_v5, %v7662_v46 }
 0x4a7   :  { %v3004_v52 = vpop.f32.mrf.mxu0 }
 0x4a8   :  { %v3260_v47 = vmax.f32 %v3010_v32, 0.0  ;;  %v3005_v34 = vadd.f32 %v7662_v46, %v3004_v52 }
 0x4aa   :  { %3324 = vst [vmem:[#allocation2 + $0x88] sm:$0xff] %v3260_v47  ;;  %v3259_v26 = vmax.f32 %v3005_v34, 0.0  ;;  %v3606_v24 = vpop.f32.mrf.mxu1 }
 0x4ab   :  { %v3170_v33 = vadd.f32 %v3606_v24, %v7662_v46 }
 0x4ac   :  { %3323 = vst [vmem:[#allocation2 + $0x80] sm:$0xff] %v3259_v26  ;;  %v3164_v10 = vpop.f32.mrf.mxu1 }
 0x4ad   :  { %v3292_v42 = vmax.f32 %v3170_v33, 0.0  ;;  %v3165_v25 = vadd.f32 %v7662_v46, %v3164_v10 }
 0x4af   :  { %3356 = vst [vmem:[#allocation2 + $0x188] sm:$0xff] %v3292_v42  ;;  %v3291_v35 = vmax.f32 %v3165_v25, 0.0 }
 0x4b1   :  { %3355 = vst [vmem:[#allocation2 + $0x180] sm:$0xff] %v3291_v35 }
 0x4b9   :  { %v3561_v44 = vpop.f32.mrf.mxu0 }
 0x4ba   :  { %v3020_v1 = vadd.f32 %v3561_v44, %v7662_v46 }
 0x4bb   :  { %v3014_v27 = vpop.f32.mrf.mxu0 }
 0x4bc   :  { %v3262_v14 = vmax.f32 %v3020_v1, 0.0  ;;  %v3015_v0 = vadd.f32 %v7662_v46, %v3014_v27 }
 0x4be   :  { %3326 = vst [vmem:[#allocation2 + $0x98] sm:$0xff] %v3262_v14  ;;  %v3261_v49 = vmax.f32 %v3015_v0, 0.0  ;;  %v3609_v61 = vpop.f32.mrf.mxu1 }
 0x4bf   :  { %v3180_v21 = vadd.f32 %v3609_v61, %v7662_v46 }
 0x4c0   :  { %3325 = vst [vmem:[#allocation2 + $0x90] sm:$0xff] %v3261_v49  ;;  %v3174_v55 = vpop.f32.mrf.mxu1 }
 0x4c1   :  { %v3294_v38 = vmax.f32 %v3180_v21, 0.0  ;;  %v3175_v4 = vadd.f32 %v7662_v46, %v3174_v55 }
 0x4c3   :  { %3358 = vst [vmem:[#allocation2 + $0x198] sm:$0xff] %v3294_v38  ;;  %v3293_v6 = vmax.f32 %v3175_v4, 0.0 }
 0x4c5   :  { %3357 = vst [vmem:[#allocation2 + $0x190] sm:$0xff] %v3293_v6  ;;  %v3750_v6 = vld [vmem:[%s8121_s2] ss:$0 sm:$0xff] }
 0x4cd   :  { %v3564_v29 = vpop.f32.mrf.mxu0 }
 0x4ce   :  { %v3030_v63 = vadd.f32 %v3564_v29, %v7662_v46 }
 0x4cf   :  { %v3024_v22 = vpop.f32.mrf.mxu0 }
 0x4d0   :  { %v3264_v19 = vmax.f32 %v3030_v63, 0.0  ;;  %v3025_v16 = vadd.f32 %v7662_v46, %v3024_v22 }
 0x4d2   :  { %3328 = vst [vmem:[#allocation2 + $0xa8] sm:$0xff] %v3264_v19  ;;  %v3263_v50 = vmax.f32 %v3025_v16, 0.0  ;;  %v3612_v45 = vpop.f32.mrf.mxu1 }
 0x4d3   :  { %v3190_v13 = vadd.f32 %v3612_v45, %v7662_v46 }
 0x4d4   :  { %3327 = vst [vmem:[#allocation2 + $0xa0] sm:$0xff] %v3263_v50  ;;  %v3184_v2 = vpop.f32.mrf.mxu1 }
 0x4d5   :  { %v3296_v60 = vmax.f32 %v3190_v13, 0.0  ;;  %v3185_v43 = vadd.f32 %v7662_v46, %v3184_v2 }
 0x4d7   :  { %3360 = vst [vmem:[#allocation2 + $0x1a8] sm:$0xff] %v3296_v60  ;;  %v3295_v59 = vmax.f32 %v3185_v43, 0.0 }
 0x4d9   :  { %3359 = vst [vmem:[#allocation2 + $0x1a0] sm:$0xff] %v3295_v59 }
 0x4e1   :  { %v3567_v11 = vpop.f32.mrf.mxu0 }
 0x4e2   :  { %v3040_v30 = vadd.f32 %v3567_v11, %v7662_v46 }
 0x4e3   :  { %v3034_v8 = vpop.f32.mrf.mxu0 }
 0x4e4   :  { %v3266_v12 = vmax.f32 %v3040_v30, 0.0  ;;  %v3035_v37 = vadd.f32 %v7662_v46, %v3034_v8 }
 0x4e6   :  { %3330 = vst [vmem:[#allocation2 + $0xb8] sm:$0xff] %v3266_v12  ;;  %v3265_v3 = vmax.f32 %v3035_v37, 0.0  ;;  %v3615_v17 = vpop.f32.mrf.mxu1 }
 0x4e7   :  { %v3200_v57 = vadd.f32 %v3615_v17, %v7662_v46 }
 0x4e8   :  { %3329 = vst [vmem:[#allocation2 + $0xb0] sm:$0xff] %v3265_v3  ;;  %v3194_v54 = vpop.f32.mrf.mxu1 }
 0x4e9   :  { %v3298_v36 = vmax.f32 %v3200_v57, 0.0  ;;  %v3195_v15 = vadd.f32 %v7662_v46, %v3194_v54 }
 0x4eb   :  { %3362 = vst [vmem:[#allocation2 + $0x1b8] sm:$0xff] %v3298_v36  ;;  %v3297_v41 = vmax.f32 %v3195_v15, 0.0 }
 0x4ed   :  { %3361 = vst [vmem:[#allocation2 + $0x1b0] sm:$0xff] %v3297_v41 }
 0x4f5   :  { %v3570_v53 = vpop.f32.mrf.mxu0 }
 0x4f6   :  { %v3050_v51 = vadd.f32 %v3570_v53, %v7662_v46 }
 0x4f7   :  { %v3044_v28 = vpop.f32.mrf.mxu0 }
 0x4f8   :  { %v3268_v48 = vmax.f32 %v3050_v51, 0.0  ;;  %v3045_v18 = vadd.f32 %v7662_v46, %v3044_v28 }
 0x4fa   :  { %3332 = vst [vmem:[#allocation2 + $0xc8] sm:$0xff] %v3268_v48  ;;  %v3267_v40 = vmax.f32 %v3045_v18, 0.0  ;;  %v3618_v23 = vpop.f32.mrf.mxu1 }
 0x4fb   :  { %v3210_v31 = vadd.f32 %v3618_v23, %v7662_v46 }
 0x4fc   :  { %3331 = vst [vmem:[#allocation2 + $0xc0] sm:$0xff] %v3267_v40  ;;  %v3204_v7 = vpop.f32.mrf.mxu1 }
 0x4fd   :  { %v3300_v58 = vmax.f32 %v3210_v31, 0.0  ;;  %v3205_v20 = vadd.f32 %v7662_v46, %v3204_v7 }
 0x4ff   :  { %3364 = vst [vmem:[#allocation2 + $0x1c8] sm:$0xff] %v3300_v58  ;;  %v3299_v39 = vmax.f32 %v3205_v20, 0.0 }
 0x501   :  { %3363 = vst [vmem:[#allocation2 + $0x1c0] sm:$0xff] %v3299_v39 }
 0x509   :  { %v3573_v9 = vpop.f32.mrf.mxu0 }
 0x50a   :  { %v3060_v62 = vadd.f32 %v3573_v9, %v7662_v46 }
 0x50b   :  { %v3054_v56 = vpop.f32.mrf.mxu0 }
 0x50c   :  { %v3270_v5 = vmax.f32 %v3060_v62, 0.0  ;;  %v3055_v32 = vadd.f32 %v7662_v46, %v3054_v56 }
 0x50e   :  { %3334 = vst [vmem:[#allocation2 + $0xd8] sm:$0xff] %v3270_v5  ;;  %v3269_v52 = vmax.f32 %v3055_v32, 0.0  ;;  %v3621_v47 = vpop.f32.mrf.mxu1 }
 0x50f   :  { %v3220_v34 = vadd.f32 %v3621_v47, %v7662_v46 }
 0x510   :  { %3333 = vst [vmem:[#allocation2 + $0xd0] sm:$0xff] %v3269_v52  ;;  %v3214_v26 = vpop.f32.mrf.mxu1 }
 0x511   :  { %v3302_v24 = vmax.f32 %v3220_v34, 0.0  ;;  %v3215_v33 = vadd.f32 %v7662_v46, %v3214_v26 }
 0x513   :  { %3366 = vst [vmem:[#allocation2 + $0x1d8] sm:$0xff] %v3302_v24  ;;  %v3301_v10 = vmax.f32 %v3215_v33, 0.0 }
 0x515   :  { %3365 = vst [vmem:[#allocation2 + $0x1d0] sm:$0xff] %v3301_v10 }
 0x51d   :  { %v3576_v42 = vpop.f32.mrf.mxu0 }
 0x51e   :  { %v3070_v25 = vadd.f32 %v3576_v42, %v7662_v46 }
 0x51f   :  { %v3064_v35 = vpop.f32.mrf.mxu0 }
 0x520   :  { %v3272_v44 = vmax.f32 %v3070_v25, 0.0  ;;  %v3065_v1 = vadd.f32 %v7662_v46, %v3064_v35 }
 0x522   :  { %3336 = vst [vmem:[#allocation2 + $0xe8] sm:$0xff] %v3272_v44  ;;  %v3271_v27 = vmax.f32 %v3065_v1, 0.0  ;;  %v3624_v14 = vpop.f32.mrf.mxu1 }
 0x523   :  { %v3230_v0 = vadd.f32 %v3624_v14, %v7662_v46 }
 0x524   :  { %3335 = vst [vmem:[#allocation2 + $0xe0] sm:$0xff] %v3271_v27  ;;  %v3224_v49 = vpop.f32.mrf.mxu1 }
 0x525   :  { %v3304_v61 = vmax.f32 %v3230_v0, 0.0  ;;  %v3225_v21 = vadd.f32 %v7662_v46, %v3224_v49 }
 0x527   :  { %3368 = vst [vmem:[#allocation2 + $0x1e8] sm:$0xff] %v3304_v61  ;;  %v3303_v55 = vmax.f32 %v3225_v21, 0.0 }
 0x529   :  { %3367 = vst [vmem:[#allocation2 + $0x1e0] sm:$0xff] %v3303_v55 }
 0x535   :  { %v3627_v38 = vpop.f32.mrf.mxu1 }
 0x536   :  { %v3579_v4 = vpop.f32.mrf.mxu0  ;;  %v3240_v29 = vadd.f32 %v3750_v6, %v3627_v38 }
 0x537   :  { %v3080_v63 = vadd.f32 %v3750_v6, %v3579_v4  ;;  %v3234_v22 = vpop.f32.mrf.mxu1 }
 0x538   :  { %v3306_v19 = vmax.f32 %v3240_v29, 0.0  ;;  %v3074_v16 = vpop.f32.mrf.mxu0  ;;  %v3235_v50 = vadd.f32 %v3750_v6, %v3234_v22 }
 0x539   :  { %v3274_v45 = vmax.f32 %v3080_v63, 0.0  ;;  %v3075_v13 = vadd.f32 %v3750_v6, %v3074_v16 }
 0x53a   :  { %3370 = vst [vmem:[#allocation2 + $0x1f8] sm:$0xff] %v3306_v19  ;;  %v3305_v46 = vmax.f32 %v3235_v50, 0.0 }
 0x53b   :  { %3338 = vst [vmem:[#allocation2 + $0xf8] sm:$0xff] %v3274_v45  ;;  %v3273_v2 = vmax.f32 %v3075_v13, 0.0 }
 0x53c   :  { %3369 = vst [vmem:[#allocation2 + $0x1f0] sm:$0xff] %v3305_v46 }
 0x53d   :  { %3337 = vst [vmem:[#allocation2 + $0xf0] sm:$0xff] %v3273_v2 }
 0x53e   :  { %3762 = shalt.err (!%p3759_p4)
}
 0x53f   :  { %s3782_s2 = smov 128  }
 0x540   :  { %3382 = dma.vmem_to_hbm [thread:$0]  %s3377_s18, 8192, %s8122_s3, [#allocation3], %s3782_s2, %s3782_s2, %s3774_s22  }
 0x541   :  { %3771 = dma.done.wait [#allocation3], 8192  }
 0x542   :  { %3772 = vsyncadd [#allocation3], 4294959104 }
 0x543   :  { %3386 = vsyncpa [#allocation3], 1 }

</bundles_post_ra>
